<compile_context>
chip_gen: v6e
topology: v6e:2x2x1
jax: 0.10.0
libtpu: 0.0.40
codegen_flags: <defaults>
</compile_context>

<pallas_src>
import functools

import jax
import jax.numpy as jnp
from jax import lax
from jax.experimental import pallas as pl
from jax.experimental.pallas import tpu as pltpu


# ----------------------------- hyper parameters -----------------------------
class H:
    N = 16          # encoder filters
    L = 8           # encoder filter length (stride = L // 2)
    B = 8           # bottleneck channels
    H = 16          # conv-block channels
    P = 3           # conv-block kernel size
    X = 2           # blocks per repeat
    R = 2           # repeats
    norm = 'gln'
    num_spks = 1    # forward's `w * m` broadcast only works for num_spks == 1
    activate = 'relu'   # defined but never applied in forward()
    causal = False
    skip_con = False
    init_phase = 'zero'
    n_fft = 16
    hop_size = 4
    win_size = 16


EPS = 1e-5
LANE = 128      # lane width; also the per-sample padded waveform slab width


def _round_up(x, m):
    return (x + m - 1) // m * m


# ------------------------------- fused kernel -------------------------------
def _gln(x, g, b, eps):
    """One-pass GlobalLayerNorm over the whole (time, channel) tile."""
    m = jnp.mean(x)
    msq = jnp.mean(x * x)
    var = jnp.maximum(msq - m * m, 0.0)
    inv = lax.rsqrt(var + eps)                  # one scalar rsqrt (EUP slot)
    return (x - m) * (g * inv) + b


def _fused_kernel(scalars_ref,                  # SMEM: [a1_0,a2_0,...,bdec]
                  inv_ref,                      # (1, S, F*Tf) inv-amplitudes
                  wblk_ref, vecblk_ref,         # packed per-block params
                  wmisc16_ref, wmisc128_ref, vecmisc_ref,  # packed misc params
                  out_ref,
                  *, S, T, N, Bc, Hc, P, hop, ftf, ftf_pad, lout_pad,
                  dilations, eps, off_dw, off_sc):
    f32 = jnp.float32
    nb = len(dilations)

    # -------- parameter slices (hoisted, shared by every sample) --------
    wistft = wmisc128_ref[0:ftf, :]                           # (F*Tf, LANE)
    wdec = wmisc128_ref[ftf_pad:ftf_pad + N, :]               # (N, LANE)
    wenc = wmisc16_ref[0:lout_pad, :]                         # (LANE, N), rows>=L zero
    wbn = wmisc16_ref[lout_pad:lout_pad + N, 0:Bc]            # (N, Bc)
    wg = wmisc16_ref[lout_pad + N:lout_pad + N + Bc, :]       # (Bc, N)
    benc = vecmisc_ref[0:1, :]
    g_enc = vecmisc_ref[1:2, :]
    b_enc = vecmisc_ref[2:3, :]
    bbn = vecmisc_ref[3:4, 0:Bc]
    bg = vecmisc_ref[4:5, :]
    bdec = scalars_ref[2 * nb]

    # boundary-mask iota built once, reused by every block / sample
    row = lax.broadcasted_iota(jnp.int32, (T, Hc), 0)
    mask_cache = {}

    def boundary_mask(s):
        if s not in mask_cache:
            mask_cache[s] = (row + s >= 0) & (row + s < T)
        return mask_cache[s]

    # -------- fused zero-phase istft for all samples of this grid step --------
    wav_all = jnp.dot(inv_ref[0], wistft, preferred_element_type=f32)  # (S, LANE)

    outs = []
    for s in range(S):
        # framing: row t of `fr` holds wav[t*hop + l] in lane l (the strided
        # lane roll left-rotates row t by t*hop; lanes >= L hit zero rows of
        # the padded encoder weight, so wrap-around never contributes).
        wav_b = jnp.broadcast_to(wav_all[s:s + 1, :], (T, lout_pad))
        fr = pltpu.roll(wav_b, shift=0, axis=1,
                        stride=(lout_pad - hop) % lout_pad, stride_axis=0)

        # ---- encoder conv + gLN + bottleneck 1x1 ----
        w = jnp.dot(fr, wenc, preferred_element_type=f32) + benc        # (T, N)
        e = jnp.dot(_gln(w, g_enc, b_enc, eps), wbn,
                    preferred_element_type=f32) + bbn                   # (T, Bc)

        # ---- TCN: R*X Conv1D_Blocks, everything in registers/VMEM ----
        for i in range(nb):
            dil = dilations[i]
            pad = dil * (P - 1) // 2
            x = e
            w1 = wblk_ref[i, 0:Bc, :]                                   # (Bc, Hc)
            wdw = wblk_ref[i, off_dw:off_dw + P, :]                     # (P, Hc)
            wsc = wblk_ref[i, off_sc:off_sc + Hc, 0:Bc]                 # (Hc, Bc)
            b1 = vecblk_ref[i, 0:1, :]
            g1 = vecblk_ref[i, 1:2, :]
            be1 = vecblk_ref[i, 2:3, :]
            bdw = vecblk_ref[i, 3:4, :]
            g2 = vecblk_ref[i, 4:5, :]
            be2 = vecblk_ref[i, 5:6, :]
            bsc = vecblk_ref[i, 6:7, 0:Bc]
            a1 = scalars_ref[2 * i]
            a2 = scalars_ref[2 * i + 1]

            # 1x1 conv B -> H, PReLU, gLN
            c = jnp.dot(x, w1, preferred_element_type=f32) + b1
            c = jnp.where(c >= 0, c, a1 * c)
            c = _gln(c, g1, be1, eps)
            # depthwise dilated conv ("same" padding): XLU roll + VPU mul-add
            acc = jnp.zeros_like(c)
            for k in range(P):
                sh = k * dil - pad
                if sh == 0:
                    tap = c
                else:
                    tap = pltpu.roll(c, shift=(-sh) % T, axis=0)        # tap[t]=c[t+sh]
                    tap = jnp.where(boundary_mask(sh), tap, 0.0)
                acc = acc + tap * wdw[k:k + 1, :]
            c = acc + bdw
            # PReLU, gLN, 1x1 conv H -> B, residual add
            c = jnp.where(c >= 0, c, a2 * c)
            c = _gln(c, g2, be2, eps)
            e = x + jnp.dot(c, wsc, preferred_element_type=f32) + bsc

        # ---- mask generation (no activation in the original forward), decode ----
        m = jnp.dot(e, wg, preferred_element_type=f32) + bg             # (T, N)
        dm = w * m                                                      # num_spks == 1
        fdec = jnp.dot(dm, wdec, preferred_element_type=f32)            # (T, LANE)
        # overlap-add: shift frame t right by t*hop with ONE strided lane
        # rotate, then sum over the frame axis (Wdec cols >= L are zero).
        placed = pltpu.roll(fdec, shift=0, axis=1, stride=hop, stride_axis=0)
        outs.append(jnp.sum(placed, axis=0, keepdims=True) + bdec)      # (1, LANE)

    out_ref[0] = jnp.concatenate(outs, axis=0) if S > 1 else outs[0]


# --------------------------- parameter preparation ---------------------------
def _istft_matrix(h, Tf):
    """(F, Tf, Lw) linear map reproducing torch.istft(complex(amp, 0), n_fft,
    hop, win, hann, center=True): wav[j] = sum_{f,s} amp[f,s] * M[f,s,j]."""
    assert h.win_size == h.n_fft  # TODO(synk): win_size < n_fft unsupported
    n_fft, hop = h.n_fft, h.hop_size
    F = n_fft // 2 + 1
    half = n_fft // 2
    Lw = hop * (Tf - 1)

    n = jnp.arange(n_fft, dtype=jnp.float32)
    f = jnp.arange(F, dtype=jnp.float32)
    # irfft basis of a purely real one-sided spectrum (phase = 0)
    coef = jnp.where((f == 0) | (f == n_fft // 2), 1.0, 2.0)
    C = (coef[:, None] * jnp.cos(2.0 * jnp.pi * f[:, None] * n[None, :] / n_fft)
         / n_fft).astype(jnp.float32)                                   # (F, n_fft)
    win = (0.5 - 0.5 * jnp.cos(2.0 * jnp.pi * n / n_fft)).astype(jnp.float32)

    # squared-window overlap-add envelope on the untrimmed grid
    Lfull = n_fft + hop * (Tf - 1)
    pos = jnp.arange(Lfull)
    off = pos[None, :] - hop * jnp.arange(Tf)[:, None]
    ok = (off >= 0) & (off < n_fft)
    env = jnp.sum(jnp.where(ok, (win ** 2)[jnp.clip(off, 0, n_fft - 1)], 0.0), axis=0)
    env = jnp.maximum(env, 1e-11)

    # trimmed output position j  ->  untrimmed position j + half
    p_un = jnp.arange(Lw) + half                                        # (Lw,)
    offs = p_un[None, :] - hop * jnp.arange(Tf)[:, None]                # (Tf, Lw)
    okj = (offs >= 0) & (offs < n_fft)
    offc = jnp.clip(offs, 0, n_fft - 1)
    wn = jnp.where(okj, win[offc], 0.0)                                 # (Tf, Lw)
    Cg = jnp.where(okj[None], C[:, offc], 0.0)                          # (F, Tf, Lw)
    return (Cg * wn[None] / env[p_un][None, None]).astype(jnp.float32)


def pack_params(p, h, Tf):
    """Pack the 21 raw parameter tensors into 6 kernel inputs (built once)."""
    N, Bc, Hc, P, L = h.N, h.B, h.H, h.P, h.L
    nb = h.R * h.X
    hop = L // 2
    wist3 = _istft_matrix(h, Tf)                    # (F, Tf, Lw)
    F, _, Lw = wist3.shape
    ftf = F * Tf
    ftf_pad = _round_up(ftf, 8)
    T = (Lw - L) // hop + 1
    lout = (T - 1) * hop + L
    lout_pad = LANE
    # static guards: both strided rolls wrap modulo the 128-lane slab
    assert (T - 1) * hop + L <= lout_pad, "sequence too long for 128-lane OLA slab"
    assert Lw <= lout_pad, "istft waveform too long for 128-lane slab"

    # 128-column weight slab: [istft matrix ; pad ; zero-padded decoder weight]
    wmisc128 = jnp.zeros((ftf_pad + N, lout_pad), jnp.float32)
    wmisc128 = wmisc128.at[:ftf, :Lw].set(wist3.reshape(ftf, Lw))
    wmisc128 = wmisc128.at[ftf_pad:ftf_pad + N, :L].set(p['Wdec'])

    # 16-column weight slab: [Wenc padded to 128 rows ; Wbn ; Wg]
    wmisc16 = jnp.zeros((lout_pad + N + _round_up(Bc, 8), N), jnp.float32)
    wmisc16 = wmisc16.at[:L, :].set(p['Wenc'])
    wmisc16 = wmisc16.at[lout_pad:lout_pad + N, :Bc].set(p['Wbn'])
    wmisc16 = wmisc16.at[lout_pad + N:lout_pad + N + Bc, :h.num_spks * N].set(p['Wg'])

    # misc vectors: benc / g_enc / b_enc / bbn / bg
    vecmisc = jnp.zeros((8, N), jnp.float32)
    vecmisc = vecmisc.at[0, :].set(p['benc'][0])
    vecmisc = vecmisc.at[1, :].set(p['g_enc'][0])
    vecmisc = vecmisc.at[2, :].set(p['b_enc'][0])
    vecmisc = vecmisc.at[3, :Bc].set(p['bbn'][0])
    vecmisc = vecmisc.at[4, :].set(p['bg'][0])

    # per-block weight slab (8-row aligned segments): W1 | Wdw | Wsc(padded cols)
    off_dw = _round_up(Bc, 8)
    off_sc = off_dw + _round_up(P, 8)
    wblk = jnp.zeros((nb, off_sc + Hc, Hc), jnp.float32)
    wblk = wblk.at[:, :Bc, :].set(p['W1s'])
    wblk = wblk.at[:, off_dw:off_dw + P, :].set(p['Wdws'])
    wblk = wblk.at[:, off_sc:off_sc + Hc, :Bc].set(p['Wscs'])

    # per-block vector slab: b1 / g1 / be1 / bdw / g2 / be2 / bsc
    vecblk = jnp.zeros((nb, 8, Hc), jnp.float32)
    vecblk = vecblk.at[:, 0, :].set(p['b1s'][:, 0, :])
    vecblk = vecblk.at[:, 1, :].set(p['g1s'][:, 0, :])
    vecblk = vecblk.at[:, 2, :].set(p['be1s'][:, 0, :])
    vecblk = vecblk.at[:, 3, :].set(p['bdws'][:, 0, :])
    vecblk = vecblk.at[:, 4, :].set(p['g2s'][:, 0, :])
    vecblk = vecblk.at[:, 5, :].set(p['be2s'][:, 0, :])
    vecblk = vecblk.at[:, 6, :Bc].set(p['bscs'][:, 0, :])

    packed = dict(scalars=p['scalars'], wblk=wblk, vecblk=vecblk,
                  wmisc16=wmisc16, wmisc128=wmisc128, vecmisc=vecmisc,
                  wist3=wist3)          # wist3 kept only for the reference path
    dims = dict(T=T, N=N, Bc=Bc, Hc=Hc, P=P, hop=hop, ftf=ftf, ftf_pad=ftf_pad,
                lout=lout, lout_pad=lout_pad, nb=nb, off_dw=off_dw, off_sc=off_sc,
                dilations=tuple(2 ** i for i in range(h.X)) * h.R)
    return packed, dims


# ------------------------------- pallas wrapper -------------------------------
def _num_parallel_chunks(batch):
    """1 grid step on single-TensorCore chips (v5e/v6e); 2 on v7x (2 TCs)."""
    try:
        kind = jax.devices()[0].device_kind.lower()
    except Exception:
        kind = ""
    want = 2 if "v7" in kind else 1
    c = min(want, batch)
    while c > 1 and batch % c:
        c -= 1
    return max(c, 1)


def convtasnet_fused_call(inv_amp, packed, dims, chunks):
    Bb, F, Tf = inv_amp.shape
    d = dims
    S = Bb // chunks
    assert chunks * S == Bb
    inv_flat = inv_amp.reshape(Bb, F * Tf).reshape(chunks, S, F * Tf)

    kernel = functools.partial(
        _fused_kernel, S=S, T=d['T'], N=d['N'], Bc=d['Bc'], Hc=d['Hc'], P=d['P'],
        hop=d['hop'], ftf=d['ftf'], ftf_pad=d['ftf_pad'], lout_pad=d['lout_pad'],
        dilations=d['dilations'], eps=EPS, off_dw=d['off_dw'], off_sc=d['off_sc'])

    def full(shape):
        return pl.BlockSpec(shape, lambda c, sc: (0,) * len(shape))

    grid_spec = pltpu.PrefetchScalarGridSpec(
        num_scalar_prefetch=1,                      # PReLU alphas + bdec -> SMEM
        grid=(chunks,),
        in_specs=[
            pl.BlockSpec((1, S, F * Tf), lambda c, sc: (c, 0, 0)),
            full(packed['wblk'].shape),
            full(packed['vecblk'].shape),
            full(packed['wmisc16'].shape),
            full(packed['wmisc128'].shape),
            full(packed['vecmisc'].shape),
        ],
        out_specs=pl.BlockSpec((1, S, d['lout_pad']), lambda c, sc: (c, 0, 0)),
    )
    out = pl.pallas_call(
        kernel,
        out_shape=jax.ShapeDtypeStruct((chunks, S, d['lout_pad']), jnp.float32),
        grid_spec=grid_spec,
        compiler_params=pltpu.CompilerParams(dimension_semantics=("parallel",)),
    )(packed['scalars'], inv_flat, packed['wblk'], packed['vecblk'],
      packed['wmisc16'], packed['wmisc128'], packed['vecmisc'])
    return out.reshape(Bb, d['lout_pad'])[:, :d['lout']]   # torch: out_wav.squeeze(1)


def convtasnet_forward(mel, inv_mel, packed, dims, chunks):
    # mel unused when inv_mel is supplied (inverse_mel path not implemented)
    del mel
    return convtasnet_fused_call(inv_mel, packed, dims, chunks)


# ------------------------- pure-JAX reference (checks) ------------------------
def _gln_ref(x, g, b):
    mean = jnp.mean(x, axis=(1, 2), keepdims=True)
    var = jnp.mean((x - mean) ** 2, axis=(1, 2), keepdims=True)
    return g * (x - mean) / jnp.sqrt(var + EPS) + b


def reference_forward(inv_amp, p, wist3, h):
    hp = lax.Precision.HIGHEST
    hop = h.L // 2
    wav = jnp.einsum('bfs,fsj->bj', inv_amp, wist3, precision=hp)       # (B, Lw)
    Lw = wav.shape[1]
    T = (Lw - h.L) // hop + 1
    idx = jnp.arange(T)[:, None] * hop + jnp.arange(h.L)[None, :]
    frames = wav[:, idx]                                                # (B, T, L)

    w = jnp.einsum('btl,ln->btn', frames, p['Wenc'], precision=hp) + p['benc']
    e = jnp.einsum('btn,nc->btc', _gln_ref(w, p['g_enc'], p['b_enc']), p['Wbn'],
                   precision=hp) + p['bbn']
    dils = [2 ** i for i in range(h.X)] * h.R
    for i, dil in enumerate(dils):
        x = e
        c = jnp.einsum('btc,ch->bth', x, p['W1s'][i], precision=hp) + p['b1s'][i]
        c = jnp.where(c >= 0, c, p['scalars'][2 * i] * c)
        c = _gln_ref(c, p['g1s'][i], p['be1s'][i])
        pad = dil * (h.P - 1) // 2
        cp = jnp.pad(c, ((0, 0), (pad, pad), (0, 0)))
        acc = jnp.zeros_like(c)
        for k in range(h.P):
            acc = acc + cp[:, k * dil:k * dil + T, :] * p['Wdws'][i][k]
        c = acc + p['bdws'][i]
        c = jnp.where(c >= 0, c, p['scalars'][2 * i + 1] * c)
        c = _gln_ref(c, p['g2s'][i], p['be2s'][i])
        e = x + jnp.einsum('bth,hc->btc', c, p['Wscs'][i], precision=hp) + p['bscs'][i]
    m = jnp.einsum('btc,cn->btn', e, p['Wg'], precision=hp) + p['bg']
    dm = w * m
    fdec = jnp.einsum('btn,nl->btl', dm, p['Wdec'], precision=hp)
    Lout = (T - 1) * hop + h.L
    out = jnp.zeros((inv_amp.shape[0], Lout), jnp.float32)
    for t in range(T):
        out = out.at[:, t * hop:t * hop + h.L].add(fdec[:, t, :])
    return out + p['scalars'][2 * len(dils)]


# ------------------------------- parameter init -------------------------------
def init_params(key, h):
    nb = h.R * h.X
    ks = jax.random.split(key, 32)
    it = iter(ks)

    def nrm(shape, scale=0.1):
        return (scale * jax.random.normal(next(it), shape)).astype(jnp.float32)

    p = {
        'Wenc': nrm((h.L, h.N)), 'benc': nrm((1, h.N)),
        'g_enc': jnp.ones((1, h.N), jnp.float32),       # gLN weight init = 1
        'b_enc': jnp.zeros((1, h.N), jnp.float32),      # gLN bias init = 0
        'Wbn': nrm((h.N, h.B)), 'bbn': nrm((1, h.B)),
        'W1s': nrm((nb, h.B, h.H)), 'b1s': nrm((nb, 1, h.H)),
        'g1s': jnp.ones((nb, 1, h.H), jnp.float32),
        'be1s': jnp.zeros((nb, 1, h.H), jnp.float32),
        'Wdws': nrm((nb, h.P, h.H)), 'bdws': nrm((nb, 1, h.H)),
        'g2s': jnp.ones((nb, 1, h.H), jnp.float32),
        'be2s': jnp.zeros((nb, 1, h.H), jnp.float32),
        'Wscs': nrm((nb, h.H, h.B)), 'bscs': nrm((nb, 1, h.B)),
        'Wg': nrm((h.B, h.num_spks * h.N)), 'bg': nrm((1, h.num_spks * h.N)),
        'Wdec': nrm((h.N, h.L)),
        # SMEM scalars: [a1_0, a2_0, ..., a1_{nb-1}, a2_{nb-1}, bdec]
        'scalars': jnp.concatenate(
            [jnp.full((2 * nb,), 0.25, jnp.float32),    # nn.PReLU default
             nrm((1,))]),                               # decoder bias
    }
    return p


# ------------------------------------ main ------------------------------------
if __name__ == "__main__":
    h = H()
    key = jax.random.PRNGKey(0)
    k_mel, k_inv, k_par = jax.random.split(key, 3)

    Bb, Fm, Tf = 2, 8, 10
    n_freq = h.n_fft // 2 + 1
    mel = jax.random.uniform(k_mel, (Bb, Fm, Tf), jnp.float32)              # (B, Fm, T)
    inv_mel = jax.random.uniform(k_inv, (Bb, n_freq, Tf), jnp.float32,
                                 minval=0.1, maxval=1.0)                     # (B, F, T)
    params = init_params(k_par, h)

    packed, dims = pack_params(params, h, Tf)       # built once, outside jit
    chunks = _num_parallel_chunks(Bb)               # 1 on v5e/v6e, 2 on v7x

    fwd = jax.jit(functools.partial(convtasnet_forward, dims=dims, chunks=chunks))
    out = fwd(mel, inv_mel, packed)
    jax.block_until_ready(out)

    expected_len = h.hop_size * (Tf - 1)            # == (T-1)*L//2 + L here
    assert out.shape == (Bb, expected_len), out.shape
    assert bool(jnp.all(jnp.isfinite(out)))

    # correctness: pure-JAX reference of the same forward math
    ref = reference_forward(inv_mel, params, packed['wist3'], h)
    err = float(jnp.max(jnp.abs(out - ref)))
    assert err < 5e-3, f"max abs err vs reference: {err}"

    print("KERNEL_OK")
</pallas_src>

<mosaic_0001>
module attributes {stable_mosaic.version = 11 : i64} {
  func.func @_fused_kernel(%arg0: i32, %arg1: memref<9xf32, #tpu.memory_space<smem>>, %arg2: memref<1x2x90xf32, #tpu.memory_space<vmem>>, %arg3: memref<4x32x16xf32, #tpu.memory_space<vmem>>, %arg4: memref<4x8x16xf32, #tpu.memory_space<vmem>>, %arg5: memref<152x16xf32, #tpu.memory_space<vmem>>, %arg6: memref<112x128xf32, #tpu.memory_space<vmem>>, %arg7: memref<8x16xf32, #tpu.memory_space<vmem>>, %arg8: memref<1x2x128xf32, #tpu.memory_space<vmem>>) attributes {dimension_semantics = [#tpu.dimension_semantics<parallel>], iteration_bounds = array<i64: 1>, scalar_prefetch = 1 : i64, scratch_operands = 0 : i64, tpu.core_type = #tpu.core_type<tc>, window_params = [{transform_indices = @transform_0, window_bounds = array<i64: 1, 2, 90>}, {pipeline_mode = #tpu.pipeline_mode<synchronous>, transform_indices = @transform_1, window_bounds = array<i64: 4, 32, 16>}, {pipeline_mode = #tpu.pipeline_mode<synchronous>, transform_indices = @transform_2, window_bounds = array<i64: 4, 8, 16>}, {pipeline_mode = #tpu.pipeline_mode<synchronous>, transform_indices = @transform_3, window_bounds = array<i64: 152, 16>}, {pipeline_mode = #tpu.pipeline_mode<synchronous>, transform_indices = @transform_4, window_bounds = array<i64: 112, 128>}, {pipeline_mode = #tpu.pipeline_mode<synchronous>, transform_indices = @transform_5, window_bounds = array<i64: 8, 16>}, {transform_indices = @transform_6, window_bounds = array<i64: 1, 2, 128>}]} {
    %c0 = arith.constant 0 : index
    %c0_0 = arith.constant 0 : index
    %0 = vector.load %arg6[%c0, %c0_0] : memref<112x128xf32, #tpu.memory_space<vmem>>, vector<90x128xf32>
    %c96 = arith.constant 96 : index
    %c0_1 = arith.constant 0 : index
    %1 = vector.load %arg6[%c96, %c0_1] : memref<112x128xf32, #tpu.memory_space<vmem>>, vector<16x128xf32>
    %c0_2 = arith.constant 0 : index
    %c0_3 = arith.constant 0 : index
    %2 = vector.load %arg5[%c0_2, %c0_3] : memref<152x16xf32, #tpu.memory_space<vmem>>, vector<128x16xf32>
    %c128 = arith.constant 128 : index
    %c0_4 = arith.constant 0 : index
    %3 = vector.load %arg5[%c128, %c0_4] : memref<152x16xf32, #tpu.memory_space<vmem>>, vector<16x8xf32>
    %c144 = arith.constant 144 : index
    %c0_5 = arith.constant 0 : index
    %4 = vector.load %arg5[%c144, %c0_5] : memref<152x16xf32, #tpu.memory_space<vmem>>, vector<8x16xf32>
    %c0_6 = arith.constant 0 : index
    %c0_7 = arith.constant 0 : index
    %5 = vector.load %arg7[%c0_6, %c0_7] : memref<8x16xf32, #tpu.memory_space<vmem>>, vector<1x16xf32>
    %c1 = arith.constant 1 : index
    %c0_8 = arith.constant 0 : index
    %6 = vector.load %arg7[%c1, %c0_8] : memref<8x16xf32, #tpu.memory_space<vmem>>, vector<1x16xf32>
    %c2 = arith.constant 2 : index
    %c0_9 = arith.constant 0 : index
    %7 = vector.load %arg7[%c2, %c0_9] : memref<8x16xf32, #tpu.memory_space<vmem>>, vector<1x16xf32>
    %c3 = arith.constant 3 : index
    %c0_10 = arith.constant 0 : index
    %8 = vector.load %arg7[%c3, %c0_10] : memref<8x16xf32, #tpu.memory_space<vmem>>, vector<1x8xf32>
    %c4 = arith.constant 4 : index
    %c0_11 = arith.constant 0 : index
    %9 = vector.load %arg7[%c4, %c0_11] : memref<8x16xf32, #tpu.memory_space<vmem>>, vector<1x16xf32>
    %c8 = arith.constant 8 : index
    %10 = memref.load %arg1[%c8] : memref<9xf32, #tpu.memory_space<smem>>
    %11 = tpu.iota {dimensions = array<i32: 0>} : vector<8x16xi32>
    %c0_12 = arith.constant 0 : index
    %c0_13 = arith.constant 0 : index
    %c0_14 = arith.constant 0 : index
    %12 = vector.load %arg2[%c0_12, %c0_13, %c0_14] : memref<1x2x90xf32, #tpu.memory_space<vmem>>, vector<1x2x90xf32>
    %13 = vector.shape_cast %12 : vector<1x2x90xf32> to vector<2x90xf32>
    %cst = arith.constant dense<0.000000e+00> : vector<2x128xf32>
    %14 = tpu.matmul %13, %0, %cst {dimension_numbers = #tpu.dot_dimension_numbers<[1], [0], [0], [1], [0, 0, 1, 1], [], []>} : vector<2x90xf32>, vector<90x128xf32>, vector<2x128xf32> -> vector<2x128xf32>
    %15 = vector.extract_strided_slice %14 {offsets = [0, 0], sizes = [1, 128], strides = [1, 1]} : vector<2x128xf32> to vector<1x128xf32>
    %16 = vector.shape_cast %15 : vector<1x128xf32> to vector<1x128xf32>
    %17 = vector.broadcast %16 : vector<1x128xf32> to vector<8x128xf32>
    %c0_i32 = arith.constant 0 : i32
    %18 = tpu.dynamic_rotate %17 by %c0_i32 dim 1 {stride = 124 : si32, stride_dimension = 0 : si32} : vector<8x128xf32>, i32 -> vector<8x128xf32>
    %cst_15 = arith.constant dense<0.000000e+00> : vector<8x16xf32>
    %19 = tpu.matmul %18, %2, %cst_15 {dimension_numbers = #tpu.dot_dimension_numbers<[1], [0], [0], [1], [0, 0, 1, 1], [], []>} : vector<8x128xf32>, vector<128x16xf32>, vector<8x16xf32> -> vector<8x16xf32>
    %20 = vector.broadcast %5 : vector<1x16xf32> to vector<8x16xf32>
    %21 = arith.addf %19, %20 : vector<8x16xf32>
    %22 = vector.shape_cast %21 : vector<8x16xf32> to vector<1x8x16xf32>
    %cst_16 = arith.constant dense<0.000000e+00> : vector<1xf32>
    %23 = vector.multi_reduction <add>, %22, %cst_16 [1, 2] : vector<1x8x16xf32> to vector<1xf32>
    %24 = vector.shape_cast %23 : vector<1xf32> to vector<1x1x1xf32>
    %25 = vector.extract %24[0, 0, 0] : f32 from vector<1x1x1xf32>
    %cst_17 = arith.constant 1.280000e+02 : f32
    %26 = arith.divf %25, %cst_17 : f32
    %27 = arith.mulf %21, %21 : vector<8x16xf32>
    %28 = vector.shape_cast %27 : vector<8x16xf32> to vector<1x8x16xf32>
    %cst_18 = arith.constant dense<0.000000e+00> : vector<1xf32>
    %29 = vector.multi_reduction <add>, %28, %cst_18 [1, 2] : vector<1x8x16xf32> to vector<1xf32>
    %30 = vector.shape_cast %29 : vector<1xf32> to vector<1x1x1xf32>
    %31 = vector.extract %30[0, 0, 0] : f32 from vector<1x1x1xf32>
    %cst_19 = arith.constant 1.280000e+02 : f32
    %32 = arith.divf %31, %cst_19 : f32
    %33 = arith.mulf %26, %26 : f32
    %34 = arith.subf %32, %33 : f32
    %cst_20 = arith.constant 0.000000e+00 : f32
    %35 = arith.maximumf %34, %cst_20 : f32
    %cst_21 = arith.constant 9.99999974E-6 : f32
    %36 = arith.addf %35, %cst_21 : f32
    %37 = math.rsqrt %36 : f32
    %38 = vector.broadcast %26 : f32 to vector<8x16xf32>
    %39 = arith.subf %21, %38 : vector<8x16xf32>
    %40 = vector.broadcast %37 : f32 to vector<1x16xf32>
    %41 = arith.mulf %6, %40 : vector<1x16xf32>
    %42 = vector.broadcast %41 : vector<1x16xf32> to vector<8x16xf32>
    %43 = arith.mulf %39, %42 : vector<8x16xf32>
    %44 = vector.broadcast %7 : vector<1x16xf32> to vector<8x16xf32>
    %45 = arith.addf %43, %44 : vector<8x16xf32>
    %cst_22 = arith.constant dense<0.000000e+00> : vector<8x8xf32>
    %46 = tpu.matmul %45, %3, %cst_22 {dimension_numbers = #tpu.dot_dimension_numbers<[1], [0], [0], [1], [0, 0, 1, 1], [], []>} : vector<8x16xf32>, vector<16x8xf32>, vector<8x8xf32> -> vector<8x8xf32>
    %47 = vector.broadcast %8 : vector<1x8xf32> to vector<8x8xf32>
    %48 = arith.addf %46, %47 : vector<8x8xf32>
    %c0_23 = arith.constant 0 : index
    %c0_24 = arith.constant 0 : index
    %c0_25 = arith.constant 0 : index
    %49 = vector.load %arg3[%c0_23, %c0_24, %c0_25] : memref<4x32x16xf32, #tpu.memory_space<vmem>>, vector<1x8x16xf32>
    %50 = vector.shape_cast %49 : vector<1x8x16xf32> to vector<8x16xf32>
    %c0_26 = arith.constant 0 : index
    %c8_27 = arith.constant 8 : index
    %c0_28 = arith.constant 0 : index
    %51 = vector.load %arg3[%c0_26, %c8_27, %c0_28] : memref<4x32x16xf32, #tpu.memory_space<vmem>>, vector<1x3x16xf32>
    %52 = vector.shape_cast %51 : vector<1x3x16xf32> to vector<3x16xf32>
    %c0_29 = arith.constant 0 : index
    %c16 = arith.constant 16 : index
    %c0_30 = arith.constant 0 : index
    %53 = vector.load %arg3[%c0_29, %c16, %c0_30] : memref<4x32x16xf32, #tpu.memory_space<vmem>>, vector<1x16x8xf32>
    %54 = vector.shape_cast %53 : vector<1x16x8xf32> to vector<16x8xf32>
    %c0_31 = arith.constant 0 : index
    %c0_32 = arith.constant 0 : index
    %c0_33 = arith.constant 0 : index
    %55 = vector.load %arg4[%c0_31, %c0_32, %c0_33] : memref<4x8x16xf32, #tpu.memory_space<vmem>>, vector<1x1x16xf32>
    %56 = vector.shape_cast %55 : vector<1x1x16xf32> to vector<1x16xf32>
    %c0_34 = arith.constant 0 : index
    %c1_35 = arith.constant 1 : index
    %c0_36 = arith.constant 0 : index
    %57 = vector.load %arg4[%c0_34, %c1_35, %c0_36] : memref<4x8x16xf32, #tpu.memory_space<vmem>>, vector<1x1x16xf32>
    %58 = vector.shape_cast %57 : vector<1x1x16xf32> to vector<1x16xf32>
    %c0_37 = arith.constant 0 : index
    %c2_38 = arith.constant 2 : index
    %c0_39 = arith.constant 0 : index
    %59 = vector.load %arg4[%c0_37, %c2_38, %c0_39] : memref<4x8x16xf32, #tpu.memory_space<vmem>>, vector<1x1x16xf32>
    %60 = vector.shape_cast %59 : vector<1x1x16xf32> to vector<1x16xf32>
    %c0_40 = arith.constant 0 : index
    %c3_41 = arith.constant 3 : index
    %c0_42 = arith.constant 0 : index
    %61 = vector.load %arg4[%c0_40, %c3_41, %c0_42] : memref<4x8x16xf32, #tpu.memory_space<vmem>>, vector<1x1x16xf32>
    %62 = vector.shape_cast %61 : vector<1x1x16xf32> to vector<1x16xf32>
    %c0_43 = arith.constant 0 : index
    %c4_44 = arith.constant 4 : index
    %c0_45 = arith.constant 0 : index
    %63 = vector.load %arg4[%c0_43, %c4_44, %c0_45] : memref<4x8x16xf32, #tpu.memory_space<vmem>>, vector<1x1x16xf32>
    %64 = vector.shape_cast %63 : vector<1x1x16xf32> to vector<1x16xf32>
    %c0_46 = arith.constant 0 : index
    %c5 = arith.constant 5 : index
    %c0_47 = arith.constant 0 : index
    %65 = vector.load %arg4[%c0_46, %c5, %c0_47] : memref<4x8x16xf32, #tpu.memory_space<vmem>>, vector<1x1x16xf32>
    %66 = vector.shape_cast %65 : vector<1x1x16xf32> to vector<1x16xf32>
    %c0_48 = arith.constant 0 : index
    %c6 = arith.constant 6 : index
    %c0_49 = arith.constant 0 : index
    %67 = vector.load %arg4[%c0_48, %c6, %c0_49] : memref<4x8x16xf32, #tpu.memory_space<vmem>>, vector<1x1x8xf32>
    %68 = vector.shape_cast %67 : vector<1x1x8xf32> to vector<1x8xf32>
    %c0_50 = arith.constant 0 : index
    %69 = memref.load %arg1[%c0_50] : memref<9xf32, #tpu.memory_space<smem>>
    %c1_51 = arith.constant 1 : index
    %70 = memref.load %arg1[%c1_51] : memref<9xf32, #tpu.memory_space<smem>>
    %cst_52 = arith.constant dense<0.000000e+00> : vector<8x16xf32>
    %71 = tpu.matmul %48, %50, %cst_52 {dimension_numbers = #tpu.dot_dimension_numbers<[1], [0], [0], [1], [0, 0, 1, 1], [], []>} : vector<8x8xf32>, vector<8x16xf32>, vector<8x16xf32> -> vector<8x16xf32>
    %72 = vector.broadcast %56 : vector<1x16xf32> to vector<8x16xf32>
    %73 = arith.addf %71, %72 : vector<8x16xf32>
    %cst_53 = arith.constant 0.000000e+00 : f32
    %74 = vector.broadcast %cst_53 : f32 to vector<8x16xf32>
    %75 = arith.cmpf oge, %73, %74 : vector<8x16xf32>
    %76 = vector.broadcast %69 : f32 to vector<8x16xf32>
    %77 = arith.mulf %76, %73 : vector<8x16xf32>
    %78 = arith.select %75, %73, %77 : vector<8x16xi1>, vector<8x16xf32>
    %79 = vector.shape_cast %78 : vector<8x16xf32> to vector<1x8x16xf32>
    %cst_54 = arith.constant dense<0.000000e+00> : vector<1xf32>
    %80 = vector.multi_reduction <add>, %79, %cst_54 [1, 2] : vector<1x8x16xf32> to vector<1xf32>
    %81 = vector.shape_cast %80 : vector<1xf32> to vector<1x1x1xf32>
    %82 = vector.extract %81[0, 0, 0] : f32 from vector<1x1x1xf32>
    %cst_55 = arith.constant 1.280000e+02 : f32
    %83 = arith.divf %82, %cst_55 : f32
    %84 = arith.mulf %78, %78 : vector<8x16xf32>
    %85 = vector.shape_cast %84 : vector<8x16xf32> to vector<1x8x16xf32>
    %cst_56 = arith.constant dense<0.000000e+00> : vector<1xf32>
    %86 = vector.multi_reduction <add>, %85, %cst_56 [1, 2] : vector<1x8x16xf32> to vector<1xf32>
    %87 = vector.shape_cast %86 : vector<1xf32> to vector<1x1x1xf32>
    %88 = vector.extract %87[0, 0, 0] : f32 from vector<1x1x1xf32>
    %cst_57 = arith.constant 1.280000e+02 : f32
    %89 = arith.divf %88, %cst_57 : f32
    %90 = arith.mulf %83, %83 : f32
    %91 = arith.subf %89, %90 : f32
    %cst_58 = arith.constant 0.000000e+00 : f32
    %92 = arith.maximumf %91, %cst_58 : f32
    %cst_59 = arith.constant 9.99999974E-6 : f32
    %93 = arith.addf %92, %cst_59 : f32
    %94 = math.rsqrt %93 : f32
    %95 = vector.broadcast %83 : f32 to vector<8x16xf32>
    %96 = arith.subf %78, %95 : vector<8x16xf32>
    %97 = vector.broadcast %94 : f32 to vector<1x16xf32>
    %98 = arith.mulf %58, %97 : vector<1x16xf32>
    %99 = vector.broadcast %98 : vector<1x16xf32> to vector<8x16xf32>
    %100 = arith.mulf %96, %99 : vector<8x16xf32>
    %101 = vector.broadcast %60 : vector<1x16xf32> to vector<8x16xf32>
    %102 = arith.addf %100, %101 : vector<8x16xf32>
    %cst_60 = arith.constant 0.000000e+00 : f32
    %103 = vector.broadcast %cst_60 : f32 to vector<8x16xf32>
    %c1_i32 = arith.constant 1 : i32
    %104 = tpu.dynamic_rotate %102 by %c1_i32 dim 0 : vector<8x16xf32>, i32 -> vector<8x16xf32>
    %c-1_i32 = arith.constant -1 : i32
    %105 = vector.broadcast %c-1_i32 : i32 to vector<8x16xi32>
    %106 = arith.addi %11, %105 : vector<8x16xi32>
    %c0_i32_61 = arith.constant 0 : i32
    %107 = vector.broadcast %c0_i32_61 : i32 to vector<8x16xi32>
    %108 = arith.cmpi sge, %106, %107 : vector<8x16xi32>
    %c-1_i32_62 = arith.constant -1 : i32
    %109 = vector.broadcast %c-1_i32_62 : i32 to vector<8x16xi32>
    %110 = arith.addi %11, %109 : vector<8x16xi32>
    %c8_i32 = arith.constant 8 : i32
    %111 = vector.broadcast %c8_i32 : i32 to vector<8x16xi32>
    %112 = arith.cmpi slt, %110, %111 : vector<8x16xi32>
    %113 = arith.andi %108, %112 : vector<8x16xi1>
    %cst_63 = arith.constant 0.000000e+00 : f32
    %114 = vector.broadcast %cst_63 : f32 to vector<8x16xf32>
    %115 = arith.select %113, %104, %114 : vector<8x16xi1>, vector<8x16xf32>
    %116 = vector.extract_strided_slice %52 {offsets = [0, 0], sizes = [1, 16], strides = [1, 1]} : vector<3x16xf32> to vector<1x16xf32>
    %117 = vector.broadcast %116 : vector<1x16xf32> to vector<8x16xf32>
    %118 = arith.mulf %115, %117 : vector<8x16xf32>
    %119 = arith.addf %103, %118 : vector<8x16xf32>
    %120 = vector.extract_strided_slice %52 {offsets = [1, 0], sizes = [1, 16], strides = [1, 1]} : vector<3x16xf32> to vector<1x16xf32>
    %121 = vector.broadcast %120 : vector<1x16xf32> to vector<8x16xf32>
    %122 = arith.mulf %102, %121 : vector<8x16xf32>
    %123 = arith.addf %119, %122 : vector<8x16xf32>
    %c7_i32 = arith.constant 7 : i32
    %124 = tpu.dynamic_rotate %102 by %c7_i32 dim 0 : vector<8x16xf32>, i32 -> vector<8x16xf32>
    %c1_i32_64 = arith.constant 1 : i32
    %125 = vector.broadcast %c1_i32_64 : i32 to vector<8x16xi32>
    %126 = arith.addi %11, %125 : vector<8x16xi32>
    %c0_i32_65 = arith.constant 0 : i32
    %127 = vector.broadcast %c0_i32_65 : i32 to vector<8x16xi32>
    %128 = arith.cmpi sge, %126, %127 : vector<8x16xi32>
    %c1_i32_66 = arith.constant 1 : i32
    %129 = vector.broadcast %c1_i32_66 : i32 to vector<8x16xi32>
    %130 = arith.addi %11, %129 : vector<8x16xi32>
    %c8_i32_67 = arith.constant 8 : i32
    %131 = vector.broadcast %c8_i32_67 : i32 to vector<8x16xi32>
    %132 = arith.cmpi slt, %130, %131 : vector<8x16xi32>
    %133 = arith.andi %128, %132 : vector<8x16xi1>
    %cst_68 = arith.constant 0.000000e+00 : f32
    %134 = vector.broadcast %cst_68 : f32 to vector<8x16xf32>
    %135 = arith.select %133, %124, %134 : vector<8x16xi1>, vector<8x16xf32>
    %136 = vector.extract_strided_slice %52 {offsets = [2, 0], sizes = [1, 16], strides = [1, 1]} : vector<3x16xf32> to vector<1x16xf32>
    %137 = vector.broadcast %136 : vector<1x16xf32> to vector<8x16xf32>
    %138 = arith.mulf %135, %137 : vector<8x16xf32>
    %139 = arith.addf %123, %138 : vector<8x16xf32>
    %140 = vector.broadcast %62 : vector<1x16xf32> to vector<8x16xf32>
    %141 = arith.addf %139, %140 : vector<8x16xf32>
    %cst_69 = arith.constant 0.000000e+00 : f32
    %142 = vector.broadcast %cst_69 : f32 to vector<8x16xf32>
    %143 = arith.cmpf oge, %141, %142 : vector<8x16xf32>
    %144 = vector.broadcast %70 : f32 to vector<8x16xf32>
    %145 = arith.mulf %144, %141 : vector<8x16xf32>
    %146 = arith.select %143, %141, %145 : vector<8x16xi1>, vector<8x16xf32>
    %147 = vector.shape_cast %146 : vector<8x16xf32> to vector<1x8x16xf32>
    %cst_70 = arith.constant dense<0.000000e+00> : vector<1xf32>
    %148 = vector.multi_reduction <add>, %147, %cst_70 [1, 2] : vector<1x8x16xf32> to vector<1xf32>
    %149 = vector.shape_cast %148 : vector<1xf32> to vector<1x1x1xf32>
    %150 = vector.extract %149[0, 0, 0] : f32 from vector<1x1x1xf32>
    %cst_71 = arith.constant 1.280000e+02 : f32
    %151 = arith.divf %150, %cst_71 : f32
    %152 = arith.mulf %146, %146 : vector<8x16xf32>
    %153 = vector.shape_cast %152 : vector<8x16xf32> to vector<1x8x16xf32>
    %cst_72 = arith.constant dense<0.000000e+00> : vector<1xf32>
    %154 = vector.multi_reduction <add>, %153, %cst_72 [1, 2] : vector<1x8x16xf32> to vector<1xf32>
    %155 = vector.shape_cast %154 : vector<1xf32> to vector<1x1x1xf32>
    %156 = vector.extract %155[0, 0, 0] : f32 from vector<1x1x1xf32>
    %cst_73 = arith.constant 1.280000e+02 : f32
    %157 = arith.divf %156, %cst_73 : f32
    %158 = arith.mulf %151, %151 : f32
    %159 = arith.subf %157, %158 : f32
    %cst_74 = arith.constant 0.000000e+00 : f32
    %160 = arith.maximumf %159, %cst_74 : f32
    %cst_75 = arith.constant 9.99999974E-6 : f32
    %161 = arith.addf %160, %cst_75 : f32
    %162 = math.rsqrt %161 : f32
    %163 = vector.broadcast %151 : f32 to vector<8x16xf32>
    %164 = arith.subf %146, %163 : vector<8x16xf32>
    %165 = vector.broadcast %162 : f32 to vector<1x16xf32>
    %166 = arith.mulf %64, %165 : vector<1x16xf32>
    %167 = vector.broadcast %166 : vector<1x16xf32> to vector<8x16xf32>
    %168 = arith.mulf %164, %167 : vector<8x16xf32>
    %169 = vector.broadcast %66 : vector<1x16xf32> to vector<8x16xf32>
    %170 = arith.addf %168, %169 : vector<8x16xf32>
    %cst_76 = arith.constant dense<0.000000e+00> : vector<8x8xf32>
    %171 = tpu.matmul %170, %54, %cst_76 {dimension_numbers = #tpu.dot_dimension_numbers<[1], [0], [0], [1], [0, 0, 1, 1], [], []>} : vector<8x16xf32>, vector<16x8xf32>, vector<8x8xf32> -> vector<8x8xf32>
    %172 = arith.addf %48, %171 : vector<8x8xf32>
    %173 = vector.broadcast %68 : vector<1x8xf32> to vector<8x8xf32>
    %174 = arith.addf %172, %173 : vector<8x8xf32>
    %c1_77 = arith.constant 1 : index
    %c0_78 = arith.constant 0 : index
    %c0_79 = arith.constant 0 : index
    %175 = vector.load %arg3[%c1_77, %c0_78, %c0_79] : memref<4x32x16xf32, #tpu.memory_space<vmem>>, vector<1x8x16xf32>
    %176 = vector.shape_cast %175 : vector<1x8x16xf32> to vector<8x16xf32>
    %c1_80 = arith.constant 1 : index
    %c8_81 = arith.constant 8 : index
    %c0_82 = arith.constant 0 : index
    %177 = vector.load %arg3[%c1_80, %c8_81, %c0_82] : memref<4x32x16xf32, #tpu.memory_space<vmem>>, vector<1x3x16xf32>
    %178 = vector.shape_cast %177 : vector<1x3x16xf32> to vector<3x16xf32>
    %c1_83 = arith.constant 1 : index
    %c16_84 = arith.constant 16 : index
    %c0_85 = arith.constant 0 : index
    %179 = vector.load %arg3[%c1_83, %c16_84, %c0_85] : memref<4x32x16xf32, #tpu.memory_space<vmem>>, vector<1x16x8xf32>
    %180 = vector.shape_cast %179 : vector<1x16x8xf32> to vector<16x8xf32>
    %c1_86 = arith.constant 1 : index
    %c0_87 = arith.constant 0 : index
    %c0_88 = arith.constant 0 : index
    %181 = vector.load %arg4[%c1_86, %c0_87, %c0_88] : memref<4x8x16xf32, #tpu.memory_space<vmem>>, vector<1x1x16xf32>
    %182 = vector.shape_cast %181 : vector<1x1x16xf32> to vector<1x16xf32>
    %c1_89 = arith.constant 1 : index
    %c1_90 = arith.constant 1 : index
    %c0_91 = arith.constant 0 : index
    %183 = vector.load %arg4[%c1_89, %c1_90, %c0_91] : memref<4x8x16xf32, #tpu.memory_space<vmem>>, vector<1x1x16xf32>
    %184 = vector.shape_cast %183 : vector<1x1x16xf32> to vector<1x16xf32>
    %c1_92 = arith.constant 1 : index
    %c2_93 = arith.constant 2 : index
    %c0_94 = arith.constant 0 : index
    %185 = vector.load %arg4[%c1_92, %c2_93, %c0_94] : memref<4x8x16xf32, #tpu.memory_space<vmem>>, vector<1x1x16xf32>
    %186 = vector.shape_cast %185 : vector<1x1x16xf32> to vector<1x16xf32>
    %c1_95 = arith.constant 1 : index
    %c3_96 = arith.constant 3 : index
    %c0_97 = arith.constant 0 : index
    %187 = vector.load %arg4[%c1_95, %c3_96, %c0_97] : memref<4x8x16xf32, #tpu.memory_space<vmem>>, vector<1x1x16xf32>
    %188 = vector.shape_cast %187 : vector<1x1x16xf32> to vector<1x16xf32>
    %c1_98 = arith.constant 1 : index
    %c4_99 = arith.constant 4 : index
    %c0_100 = arith.constant 0 : index
    %189 = vector.load %arg4[%c1_98, %c4_99, %c0_100] : memref<4x8x16xf32, #tpu.memory_space<vmem>>, vector<1x1x16xf32>
    %190 = vector.shape_cast %189 : vector<1x1x16xf32> to vector<1x16xf32>
    %c1_101 = arith.constant 1 : index
    %c5_102 = arith.constant 5 : index
    %c0_103 = arith.constant 0 : index
    %191 = vector.load %arg4[%c1_101, %c5_102, %c0_103] : memref<4x8x16xf32, #tpu.memory_space<vmem>>, vector<1x1x16xf32>
    %192 = vector.shape_cast %191 : vector<1x1x16xf32> to vector<1x16xf32>
    %c1_104 = arith.constant 1 : index
    %c6_105 = arith.constant 6 : index
    %c0_106 = arith.constant 0 : index
    %193 = vector.load %arg4[%c1_104, %c6_105, %c0_106] : memref<4x8x16xf32, #tpu.memory_space<vmem>>, vector<1x1x8xf32>
    %194 = vector.shape_cast %193 : vector<1x1x8xf32> to vector<1x8xf32>
    %c2_107 = arith.constant 2 : index
    %195 = memref.load %arg1[%c2_107] : memref<9xf32, #tpu.memory_space<smem>>
    %c3_108 = arith.constant 3 : index
    %196 = memref.load %arg1[%c3_108] : memref<9xf32, #tpu.memory_space<smem>>
    %cst_109 = arith.constant dense<0.000000e+00> : vector<8x16xf32>
    %197 = tpu.matmul %174, %176, %cst_109 {dimension_numbers = #tpu.dot_dimension_numbers<[1], [0], [0], [1], [0, 0, 1, 1], [], []>} : vector<8x8xf32>, vector<8x16xf32>, vector<8x16xf32> -> vector<8x16xf32>
    %198 = vector.broadcast %182 : vector<1x16xf32> to vector<8x16xf32>
    %199 = arith.addf %197, %198 : vector<8x16xf32>
    %cst_110 = arith.constant 0.000000e+00 : f32
    %200 = vector.broadcast %cst_110 : f32 to vector<8x16xf32>
    %201 = arith.cmpf oge, %199, %200 : vector<8x16xf32>
    %202 = vector.broadcast %195 : f32 to vector<8x16xf32>
    %203 = arith.mulf %202, %199 : vector<8x16xf32>
    %204 = arith.select %201, %199, %203 : vector<8x16xi1>, vector<8x16xf32>
    %205 = vector.shape_cast %204 : vector<8x16xf32> to vector<1x8x16xf32>
    %cst_111 = arith.constant dense<0.000000e+00> : vector<1xf32>
    %206 = vector.multi_reduction <add>, %205, %cst_111 [1, 2] : vector<1x8x16xf32> to vector<1xf32>
    %207 = vector.shape_cast %206 : vector<1xf32> to vector<1x1x1xf32>
    %208 = vector.extract %207[0, 0, 0] : f32 from vector<1x1x1xf32>
    %cst_112 = arith.constant 1.280000e+02 : f32
    %209 = arith.divf %208, %cst_112 : f32
    %210 = arith.mulf %204, %204 : vector<8x16xf32>
    %211 = vector.shape_cast %210 : vector<8x16xf32> to vector<1x8x16xf32>
    %cst_113 = arith.constant dense<0.000000e+00> : vector<1xf32>
    %212 = vector.multi_reduction <add>, %211, %cst_113 [1, 2] : vector<1x8x16xf32> to vector<1xf32>
    %213 = vector.shape_cast %212 : vector<1xf32> to vector<1x1x1xf32>
    %214 = vector.extract %213[0, 0, 0] : f32 from vector<1x1x1xf32>
    %cst_114 = arith.constant 1.280000e+02 : f32
    %215 = arith.divf %214, %cst_114 : f32
    %216 = arith.mulf %209, %209 : f32
    %217 = arith.subf %215, %216 : f32
    %cst_115 = arith.constant 0.000000e+00 : f32
    %218 = arith.maximumf %217, %cst_115 : f32
    %cst_116 = arith.constant 9.99999974E-6 : f32
    %219 = arith.addf %218, %cst_116 : f32
    %220 = math.rsqrt %219 : f32
    %221 = vector.broadcast %209 : f32 to vector<8x16xf32>
    %222 = arith.subf %204, %221 : vector<8x16xf32>
    %223 = vector.broadcast %220 : f32 to vector<1x16xf32>
    %224 = arith.mulf %184, %223 : vector<1x16xf32>
    %225 = vector.broadcast %224 : vector<1x16xf32> to vector<8x16xf32>
    %226 = arith.mulf %222, %225 : vector<8x16xf32>
    %227 = vector.broadcast %186 : vector<1x16xf32> to vector<8x16xf32>
    %228 = arith.addf %226, %227 : vector<8x16xf32>
    %cst_117 = arith.constant 0.000000e+00 : f32
    %229 = vector.broadcast %cst_117 : f32 to vector<8x16xf32>
    %c2_i32 = arith.constant 2 : i32
    %230 = tpu.dynamic_rotate %228 by %c2_i32 dim 0 : vector<8x16xf32>, i32 -> vector<8x16xf32>
    %c-2_i32 = arith.constant -2 : i32
    %231 = vector.broadcast %c-2_i32 : i32 to vector<8x16xi32>
    %232 = arith.addi %11, %231 : vector<8x16xi32>
    %c0_i32_118 = arith.constant 0 : i32
    %233 = vector.broadcast %c0_i32_118 : i32 to vector<8x16xi32>
    %234 = arith.cmpi sge, %232, %233 : vector<8x16xi32>
    %c-2_i32_119 = arith.constant -2 : i32
    %235 = vector.broadcast %c-2_i32_119 : i32 to vector<8x16xi32>
    %236 = arith.addi %11, %235 : vector<8x16xi32>
    %c8_i32_120 = arith.constant 8 : i32
    %237 = vector.broadcast %c8_i32_120 : i32 to vector<8x16xi32>
    %238 = arith.cmpi slt, %236, %237 : vector<8x16xi32>
    %239 = arith.andi %234, %238 : vector<8x16xi1>
    %cst_121 = arith.constant 0.000000e+00 : f32
    %240 = vector.broadcast %cst_121 : f32 to vector<8x16xf32>
    %241 = arith.select %239, %230, %240 : vector<8x16xi1>, vector<8x16xf32>
    %242 = vector.extract_strided_slice %178 {offsets = [0, 0], sizes = [1, 16], strides = [1, 1]} : vector<3x16xf32> to vector<1x16xf32>
    %243 = vector.broadcast %242 : vector<1x16xf32> to vector<8x16xf32>
    %244 = arith.mulf %241, %243 : vector<8x16xf32>
    %245 = arith.addf %229, %244 : vector<8x16xf32>
    %246 = vector.extract_strided_slice %178 {offsets = [1, 0], sizes = [1, 16], strides = [1, 1]} : vector<3x16xf32> to vector<1x16xf32>
    %247 = vector.broadcast %246 : vector<1x16xf32> to vector<8x16xf32>
    %248 = arith.mulf %228, %247 : vector<8x16xf32>
    %249 = arith.addf %245, %248 : vector<8x16xf32>
    %c6_i32 = arith.constant 6 : i32
    %250 = tpu.dynamic_rotate %228 by %c6_i32 dim 0 : vector<8x16xf32>, i32 -> vector<8x16xf32>
    %c2_i32_122 = arith.constant 2 : i32
    %251 = vector.broadcast %c2_i32_122 : i32 to vector<8x16xi32>
    %252 = arith.addi %11, %251 : vector<8x16xi32>
    %c0_i32_123 = arith.constant 0 : i32
    %253 = vector.broadcast %c0_i32_123 : i32 to vector<8x16xi32>
    %254 = arith.cmpi sge, %252, %253 : vector<8x16xi32>
    %c2_i32_124 = arith.constant 2 : i32
    %255 = vector.broadcast %c2_i32_124 : i32 to vector<8x16xi32>
    %256 = arith.addi %11, %255 : vector<8x16xi32>
    %c8_i32_125 = arith.constant 8 : i32
    %257 = vector.broadcast %c8_i32_125 : i32 to vector<8x16xi32>
    %258 = arith.cmpi slt, %256, %257 : vector<8x16xi32>
    %259 = arith.andi %254, %258 : vector<8x16xi1>
    %cst_126 = arith.constant 0.000000e+00 : f32
    %260 = vector.broadcast %cst_126 : f32 to vector<8x16xf32>
    %261 = arith.select %259, %250, %260 : vector<8x16xi1>, vector<8x16xf32>
    %262 = vector.extract_strided_slice %178 {offsets = [2, 0], sizes = [1, 16], strides = [1, 1]} : vector<3x16xf32> to vector<1x16xf32>
    %263 = vector.broadcast %262 : vector<1x16xf32> to vector<8x16xf32>
    %264 = arith.mulf %261, %263 : vector<8x16xf32>
    %265 = arith.addf %249, %264 : vector<8x16xf32>
    %266 = vector.broadcast %188 : vector<1x16xf32> to vector<8x16xf32>
    %267 = arith.addf %265, %266 : vector<8x16xf32>
    %cst_127 = arith.constant 0.000000e+00 : f32
    %268 = vector.broadcast %cst_127 : f32 to vector<8x16xf32>
    %269 = arith.cmpf oge, %267, %268 : vector<8x16xf32>
    %270 = vector.broadcast %196 : f32 to vector<8x16xf32>
    %271 = arith.mulf %270, %267 : vector<8x16xf32>
    %272 = arith.select %269, %267, %271 : vector<8x16xi1>, vector<8x16xf32>
    %273 = vector.shape_cast %272 : vector<8x16xf32> to vector<1x8x16xf32>
    %cst_128 = arith.constant dense<0.000000e+00> : vector<1xf32>
    %274 = vector.multi_reduction <add>, %273, %cst_128 [1, 2] : vector<1x8x16xf32> to vector<1xf32>
    %275 = vector.shape_cast %274 : vector<1xf32> to vector<1x1x1xf32>
    %276 = vector.extract %275[0, 0, 0] : f32 from vector<1x1x1xf32>
    %cst_129 = arith.constant 1.280000e+02 : f32
    %277 = arith.divf %276, %cst_129 : f32
    %278 = arith.mulf %272, %272 : vector<8x16xf32>
    %279 = vector.shape_cast %278 : vector<8x16xf32> to vector<1x8x16xf32>
    %cst_130 = arith.constant dense<0.000000e+00> : vector<1xf32>
    %280 = vector.multi_reduction <add>, %279, %cst_130 [1, 2] : vector<1x8x16xf32> to vector<1xf32>
    %281 = vector.shape_cast %280 : vector<1xf32> to vector<1x1x1xf32>
    %282 = vector.extract %281[0, 0, 0] : f32 from vector<1x1x1xf32>
    %cst_131 = arith.constant 1.280000e+02 : f32
    %283 = arith.divf %282, %cst_131 : f32
    %284 = arith.mulf %277, %277 : f32
    %285 = arith.subf %283, %284 : f32
    %cst_132 = arith.constant 0.000000e+00 : f32
    %286 = arith.maximumf %285, %cst_132 : f32
    %cst_133 = arith.constant 9.99999974E-6 : f32
    %287 = arith.addf %286, %cst_133 : f32
    %288 = math.rsqrt %287 : f32
    %289 = vector.broadcast %277 : f32 to vector<8x16xf32>
    %290 = arith.subf %272, %289 : vector<8x16xf32>
    %291 = vector.broadcast %288 : f32 to vector<1x16xf32>
    %292 = arith.mulf %190, %291 : vector<1x16xf32>
    %293 = vector.broadcast %292 : vector<1x16xf32> to vector<8x16xf32>
    %294 = arith.mulf %290, %293 : vector<8x16xf32>
    %295 = vector.broadcast %192 : vector<1x16xf32> to vector<8x16xf32>
    %296 = arith.addf %294, %295 : vector<8x16xf32>
    %cst_134 = arith.constant dense<0.000000e+00> : vector<8x8xf32>
    %297 = tpu.matmul %296, %180, %cst_134 {dimension_numbers = #tpu.dot_dimension_numbers<[1], [0], [0], [1], [0, 0, 1, 1], [], []>} : vector<8x16xf32>, vector<16x8xf32>, vector<8x8xf32> -> vector<8x8xf32>
    %298 = arith.addf %174, %297 : vector<8x8xf32>
    %299 = vector.broadcast %194 : vector<1x8xf32> to vector<8x8xf32>
    %300 = arith.addf %298, %299 : vector<8x8xf32>
    %c2_135 = arith.constant 2 : index
    %c0_136 = arith.constant 0 : index
    %c0_137 = arith.constant 0 : index
    %301 = vector.load %arg3[%c2_135, %c0_136, %c0_137] : memref<4x32x16xf32, #tpu.memory_space<vmem>>, vector<1x8x16xf32>
    %302 = vector.shape_cast %301 : vector<1x8x16xf32> to vector<8x16xf32>
    %c2_138 = arith.constant 2 : index
    %c8_139 = arith.constant 8 : index
    %c0_140 = arith.constant 0 : index
    %303 = vector.load %arg3[%c2_138, %c8_139, %c0_140] : memref<4x32x16xf32, #tpu.memory_space<vmem>>, vector<1x3x16xf32>
    %304 = vector.shape_cast %303 : vector<1x3x16xf32> to vector<3x16xf32>
    %c2_141 = arith.constant 2 : index
    %c16_142 = arith.constant 16 : index
    %c0_143 = arith.constant 0 : index
    %305 = vector.load %arg3[%c2_141, %c16_142, %c0_143] : memref<4x32x16xf32, #tpu.memory_space<vmem>>, vector<1x16x8xf32>
    %306 = vector.shape_cast %305 : vector<1x16x8xf32> to vector<16x8xf32>
    %c2_144 = arith.constant 2 : index
    %c0_145 = arith.constant 0 : index
    %c0_146 = arith.constant 0 : index
    %307 = vector.load %arg4[%c2_144, %c0_145, %c0_146] : memref<4x8x16xf32, #tpu.memory_space<vmem>>, vector<1x1x16xf32>
    %308 = vector.shape_cast %307 : vector<1x1x16xf32> to vector<1x16xf32>
    %c2_147 = arith.constant 2 : index
    %c1_148 = arith.constant 1 : index
    %c0_149 = arith.constant 0 : index
    %309 = vector.load %arg4[%c2_147, %c1_148, %c0_149] : memref<4x8x16xf32, #tpu.memory_space<vmem>>, vector<1x1x16xf32>
    %310 = vector.shape_cast %309 : vector<1x1x16xf32> to vector<1x16xf32>
    %c2_150 = arith.constant 2 : index
    %c2_151 = arith.constant 2 : index
    %c0_152 = arith.constant 0 : index
    %311 = vector.load %arg4[%c2_150, %c2_151, %c0_152] : memref<4x8x16xf32, #tpu.memory_space<vmem>>, vector<1x1x16xf32>
    %312 = vector.shape_cast %311 : vector<1x1x16xf32> to vector<1x16xf32>
    %c2_153 = arith.constant 2 : index
    %c3_154 = arith.constant 3 : index
    %c0_155 = arith.constant 0 : index
    %313 = vector.load %arg4[%c2_153, %c3_154, %c0_155] : memref<4x8x16xf32, #tpu.memory_space<vmem>>, vector<1x1x16xf32>
    %314 = vector.shape_cast %313 : vector<1x1x16xf32> to vector<1x16xf32>
    %c2_156 = arith.constant 2 : index
    %c4_157 = arith.constant 4 : index
    %c0_158 = arith.constant 0 : index
    %315 = vector.load %arg4[%c2_156, %c4_157, %c0_158] : memref<4x8x16xf32, #tpu.memory_space<vmem>>, vector<1x1x16xf32>
    %316 = vector.shape_cast %315 : vector<1x1x16xf32> to vector<1x16xf32>
    %c2_159 = arith.constant 2 : index
    %c5_160 = arith.constant 5 : index
    %c0_161 = arith.constant 0 : index
    %317 = vector.load %arg4[%c2_159, %c5_160, %c0_161] : memref<4x8x16xf32, #tpu.memory_space<vmem>>, vector<1x1x16xf32>
    %318 = vector.shape_cast %317 : vector<1x1x16xf32> to vector<1x16xf32>
    %c2_162 = arith.constant 2 : index
    %c6_163 = arith.constant 6 : index
    %c0_164 = arith.constant 0 : index
    %319 = vector.load %arg4[%c2_162, %c6_163, %c0_164] : memref<4x8x16xf32, #tpu.memory_space<vmem>>, vector<1x1x8xf32>
    %320 = vector.shape_cast %319 : vector<1x1x8xf32> to vector<1x8xf32>
    %c4_165 = arith.constant 4 : index
    %321 = memref.load %arg1[%c4_165] : memref<9xf32, #tpu.memory_space<smem>>
    %c5_166 = arith.constant 5 : index
    %322 = memref.load %arg1[%c5_166] : memref<9xf32, #tpu.memory_space<smem>>
    %cst_167 = arith.constant dense<0.000000e+00> : vector<8x16xf32>
    %323 = tpu.matmul %300, %302, %cst_167 {dimension_numbers = #tpu.dot_dimension_numbers<[1], [0], [0], [1], [0, 0, 1, 1], [], []>} : vector<8x8xf32>, vector<8x16xf32>, vector<8x16xf32> -> vector<8x16xf32>
    %324 = vector.broadcast %308 : vector<1x16xf32> to vector<8x16xf32>
    %325 = arith.addf %323, %324 : vector<8x16xf32>
    %cst_168 = arith.constant 0.000000e+00 : f32
    %326 = vector.broadcast %cst_168 : f32 to vector<8x16xf32>
    %327 = arith.cmpf oge, %325, %326 : vector<8x16xf32>
    %328 = vector.broadcast %321 : f32 to vector<8x16xf32>
    %329 = arith.mulf %328, %325 : vector<8x16xf32>
    %330 = arith.select %327, %325, %329 : vector<8x16xi1>, vector<8x16xf32>
    %331 = vector.shape_cast %330 : vector<8x16xf32> to vector<1x8x16xf32>
    %cst_169 = arith.constant dense<0.000000e+00> : vector<1xf32>
    %332 = vector.multi_reduction <add>, %331, %cst_169 [1, 2] : vector<1x8x16xf32> to vector<1xf32>
    %333 = vector.shape_cast %332 : vector<1xf32> to vector<1x1x1xf32>
    %334 = vector.extract %333[0, 0, 0] : f32 from vector<1x1x1xf32>
    %cst_170 = arith.constant 1.280000e+02 : f32
    %335 = arith.divf %334, %cst_170 : f32
    %336 = arith.mulf %330, %330 : vector<8x16xf32>
    %337 = vector.shape_cast %336 : vector<8x16xf32> to vector<1x8x16xf32>
    %cst_171 = arith.constant dense<0.000000e+00> : vector<1xf32>
    %338 = vector.multi_reduction <add>, %337, %cst_171 [1, 2] : vector<1x8x16xf32> to vector<1xf32>
    %339 = vector.shape_cast %338 : vector<1xf32> to vector<1x1x1xf32>
    %340 = vector.extract %339[0, 0, 0] : f32 from vector<1x1x1xf32>
    %cst_172 = arith.constant 1.280000e+02 : f32
    %341 = arith.divf %340, %cst_172 : f32
    %342 = arith.mulf %335, %335 : f32
    %343 = arith.subf %341, %342 : f32
    %cst_173 = arith.constant 0.000000e+00 : f32
    %344 = arith.maximumf %343, %cst_173 : f32
    %cst_174 = arith.constant 9.99999974E-6 : f32
    %345 = arith.addf %344, %cst_174 : f32
    %346 = math.rsqrt %345 : f32
    %347 = vector.broadcast %335 : f32 to vector<8x16xf32>
    %348 = arith.subf %330, %347 : vector<8x16xf32>
    %349 = vector.broadcast %346 : f32 to vector<1x16xf32>
    %350 = arith.mulf %310, %349 : vector<1x16xf32>
    %351 = vector.broadcast %350 : vector<1x16xf32> to vector<8x16xf32>
    %352 = arith.mulf %348, %351 : vector<8x16xf32>
    %353 = vector.broadcast %312 : vector<1x16xf32> to vector<8x16xf32>
    %354 = arith.addf %352, %353 : vector<8x16xf32>
    %cst_175 = arith.constant 0.000000e+00 : f32
    %355 = vector.broadcast %cst_175 : f32 to vector<8x16xf32>
    %c1_i32_176 = arith.constant 1 : i32
    %356 = tpu.dynamic_rotate %354 by %c1_i32_176 dim 0 : vector<8x16xf32>, i32 -> vector<8x16xf32>
    %cst_177 = arith.constant 0.000000e+00 : f32
    %357 = vector.broadcast %cst_177 : f32 to vector<8x16xf32>
    %358 = arith.select %113, %356, %357 : vector<8x16xi1>, vector<8x16xf32>
    %359 = vector.extract_strided_slice %304 {offsets = [0, 0], sizes = [1, 16], strides = [1, 1]} : vector<3x16xf32> to vector<1x16xf32>
    %360 = vector.broadcast %359 : vector<1x16xf32> to vector<8x16xf32>
    %361 = arith.mulf %358, %360 : vector<8x16xf32>
    %362 = arith.addf %355, %361 : vector<8x16xf32>
    %363 = vector.extract_strided_slice %304 {offsets = [1, 0], sizes = [1, 16], strides = [1, 1]} : vector<3x16xf32> to vector<1x16xf32>
    %364 = vector.broadcast %363 : vector<1x16xf32> to vector<8x16xf32>
    %365 = arith.mulf %354, %364 : vector<8x16xf32>
    %366 = arith.addf %362, %365 : vector<8x16xf32>
    %c7_i32_178 = arith.constant 7 : i32
    %367 = tpu.dynamic_rotate %354 by %c7_i32_178 dim 0 : vector<8x16xf32>, i32 -> vector<8x16xf32>
    %cst_179 = arith.constant 0.000000e+00 : f32
    %368 = vector.broadcast %cst_179 : f32 to vector<8x16xf32>
    %369 = arith.select %133, %367, %368 : vector<8x16xi1>, vector<8x16xf32>
    %370 = vector.extract_strided_slice %304 {offsets = [2, 0], sizes = [1, 16], strides = [1, 1]} : vector<3x16xf32> to vector<1x16xf32>
    %371 = vector.broadcast %370 : vector<1x16xf32> to vector<8x16xf32>
    %372 = arith.mulf %369, %371 : vector<8x16xf32>
    %373 = arith.addf %366, %372 : vector<8x16xf32>
    %374 = vector.broadcast %314 : vector<1x16xf32> to vector<8x16xf32>
    %375 = arith.addf %373, %374 : vector<8x16xf32>
    %cst_180 = arith.constant 0.000000e+00 : f32
    %376 = vector.broadcast %cst_180 : f32 to vector<8x16xf32>
    %377 = arith.cmpf oge, %375, %376 : vector<8x16xf32>
    %378 = vector.broadcast %322 : f32 to vector<8x16xf32>
    %379 = arith.mulf %378, %375 : vector<8x16xf32>
    %380 = arith.select %377, %375, %379 : vector<8x16xi1>, vector<8x16xf32>
    %381 = vector.shape_cast %380 : vector<8x16xf32> to vector<1x8x16xf32>
    %cst_181 = arith.constant dense<0.000000e+00> : vector<1xf32>
    %382 = vector.multi_reduction <add>, %381, %cst_181 [1, 2] : vector<1x8x16xf32> to vector<1xf32>
    %383 = vector.shape_cast %382 : vector<1xf32> to vector<1x1x1xf32>
    %384 = vector.extract %383[0, 0, 0] : f32 from vector<1x1x1xf32>
    %cst_182 = arith.constant 1.280000e+02 : f32
    %385 = arith.divf %384, %cst_182 : f32
    %386 = arith.mulf %380, %380 : vector<8x16xf32>
    %387 = vector.shape_cast %386 : vector<8x16xf32> to vector<1x8x16xf32>
    %cst_183 = arith.constant dense<0.000000e+00> : vector<1xf32>
    %388 = vector.multi_reduction <add>, %387, %cst_183 [1, 2] : vector<1x8x16xf32> to vector<1xf32>
    %389 = vector.shape_cast %388 : vector<1xf32> to vector<1x1x1xf32>
    %390 = vector.extract %389[0, 0, 0] : f32 from vector<1x1x1xf32>
    %cst_184 = arith.constant 1.280000e+02 : f32
    %391 = arith.divf %390, %cst_184 : f32
    %392 = arith.mulf %385, %385 : f32
    %393 = arith.subf %391, %392 : f32
    %cst_185 = arith.constant 0.000000e+00 : f32
    %394 = arith.maximumf %393, %cst_185 : f32
    %cst_186 = arith.constant 9.99999974E-6 : f32
    %395 = arith.addf %394, %cst_186 : f32
    %396 = math.rsqrt %395 : f32
    %397 = vector.broadcast %385 : f32 to vector<8x16xf32>
    %398 = arith.subf %380, %397 : vector<8x16xf32>
    %399 = vector.broadcast %396 : f32 to vector<1x16xf32>
    %400 = arith.mulf %316, %399 : vector<1x16xf32>
    %401 = vector.broadcast %400 : vector<1x16xf32> to vector<8x16xf32>
    %402 = arith.mulf %398, %401 : vector<8x16xf32>
    %403 = vector.broadcast %318 : vector<1x16xf32> to vector<8x16xf32>
    %404 = arith.addf %402, %403 : vector<8x16xf32>
    %cst_187 = arith.constant dense<0.000000e+00> : vector<8x8xf32>
    %405 = tpu.matmul %404, %306, %cst_187 {dimension_numbers = #tpu.dot_dimension_numbers<[1], [0], [0], [1], [0, 0, 1, 1], [], []>} : vector<8x16xf32>, vector<16x8xf32>, vector<8x8xf32> -> vector<8x8xf32>
    %406 = arith.addf %300, %405 : vector<8x8xf32>
    %407 = vector.broadcast %320 : vector<1x8xf32> to vector<8x8xf32>
    %408 = arith.addf %406, %407 : vector<8x8xf32>
    %c3_188 = arith.constant 3 : index
    %c0_189 = arith.constant 0 : index
    %c0_190 = arith.constant 0 : index
    %409 = vector.load %arg3[%c3_188, %c0_189, %c0_190] : memref<4x32x16xf32, #tpu.memory_space<vmem>>, vector<1x8x16xf32>
    %410 = vector.shape_cast %409 : vector<1x8x16xf32> to vector<8x16xf32>
    %c3_191 = arith.constant 3 : index
    %c8_192 = arith.constant 8 : index
    %c0_193 = arith.constant 0 : index
    %411 = vector.load %arg3[%c3_191, %c8_192, %c0_193] : memref<4x32x16xf32, #tpu.memory_space<vmem>>, vector<1x3x16xf32>
    %412 = vector.shape_cast %411 : vector<1x3x16xf32> to vector<3x16xf32>
    %c3_194 = arith.constant 3 : index
    %c16_195 = arith.constant 16 : index
    %c0_196 = arith.constant 0 : index
    %413 = vector.load %arg3[%c3_194, %c16_195, %c0_196] : memref<4x32x16xf32, #tpu.memory_space<vmem>>, vector<1x16x8xf32>
    %414 = vector.shape_cast %413 : vector<1x16x8xf32> to vector<16x8xf32>
    %c3_197 = arith.constant 3 : index
    %c0_198 = arith.constant 0 : index
    %c0_199 = arith.constant 0 : index
    %415 = vector.load %arg4[%c3_197, %c0_198, %c0_199] : memref<4x8x16xf32, #tpu.memory_space<vmem>>, vector<1x1x16xf32>
    %416 = vector.shape_cast %415 : vector<1x1x16xf32> to vector<1x16xf32>
    %c3_200 = arith.constant 3 : index
    %c1_201 = arith.constant 1 : index
    %c0_202 = arith.constant 0 : index
    %417 = vector.load %arg4[%c3_200, %c1_201, %c0_202] : memref<4x8x16xf32, #tpu.memory_space<vmem>>, vector<1x1x16xf32>
    %418 = vector.shape_cast %417 : vector<1x1x16xf32> to vector<1x16xf32>
    %c3_203 = arith.constant 3 : index
    %c2_204 = arith.constant 2 : index
    %c0_205 = arith.constant 0 : index
    %419 = vector.load %arg4[%c3_203, %c2_204, %c0_205] : memref<4x8x16xf32, #tpu.memory_space<vmem>>, vector<1x1x16xf32>
    %420 = vector.shape_cast %419 : vector<1x1x16xf32> to vector<1x16xf32>
    %c3_206 = arith.constant 3 : index
    %c3_207 = arith.constant 3 : index
    %c0_208 = arith.constant 0 : index
    %421 = vector.load %arg4[%c3_206, %c3_207, %c0_208] : memref<4x8x16xf32, #tpu.memory_space<vmem>>, vector<1x1x16xf32>
    %422 = vector.shape_cast %421 : vector<1x1x16xf32> to vector<1x16xf32>
    %c3_209 = arith.constant 3 : index
    %c4_210 = arith.constant 4 : index
    %c0_211 = arith.constant 0 : index
    %423 = vector.load %arg4[%c3_209, %c4_210, %c0_211] : memref<4x8x16xf32, #tpu.memory_space<vmem>>, vector<1x1x16xf32>
    %424 = vector.shape_cast %423 : vector<1x1x16xf32> to vector<1x16xf32>
    %c3_212 = arith.constant 3 : index
    %c5_213 = arith.constant 5 : index
    %c0_214 = arith.constant 0 : index
    %425 = vector.load %arg4[%c3_212, %c5_213, %c0_214] : memref<4x8x16xf32, #tpu.memory_space<vmem>>, vector<1x1x16xf32>
    %426 = vector.shape_cast %425 : vector<1x1x16xf32> to vector<1x16xf32>
    %c3_215 = arith.constant 3 : index
    %c6_216 = arith.constant 6 : index
    %c0_217 = arith.constant 0 : index
    %427 = vector.load %arg4[%c3_215, %c6_216, %c0_217] : memref<4x8x16xf32, #tpu.memory_space<vmem>>, vector<1x1x8xf32>
    %428 = vector.shape_cast %427 : vector<1x1x8xf32> to vector<1x8xf32>
    %c6_218 = arith.constant 6 : index
    %429 = memref.load %arg1[%c6_218] : memref<9xf32, #tpu.memory_space<smem>>
    %c7 = arith.constant 7 : index
    %430 = memref.load %arg1[%c7] : memref<9xf32, #tpu.memory_space<smem>>
    %cst_219 = arith.constant dense<0.000000e+00> : vector<8x16xf32>
    %431 = tpu.matmul %408, %410, %cst_219 {dimension_numbers = #tpu.dot_dimension_numbers<[1], [0], [0], [1], [0, 0, 1, 1], [], []>} : vector<8x8xf32>, vector<8x16xf32>, vector<8x16xf32> -> vector<8x16xf32>
    %432 = vector.broadcast %416 : vector<1x16xf32> to vector<8x16xf32>
    %433 = arith.addf %431, %432 : vector<8x16xf32>
    %cst_220 = arith.constant 0.000000e+00 : f32
    %434 = vector.broadcast %cst_220 : f32 to vector<8x16xf32>
    %435 = arith.cmpf oge, %433, %434 : vector<8x16xf32>
    %436 = vector.broadcast %429 : f32 to vector<8x16xf32>
    %437 = arith.mulf %436, %433 : vector<8x16xf32>
    %438 = arith.select %435, %433, %437 : vector<8x16xi1>, vector<8x16xf32>
    %439 = vector.shape_cast %438 : vector<8x16xf32> to vector<1x8x16xf32>
    %cst_221 = arith.constant dense<0.000000e+00> : vector<1xf32>
    %440 = vector.multi_reduction <add>, %439, %cst_221 [1, 2] : vector<1x8x16xf32> to vector<1xf32>
    %441 = vector.shape_cast %440 : vector<1xf32> to vector<1x1x1xf32>
    %442 = vector.extract %441[0, 0, 0] : f32 from vector<1x1x1xf32>
    %cst_222 = arith.constant 1.280000e+02 : f32
    %443 = arith.divf %442, %cst_222 : f32
    %444 = arith.mulf %438, %438 : vector<8x16xf32>
    %445 = vector.shape_cast %444 : vector<8x16xf32> to vector<1x8x16xf32>
    %cst_223 = arith.constant dense<0.000000e+00> : vector<1xf32>
    %446 = vector.multi_reduction <add>, %445, %cst_223 [1, 2] : vector<1x8x16xf32> to vector<1xf32>
    %447 = vector.shape_cast %446 : vector<1xf32> to vector<1x1x1xf32>
    %448 = vector.extract %447[0, 0, 0] : f32 from vector<1x1x1xf32>
    %cst_224 = arith.constant 1.280000e+02 : f32
    %449 = arith.divf %448, %cst_224 : f32
    %450 = arith.mulf %443, %443 : f32
    %451 = arith.subf %449, %450 : f32
    %cst_225 = arith.constant 0.000000e+00 : f32
    %452 = arith.maximumf %451, %cst_225 : f32
    %cst_226 = arith.constant 9.99999974E-6 : f32
    %453 = arith.addf %452, %cst_226 : f32
    %454 = math.rsqrt %453 : f32
    %455 = vector.broadcast %443 : f32 to vector<8x16xf32>
    %456 = arith.subf %438, %455 : vector<8x16xf32>
    %457 = vector.broadcast %454 : f32 to vector<1x16xf32>
    %458 = arith.mulf %418, %457 : vector<1x16xf32>
    %459 = vector.broadcast %458 : vector<1x16xf32> to vector<8x16xf32>
    %460 = arith.mulf %456, %459 : vector<8x16xf32>
    %461 = vector.broadcast %420 : vector<1x16xf32> to vector<8x16xf32>
    %462 = arith.addf %460, %461 : vector<8x16xf32>
    %cst_227 = arith.constant 0.000000e+00 : f32
    %463 = vector.broadcast %cst_227 : f32 to vector<8x16xf32>
    %c2_i32_228 = arith.constant 2 : i32
    %464 = tpu.dynamic_rotate %462 by %c2_i32_228 dim 0 : vector<8x16xf32>, i32 -> vector<8x16xf32>
    %cst_229 = arith.constant 0.000000e+00 : f32
    %465 = vector.broadcast %cst_229 : f32 to vector<8x16xf32>
    %466 = arith.select %239, %464, %465 : vector<8x16xi1>, vector<8x16xf32>
    %467 = vector.extract_strided_slice %412 {offsets = [0, 0], sizes = [1, 16], strides = [1, 1]} : vector<3x16xf32> to vector<1x16xf32>
    %468 = vector.broadcast %467 : vector<1x16xf32> to vector<8x16xf32>
    %469 = arith.mulf %466, %468 : vector<8x16xf32>
    %470 = arith.addf %463, %469 : vector<8x16xf32>
    %471 = vector.extract_strided_slice %412 {offsets = [1, 0], sizes = [1, 16], strides = [1, 1]} : vector<3x16xf32> to vector<1x16xf32>
    %472 = vector.broadcast %471 : vector<1x16xf32> to vector<8x16xf32>
    %473 = arith.mulf %462, %472 : vector<8x16xf32>
    %474 = arith.addf %470, %473 : vector<8x16xf32>
    %c6_i32_230 = arith.constant 6 : i32
    %475 = tpu.dynamic_rotate %462 by %c6_i32_230 dim 0 : vector<8x16xf32>, i32 -> vector<8x16xf32>
    %cst_231 = arith.constant 0.000000e+00 : f32
    %476 = vector.broadcast %cst_231 : f32 to vector<8x16xf32>
    %477 = arith.select %259, %475, %476 : vector<8x16xi1>, vector<8x16xf32>
    %478 = vector.extract_strided_slice %412 {offsets = [2, 0], sizes = [1, 16], strides = [1, 1]} : vector<3x16xf32> to vector<1x16xf32>
    %479 = vector.broadcast %478 : vector<1x16xf32> to vector<8x16xf32>
    %480 = arith.mulf %477, %479 : vector<8x16xf32>
    %481 = arith.addf %474, %480 : vector<8x16xf32>
    %482 = vector.broadcast %422 : vector<1x16xf32> to vector<8x16xf32>
    %483 = arith.addf %481, %482 : vector<8x16xf32>
    %cst_232 = arith.constant 0.000000e+00 : f32
    %484 = vector.broadcast %cst_232 : f32 to vector<8x16xf32>
    %485 = arith.cmpf oge, %483, %484 : vector<8x16xf32>
    %486 = vector.broadcast %430 : f32 to vector<8x16xf32>
    %487 = arith.mulf %486, %483 : vector<8x16xf32>
    %488 = arith.select %485, %483, %487 : vector<8x16xi1>, vector<8x16xf32>
    %489 = vector.shape_cast %488 : vector<8x16xf32> to vector<1x8x16xf32>
    %cst_233 = arith.constant dense<0.000000e+00> : vector<1xf32>
    %490 = vector.multi_reduction <add>, %489, %cst_233 [1, 2] : vector<1x8x16xf32> to vector<1xf32>
    %491 = vector.shape_cast %490 : vector<1xf32> to vector<1x1x1xf32>
    %492 = vector.extract %491[0, 0, 0] : f32 from vector<1x1x1xf32>
    %cst_234 = arith.constant 1.280000e+02 : f32
    %493 = arith.divf %492, %cst_234 : f32
    %494 = arith.mulf %488, %488 : vector<8x16xf32>
    %495 = vector.shape_cast %494 : vector<8x16xf32> to vector<1x8x16xf32>
    %cst_235 = arith.constant dense<0.000000e+00> : vector<1xf32>
    %496 = vector.multi_reduction <add>, %495, %cst_235 [1, 2] : vector<1x8x16xf32> to vector<1xf32>
    %497 = vector.shape_cast %496 : vector<1xf32> to vector<1x1x1xf32>
    %498 = vector.extract %497[0, 0, 0] : f32 from vector<1x1x1xf32>
    %cst_236 = arith.constant 1.280000e+02 : f32
    %499 = arith.divf %498, %cst_236 : f32
    %500 = arith.mulf %493, %493 : f32
    %501 = arith.subf %499, %500 : f32
    %cst_237 = arith.constant 0.000000e+00 : f32
    %502 = arith.maximumf %501, %cst_237 : f32
    %cst_238 = arith.constant 9.99999974E-6 : f32
    %503 = arith.addf %502, %cst_238 : f32
    %504 = math.rsqrt %503 : f32
    %505 = vector.broadcast %493 : f32 to vector<8x16xf32>
    %506 = arith.subf %488, %505 : vector<8x16xf32>
    %507 = vector.broadcast %504 : f32 to vector<1x16xf32>
    %508 = arith.mulf %424, %507 : vector<1x16xf32>
    %509 = vector.broadcast %508 : vector<1x16xf32> to vector<8x16xf32>
    %510 = arith.mulf %506, %509 : vector<8x16xf32>
    %511 = vector.broadcast %426 : vector<1x16xf32> to vector<8x16xf32>
    %512 = arith.addf %510, %511 : vector<8x16xf32>
    %cst_239 = arith.constant dense<0.000000e+00> : vector<8x8xf32>
    %513 = tpu.matmul %512, %414, %cst_239 {dimension_numbers = #tpu.dot_dimension_numbers<[1], [0], [0], [1], [0, 0, 1, 1], [], []>} : vector<8x16xf32>, vector<16x8xf32>, vector<8x8xf32> -> vector<8x8xf32>
    %514 = arith.addf %408, %513 : vector<8x8xf32>
    %515 = vector.broadcast %428 : vector<1x8xf32> to vector<8x8xf32>
    %516 = arith.addf %514, %515 : vector<8x8xf32>
    %cst_240 = arith.constant dense<0.000000e+00> : vector<8x16xf32>
    %517 = tpu.matmul %516, %4, %cst_240 {dimension_numbers = #tpu.dot_dimension_numbers<[1], [0], [0], [1], [0, 0, 1, 1], [], []>} : vector<8x8xf32>, vector<8x16xf32>, vector<8x16xf32> -> vector<8x16xf32>
    %518 = vector.broadcast %9 : vector<1x16xf32> to vector<8x16xf32>
    %519 = arith.addf %517, %518 : vector<8x16xf32>
    %520 = arith.mulf %21, %519 : vector<8x16xf32>
    %cst_241 = arith.constant dense<0.000000e+00> : vector<8x128xf32>
    %521 = tpu.matmul %520, %1, %cst_241 {dimension_numbers = #tpu.dot_dimension_numbers<[1], [0], [0], [1], [0, 0, 1, 1], [], []>} : vector<8x16xf32>, vector<16x128xf32>, vector<8x128xf32> -> vector<8x128xf32>
    %c0_i32_242 = arith.constant 0 : i32
    %522 = tpu.dynamic_rotate %521 by %c0_i32_242 dim 1 {stride = 4 : si32, stride_dimension = 0 : si32} : vector<8x128xf32>, i32 -> vector<8x128xf32>
    %cst_243 = arith.constant dense<0.000000e+00> : vector<128xf32>
    %523 = vector.multi_reduction <add>, %522, %cst_243 [0] : vector<8x128xf32> to vector<128xf32>
    %524 = vector.shape_cast %523 : vector<128xf32> to vector<1x128xf32>
    %525 = vector.broadcast %10 : f32 to vector<1x128xf32>
    %526 = arith.addf %524, %525 : vector<1x128xf32>
    %527 = vector.extract_strided_slice %14 {offsets = [1, 0], sizes = [1, 128], strides = [1, 1]} : vector<2x128xf32> to vector<1x128xf32>
    %528 = vector.shape_cast %527 : vector<1x128xf32> to vector<1x128xf32>
    %529 = vector.broadcast %528 : vector<1x128xf32> to vector<8x128xf32>
    %c0_i32_244 = arith.constant 0 : i32
    %530 = tpu.dynamic_rotate %529 by %c0_i32_244 dim 1 {stride = 124 : si32, stride_dimension = 0 : si32} : vector<8x128xf32>, i32 -> vector<8x128xf32>
    %cst_245 = arith.constant dense<0.000000e+00> : vector<8x16xf32>
    %531 = tpu.matmul %530, %2, %cst_245 {dimension_numbers = #tpu.dot_dimension_numbers<[1], [0], [0], [1], [0, 0, 1, 1], [], []>} : vector<8x128xf32>, vector<128x16xf32>, vector<8x16xf32> -> vector<8x16xf32>
    %532 = vector.broadcast %5 : vector<1x16xf32> to vector<8x16xf32>
    %533 = arith.addf %531, %532 : vector<8x16xf32>
    %534 = vector.shape_cast %533 : vector<8x16xf32> to vector<1x8x16xf32>
    %cst_246 = arith.constant dense<0.000000e+00> : vector<1xf32>
    %535 = vector.multi_reduction <add>, %534, %cst_246 [1, 2] : vector<1x8x16xf32> to vector<1xf32>
    %536 = vector.shape_cast %535 : vector<1xf32> to vector<1x1x1xf32>
    %537 = vector.extract %536[0, 0, 0] : f32 from vector<1x1x1xf32>
    %cst_247 = arith.constant 1.280000e+02 : f32
    %538 = arith.divf %537, %cst_247 : f32
    %539 = arith.mulf %533, %533 : vector<8x16xf32>
    %540 = vector.shape_cast %539 : vector<8x16xf32> to vector<1x8x16xf32>
    %cst_248 = arith.constant dense<0.000000e+00> : vector<1xf32>
    %541 = vector.multi_reduction <add>, %540, %cst_248 [1, 2] : vector<1x8x16xf32> to vector<1xf32>
    %542 = vector.shape_cast %541 : vector<1xf32> to vector<1x1x1xf32>
    %543 = vector.extract %542[0, 0, 0] : f32 from vector<1x1x1xf32>
    %cst_249 = arith.constant 1.280000e+02 : f32
    %544 = arith.divf %543, %cst_249 : f32
    %545 = arith.mulf %538, %538 : f32
    %546 = arith.subf %544, %545 : f32
    %cst_250 = arith.constant 0.000000e+00 : f32
    %547 = arith.maximumf %546, %cst_250 : f32
    %cst_251 = arith.constant 9.99999974E-6 : f32
    %548 = arith.addf %547, %cst_251 : f32
    %549 = math.rsqrt %548 : f32
    %550 = vector.broadcast %538 : f32 to vector<8x16xf32>
    %551 = arith.subf %533, %550 : vector<8x16xf32>
    %552 = vector.broadcast %549 : f32 to vector<1x16xf32>
    %553 = arith.mulf %6, %552 : vector<1x16xf32>
    %554 = vector.broadcast %553 : vector<1x16xf32> to vector<8x16xf32>
    %555 = arith.mulf %551, %554 : vector<8x16xf32>
    %556 = vector.broadcast %7 : vector<1x16xf32> to vector<8x16xf32>
    %557 = arith.addf %555, %556 : vector<8x16xf32>
    %cst_252 = arith.constant dense<0.000000e+00> : vector<8x8xf32>
    %558 = tpu.matmul %557, %3, %cst_252 {dimension_numbers = #tpu.dot_dimension_numbers<[1], [0], [0], [1], [0, 0, 1, 1], [], []>} : vector<8x16xf32>, vector<16x8xf32>, vector<8x8xf32> -> vector<8x8xf32>
    %559 = vector.broadcast %8 : vector<1x8xf32> to vector<8x8xf32>
    %560 = arith.addf %558, %559 : vector<8x8xf32>
    %c0_253 = arith.constant 0 : index
    %c0_254 = arith.constant 0 : index
    %c0_255 = arith.constant 0 : index
    %561 = vector.load %arg3[%c0_253, %c0_254, %c0_255] : memref<4x32x16xf32, #tpu.memory_space<vmem>>, vector<1x8x16xf32>
    %562 = vector.shape_cast %561 : vector<1x8x16xf32> to vector<8x16xf32>
    %c0_256 = arith.constant 0 : index
    %c8_257 = arith.constant 8 : index
    %c0_258 = arith.constant 0 : index
    %563 = vector.load %arg3[%c0_256, %c8_257, %c0_258] : memref<4x32x16xf32, #tpu.memory_space<vmem>>, vector<1x3x16xf32>
    %564 = vector.shape_cast %563 : vector<1x3x16xf32> to vector<3x16xf32>
    %c0_259 = arith.constant 0 : index
    %c16_260 = arith.constant 16 : index
    %c0_261 = arith.constant 0 : index
    %565 = vector.load %arg3[%c0_259, %c16_260, %c0_261] : memref<4x32x16xf32, #tpu.memory_space<vmem>>, vector<1x16x8xf32>
    %566 = vector.shape_cast %565 : vector<1x16x8xf32> to vector<16x8xf32>
    %c0_262 = arith.constant 0 : index
    %c0_263 = arith.constant 0 : index
    %c0_264 = arith.constant 0 : index
    %567 = vector.load %arg4[%c0_262, %c0_263, %c0_264] : memref<4x8x16xf32, #tpu.memory_space<vmem>>, vector<1x1x16xf32>
    %568 = vector.shape_cast %567 : vector<1x1x16xf32> to vector<1x16xf32>
    %c0_265 = arith.constant 0 : index
    %c1_266 = arith.constant 1 : index
    %c0_267 = arith.constant 0 : index
    %569 = vector.load %arg4[%c0_265, %c1_266, %c0_267] : memref<4x8x16xf32, #tpu.memory_space<vmem>>, vector<1x1x16xf32>
    %570 = vector.shape_cast %569 : vector<1x1x16xf32> to vector<1x16xf32>
    %c0_268 = arith.constant 0 : index
    %c2_269 = arith.constant 2 : index
    %c0_270 = arith.constant 0 : index
    %571 = vector.load %arg4[%c0_268, %c2_269, %c0_270] : memref<4x8x16xf32, #tpu.memory_space<vmem>>, vector<1x1x16xf32>
    %572 = vector.shape_cast %571 : vector<1x1x16xf32> to vector<1x16xf32>
    %c0_271 = arith.constant 0 : index
    %c3_272 = arith.constant 3 : index
    %c0_273 = arith.constant 0 : index
    %573 = vector.load %arg4[%c0_271, %c3_272, %c0_273] : memref<4x8x16xf32, #tpu.memory_space<vmem>>, vector<1x1x16xf32>
    %574 = vector.shape_cast %573 : vector<1x1x16xf32> to vector<1x16xf32>
    %c0_274 = arith.constant 0 : index
    %c4_275 = arith.constant 4 : index
    %c0_276 = arith.constant 0 : index
    %575 = vector.load %arg4[%c0_274, %c4_275, %c0_276] : memref<4x8x16xf32, #tpu.memory_space<vmem>>, vector<1x1x16xf32>
    %576 = vector.shape_cast %575 : vector<1x1x16xf32> to vector<1x16xf32>
    %c0_277 = arith.constant 0 : index
    %c5_278 = arith.constant 5 : index
    %c0_279 = arith.constant 0 : index
    %577 = vector.load %arg4[%c0_277, %c5_278, %c0_279] : memref<4x8x16xf32, #tpu.memory_space<vmem>>, vector<1x1x16xf32>
    %578 = vector.shape_cast %577 : vector<1x1x16xf32> to vector<1x16xf32>
    %c0_280 = arith.constant 0 : index
    %c6_281 = arith.constant 6 : index
    %c0_282 = arith.constant 0 : index
    %579 = vector.load %arg4[%c0_280, %c6_281, %c0_282] : memref<4x8x16xf32, #tpu.memory_space<vmem>>, vector<1x1x8xf32>
    %580 = vector.shape_cast %579 : vector<1x1x8xf32> to vector<1x8xf32>
    %c0_283 = arith.constant 0 : index
    %581 = memref.load %arg1[%c0_283] : memref<9xf32, #tpu.memory_space<smem>>
    %c1_284 = arith.constant 1 : index
    %582 = memref.load %arg1[%c1_284] : memref<9xf32, #tpu.memory_space<smem>>
    %cst_285 = arith.constant dense<0.000000e+00> : vector<8x16xf32>
    %583 = tpu.matmul %560, %562, %cst_285 {dimension_numbers = #tpu.dot_dimension_numbers<[1], [0], [0], [1], [0, 0, 1, 1], [], []>} : vector<8x8xf32>, vector<8x16xf32>, vector<8x16xf32> -> vector<8x16xf32>
    %584 = vector.broadcast %568 : vector<1x16xf32> to vector<8x16xf32>
    %585 = arith.addf %583, %584 : vector<8x16xf32>
    %cst_286 = arith.constant 0.000000e+00 : f32
    %586 = vector.broadcast %cst_286 : f32 to vector<8x16xf32>
    %587 = arith.cmpf oge, %585, %586 : vector<8x16xf32>
    %588 = vector.broadcast %581 : f32 to vector<8x16xf32>
    %589 = arith.mulf %588, %585 : vector<8x16xf32>
    %590 = arith.select %587, %585, %589 : vector<8x16xi1>, vector<8x16xf32>
    %591 = vector.shape_cast %590 : vector<8x16xf32> to vector<1x8x16xf32>
    %cst_287 = arith.constant dense<0.000000e+00> : vector<1xf32>
    %592 = vector.multi_reduction <add>, %591, %cst_287 [1, 2] : vector<1x8x16xf32> to vector<1xf32>
    %593 = vector.shape_cast %592 : vector<1xf32> to vector<1x1x1xf32>
    %594 = vector.extract %593[0, 0, 0] : f32 from vector<1x1x1xf32>
    %cst_288 = arith.constant 1.280000e+02 : f32
    %595 = arith.divf %594, %cst_288 : f32
    %596 = arith.mulf %590, %590 : vector<8x16xf32>
    %597 = vector.shape_cast %596 : vector<8x16xf32> to vector<1x8x16xf32>
    %cst_289 = arith.constant dense<0.000000e+00> : vector<1xf32>
    %598 = vector.multi_reduction <add>, %597, %cst_289 [1, 2] : vector<1x8x16xf32> to vector<1xf32>
    %599 = vector.shape_cast %598 : vector<1xf32> to vector<1x1x1xf32>
    %600 = vector.extract %599[0, 0, 0] : f32 from vector<1x1x1xf32>
    %cst_290 = arith.constant 1.280000e+02 : f32
    %601 = arith.divf %600, %cst_290 : f32
    %602 = arith.mulf %595, %595 : f32
    %603 = arith.subf %601, %602 : f32
    %cst_291 = arith.constant 0.000000e+00 : f32
    %604 = arith.maximumf %603, %cst_291 : f32
    %cst_292 = arith.constant 9.99999974E-6 : f32
    %605 = arith.addf %604, %cst_292 : f32
    %606 = math.rsqrt %605 : f32
    %607 = vector.broadcast %595 : f32 to vector<8x16xf32>
    %608 = arith.subf %590, %607 : vector<8x16xf32>
    %609 = vector.broadcast %606 : f32 to vector<1x16xf32>
    %610 = arith.mulf %570, %609 : vector<1x16xf32>
    %611 = vector.broadcast %610 : vector<1x16xf32> to vector<8x16xf32>
    %612 = arith.mulf %608, %611 : vector<8x16xf32>
    %613 = vector.broadcast %572 : vector<1x16xf32> to vector<8x16xf32>
    %614 = arith.addf %612, %613 : vector<8x16xf32>
    %cst_293 = arith.constant 0.000000e+00 : f32
    %615 = vector.broadcast %cst_293 : f32 to vector<8x16xf32>
    %c1_i32_294 = arith.constant 1 : i32
    %616 = tpu.dynamic_rotate %614 by %c1_i32_294 dim 0 : vector<8x16xf32>, i32 -> vector<8x16xf32>
    %cst_295 = arith.constant 0.000000e+00 : f32
    %617 = vector.broadcast %cst_295 : f32 to vector<8x16xf32>
    %618 = arith.select %113, %616, %617 : vector<8x16xi1>, vector<8x16xf32>
    %619 = vector.extract_strided_slice %564 {offsets = [0, 0], sizes = [1, 16], strides = [1, 1]} : vector<3x16xf32> to vector<1x16xf32>
    %620 = vector.broadcast %619 : vector<1x16xf32> to vector<8x16xf32>
    %621 = arith.mulf %618, %620 : vector<8x16xf32>
    %622 = arith.addf %615, %621 : vector<8x16xf32>
    %623 = vector.extract_strided_slice %564 {offsets = [1, 0], sizes = [1, 16], strides = [1, 1]} : vector<3x16xf32> to vector<1x16xf32>
    %624 = vector.broadcast %623 : vector<1x16xf32> to vector<8x16xf32>
    %625 = arith.mulf %614, %624 : vector<8x16xf32>
    %626 = arith.addf %622, %625 : vector<8x16xf32>
    %c7_i32_296 = arith.constant 7 : i32
    %627 = tpu.dynamic_rotate %614 by %c7_i32_296 dim 0 : vector<8x16xf32>, i32 -> vector<8x16xf32>
    %cst_297 = arith.constant 0.000000e+00 : f32
    %628 = vector.broadcast %cst_297 : f32 to vector<8x16xf32>
    %629 = arith.select %133, %627, %628 : vector<8x16xi1>, vector<8x16xf32>
    %630 = vector.extract_strided_slice %564 {offsets = [2, 0], sizes = [1, 16], strides = [1, 1]} : vector<3x16xf32> to vector<1x16xf32>
    %631 = vector.broadcast %630 : vector<1x16xf32> to vector<8x16xf32>
    %632 = arith.mulf %629, %631 : vector<8x16xf32>
    %633 = arith.addf %626, %632 : vector<8x16xf32>
    %634 = vector.broadcast %574 : vector<1x16xf32> to vector<8x16xf32>
    %635 = arith.addf %633, %634 : vector<8x16xf32>
    %cst_298 = arith.constant 0.000000e+00 : f32
    %636 = vector.broadcast %cst_298 : f32 to vector<8x16xf32>
    %637 = arith.cmpf oge, %635, %636 : vector<8x16xf32>
    %638 = vector.broadcast %582 : f32 to vector<8x16xf32>
    %639 = arith.mulf %638, %635 : vector<8x16xf32>
    %640 = arith.select %637, %635, %639 : vector<8x16xi1>, vector<8x16xf32>
    %641 = vector.shape_cast %640 : vector<8x16xf32> to vector<1x8x16xf32>
    %cst_299 = arith.constant dense<0.000000e+00> : vector<1xf32>
    %642 = vector.multi_reduction <add>, %641, %cst_299 [1, 2] : vector<1x8x16xf32> to vector<1xf32>
    %643 = vector.shape_cast %642 : vector<1xf32> to vector<1x1x1xf32>
    %644 = vector.extract %643[0, 0, 0] : f32 from vector<1x1x1xf32>
    %cst_300 = arith.constant 1.280000e+02 : f32
    %645 = arith.divf %644, %cst_300 : f32
    %646 = arith.mulf %640, %640 : vector<8x16xf32>
    %647 = vector.shape_cast %646 : vector<8x16xf32> to vector<1x8x16xf32>
    %cst_301 = arith.constant dense<0.000000e+00> : vector<1xf32>
    %648 = vector.multi_reduction <add>, %647, %cst_301 [1, 2] : vector<1x8x16xf32> to vector<1xf32>
    %649 = vector.shape_cast %648 : vector<1xf32> to vector<1x1x1xf32>
    %650 = vector.extract %649[0, 0, 0] : f32 from vector<1x1x1xf32>
    %cst_302 = arith.constant 1.280000e+02 : f32
    %651 = arith.divf %650, %cst_302 : f32
    %652 = arith.mulf %645, %645 : f32
    %653 = arith.subf %651, %652 : f32
    %cst_303 = arith.constant 0.000000e+00 : f32
    %654 = arith.maximumf %653, %cst_303 : f32
    %cst_304 = arith.constant 9.99999974E-6 : f32
    %655 = arith.addf %654, %cst_304 : f32
    %656 = math.rsqrt %655 : f32
    %657 = vector.broadcast %645 : f32 to vector<8x16xf32>
    %658 = arith.subf %640, %657 : vector<8x16xf32>
    %659 = vector.broadcast %656 : f32 to vector<1x16xf32>
    %660 = arith.mulf %576, %659 : vector<1x16xf32>
    %661 = vector.broadcast %660 : vector<1x16xf32> to vector<8x16xf32>
    %662 = arith.mulf %658, %661 : vector<8x16xf32>
    %663 = vector.broadcast %578 : vector<1x16xf32> to vector<8x16xf32>
    %664 = arith.addf %662, %663 : vector<8x16xf32>
    %cst_305 = arith.constant dense<0.000000e+00> : vector<8x8xf32>
    %665 = tpu.matmul %664, %566, %cst_305 {dimension_numbers = #tpu.dot_dimension_numbers<[1], [0], [0], [1], [0, 0, 1, 1], [], []>} : vector<8x16xf32>, vector<16x8xf32>, vector<8x8xf32> -> vector<8x8xf32>
    %666 = arith.addf %560, %665 : vector<8x8xf32>
    %667 = vector.broadcast %580 : vector<1x8xf32> to vector<8x8xf32>
    %668 = arith.addf %666, %667 : vector<8x8xf32>
    %c1_306 = arith.constant 1 : index
    %c0_307 = arith.constant 0 : index
    %c0_308 = arith.constant 0 : index
    %669 = vector.load %arg3[%c1_306, %c0_307, %c0_308] : memref<4x32x16xf32, #tpu.memory_space<vmem>>, vector<1x8x16xf32>
    %670 = vector.shape_cast %669 : vector<1x8x16xf32> to vector<8x16xf32>
    %c1_309 = arith.constant 1 : index
    %c8_310 = arith.constant 8 : index
    %c0_311 = arith.constant 0 : index
    %671 = vector.load %arg3[%c1_309, %c8_310, %c0_311] : memref<4x32x16xf32, #tpu.memory_space<vmem>>, vector<1x3x16xf32>
    %672 = vector.shape_cast %671 : vector<1x3x16xf32> to vector<3x16xf32>
    %c1_312 = arith.constant 1 : index
    %c16_313 = arith.constant 16 : index
    %c0_314 = arith.constant 0 : index
    %673 = vector.load %arg3[%c1_312, %c16_313, %c0_314] : memref<4x32x16xf32, #tpu.memory_space<vmem>>, vector<1x16x8xf32>
    %674 = vector.shape_cast %673 : vector<1x16x8xf32> to vector<16x8xf32>
    %c1_315 = arith.constant 1 : index
    %c0_316 = arith.constant 0 : index
    %c0_317 = arith.constant 0 : index
    %675 = vector.load %arg4[%c1_315, %c0_316, %c0_317] : memref<4x8x16xf32, #tpu.memory_space<vmem>>, vector<1x1x16xf32>
    %676 = vector.shape_cast %675 : vector<1x1x16xf32> to vector<1x16xf32>
    %c1_318 = arith.constant 1 : index
    %c1_319 = arith.constant 1 : index
    %c0_320 = arith.constant 0 : index
    %677 = vector.load %arg4[%c1_318, %c1_319, %c0_320] : memref<4x8x16xf32, #tpu.memory_space<vmem>>, vector<1x1x16xf32>
    %678 = vector.shape_cast %677 : vector<1x1x16xf32> to vector<1x16xf32>
    %c1_321 = arith.constant 1 : index
    %c2_322 = arith.constant 2 : index
    %c0_323 = arith.constant 0 : index
    %679 = vector.load %arg4[%c1_321, %c2_322, %c0_323] : memref<4x8x16xf32, #tpu.memory_space<vmem>>, vector<1x1x16xf32>
    %680 = vector.shape_cast %679 : vector<1x1x16xf32> to vector<1x16xf32>
    %c1_324 = arith.constant 1 : index
    %c3_325 = arith.constant 3 : index
    %c0_326 = arith.constant 0 : index
    %681 = vector.load %arg4[%c1_324, %c3_325, %c0_326] : memref<4x8x16xf32, #tpu.memory_space<vmem>>, vector<1x1x16xf32>
    %682 = vector.shape_cast %681 : vector<1x1x16xf32> to vector<1x16xf32>
    %c1_327 = arith.constant 1 : index
    %c4_328 = arith.constant 4 : index
    %c0_329 = arith.constant 0 : index
    %683 = vector.load %arg4[%c1_327, %c4_328, %c0_329] : memref<4x8x16xf32, #tpu.memory_space<vmem>>, vector<1x1x16xf32>
    %684 = vector.shape_cast %683 : vector<1x1x16xf32> to vector<1x16xf32>
    %c1_330 = arith.constant 1 : index
    %c5_331 = arith.constant 5 : index
    %c0_332 = arith.constant 0 : index
    %685 = vector.load %arg4[%c1_330, %c5_331, %c0_332] : memref<4x8x16xf32, #tpu.memory_space<vmem>>, vector<1x1x16xf32>
    %686 = vector.shape_cast %685 : vector<1x1x16xf32> to vector<1x16xf32>
    %c1_333 = arith.constant 1 : index
    %c6_334 = arith.constant 6 : index
    %c0_335 = arith.constant 0 : index
    %687 = vector.load %arg4[%c1_333, %c6_334, %c0_335] : memref<4x8x16xf32, #tpu.memory_space<vmem>>, vector<1x1x8xf32>
    %688 = vector.shape_cast %687 : vector<1x1x8xf32> to vector<1x8xf32>
    %c2_336 = arith.constant 2 : index
    %689 = memref.load %arg1[%c2_336] : memref<9xf32, #tpu.memory_space<smem>>
    %c3_337 = arith.constant 3 : index
    %690 = memref.load %arg1[%c3_337] : memref<9xf32, #tpu.memory_space<smem>>
    %cst_338 = arith.constant dense<0.000000e+00> : vector<8x16xf32>
    %691 = tpu.matmul %668, %670, %cst_338 {dimension_numbers = #tpu.dot_dimension_numbers<[1], [0], [0], [1], [0, 0, 1, 1], [], []>} : vector<8x8xf32>, vector<8x16xf32>, vector<8x16xf32> -> vector<8x16xf32>
    %692 = vector.broadcast %676 : vector<1x16xf32> to vector<8x16xf32>
    %693 = arith.addf %691, %692 : vector<8x16xf32>
    %cst_339 = arith.constant 0.000000e+00 : f32
    %694 = vector.broadcast %cst_339 : f32 to vector<8x16xf32>
    %695 = arith.cmpf oge, %693, %694 : vector<8x16xf32>
    %696 = vector.broadcast %689 : f32 to vector<8x16xf32>
    %697 = arith.mulf %696, %693 : vector<8x16xf32>
    %698 = arith.select %695, %693, %697 : vector<8x16xi1>, vector<8x16xf32>
    %699 = vector.shape_cast %698 : vector<8x16xf32> to vector<1x8x16xf32>
    %cst_340 = arith.constant dense<0.000000e+00> : vector<1xf32>
    %700 = vector.multi_reduction <add>, %699, %cst_340 [1, 2] : vector<1x8x16xf32> to vector<1xf32>
    %701 = vector.shape_cast %700 : vector<1xf32> to vector<1x1x1xf32>
    %702 = vector.extract %701[0, 0, 0] : f32 from vector<1x1x1xf32>
    %cst_341 = arith.constant 1.280000e+02 : f32
    %703 = arith.divf %702, %cst_341 : f32
    %704 = arith.mulf %698, %698 : vector<8x16xf32>
    %705 = vector.shape_cast %704 : vector<8x16xf32> to vector<1x8x16xf32>
    %cst_342 = arith.constant dense<0.000000e+00> : vector<1xf32>
    %706 = vector.multi_reduction <add>, %705, %cst_342 [1, 2] : vector<1x8x16xf32> to vector<1xf32>
    %707 = vector.shape_cast %706 : vector<1xf32> to vector<1x1x1xf32>
    %708 = vector.extract %707[0, 0, 0] : f32 from vector<1x1x1xf32>
    %cst_343 = arith.constant 1.280000e+02 : f32
    %709 = arith.divf %708, %cst_343 : f32
    %710 = arith.mulf %703, %703 : f32
    %711 = arith.subf %709, %710 : f32
    %cst_344 = arith.constant 0.000000e+00 : f32
    %712 = arith.maximumf %711, %cst_344 : f32
    %cst_345 = arith.constant 9.99999974E-6 : f32
    %713 = arith.addf %712, %cst_345 : f32
    %714 = math.rsqrt %713 : f32
    %715 = vector.broadcast %703 : f32 to vector<8x16xf32>
    %716 = arith.subf %698, %715 : vector<8x16xf32>
    %717 = vector.broadcast %714 : f32 to vector<1x16xf32>
    %718 = arith.mulf %678, %717 : vector<1x16xf32>
    %719 = vector.broadcast %718 : vector<1x16xf32> to vector<8x16xf32>
    %720 = arith.mulf %716, %719 : vector<8x16xf32>
    %721 = vector.broadcast %680 : vector<1x16xf32> to vector<8x16xf32>
    %722 = arith.addf %720, %721 : vector<8x16xf32>
    %cst_346 = arith.constant 0.000000e+00 : f32
    %723 = vector.broadcast %cst_346 : f32 to vector<8x16xf32>
    %c2_i32_347 = arith.constant 2 : i32
    %724 = tpu.dynamic_rotate %722 by %c2_i32_347 dim 0 : vector<8x16xf32>, i32 -> vector<8x16xf32>
    %cst_348 = arith.constant 0.000000e+00 : f32
    %725 = vector.broadcast %cst_348 : f32 to vector<8x16xf32>
    %726 = arith.select %239, %724, %725 : vector<8x16xi1>, vector<8x16xf32>
    %727 = vector.extract_strided_slice %672 {offsets = [0, 0], sizes = [1, 16], strides = [1, 1]} : vector<3x16xf32> to vector<1x16xf32>
    %728 = vector.broadcast %727 : vector<1x16xf32> to vector<8x16xf32>
    %729 = arith.mulf %726, %728 : vector<8x16xf32>
    %730 = arith.addf %723, %729 : vector<8x16xf32>
    %731 = vector.extract_strided_slice %672 {offsets = [1, 0], sizes = [1, 16], strides = [1, 1]} : vector<3x16xf32> to vector<1x16xf32>
    %732 = vector.broadcast %731 : vector<1x16xf32> to vector<8x16xf32>
    %733 = arith.mulf %722, %732 : vector<8x16xf32>
    %734 = arith.addf %730, %733 : vector<8x16xf32>
    %c6_i32_349 = arith.constant 6 : i32
    %735 = tpu.dynamic_rotate %722 by %c6_i32_349 dim 0 : vector<8x16xf32>, i32 -> vector<8x16xf32>
    %cst_350 = arith.constant 0.000000e+00 : f32
    %736 = vector.broadcast %cst_350 : f32 to vector<8x16xf32>
    %737 = arith.select %259, %735, %736 : vector<8x16xi1>, vector<8x16xf32>
    %738 = vector.extract_strided_slice %672 {offsets = [2, 0], sizes = [1, 16], strides = [1, 1]} : vector<3x16xf32> to vector<1x16xf32>
    %739 = vector.broadcast %738 : vector<1x16xf32> to vector<8x16xf32>
    %740 = arith.mulf %737, %739 : vector<8x16xf32>
    %741 = arith.addf %734, %740 : vector<8x16xf32>
    %742 = vector.broadcast %682 : vector<1x16xf32> to vector<8x16xf32>
    %743 = arith.addf %741, %742 : vector<8x16xf32>
    %cst_351 = arith.constant 0.000000e+00 : f32
    %744 = vector.broadcast %cst_351 : f32 to vector<8x16xf32>
    %745 = arith.cmpf oge, %743, %744 : vector<8x16xf32>
    %746 = vector.broadcast %690 : f32 to vector<8x16xf32>
    %747 = arith.mulf %746, %743 : vector<8x16xf32>
    %748 = arith.select %745, %743, %747 : vector<8x16xi1>, vector<8x16xf32>
    %749 = vector.shape_cast %748 : vector<8x16xf32> to vector<1x8x16xf32>
    %cst_352 = arith.constant dense<0.000000e+00> : vector<1xf32>
    %750 = vector.multi_reduction <add>, %749, %cst_352 [1, 2] : vector<1x8x16xf32> to vector<1xf32>
    %751 = vector.shape_cast %750 : vector<1xf32> to vector<1x1x1xf32>
    %752 = vector.extract %751[0, 0, 0] : f32 from vector<1x1x1xf32>
    %cst_353 = arith.constant 1.280000e+02 : f32
    %753 = arith.divf %752, %cst_353 : f32
    %754 = arith.mulf %748, %748 : vector<8x16xf32>
    %755 = vector.shape_cast %754 : vector<8x16xf32> to vector<1x8x16xf32>
    %cst_354 = arith.constant dense<0.000000e+00> : vector<1xf32>
    %756 = vector.multi_reduction <add>, %755, %cst_354 [1, 2] : vector<1x8x16xf32> to vector<1xf32>
    %757 = vector.shape_cast %756 : vector<1xf32> to vector<1x1x1xf32>
    %758 = vector.extract %757[0, 0, 0] : f32 from vector<1x1x1xf32>
    %cst_355 = arith.constant 1.280000e+02 : f32
    %759 = arith.divf %758, %cst_355 : f32
    %760 = arith.mulf %753, %753 : f32
    %761 = arith.subf %759, %760 : f32
    %cst_356 = arith.constant 0.000000e+00 : f32
    %762 = arith.maximumf %761, %cst_356 : f32
    %cst_357 = arith.constant 9.99999974E-6 : f32
    %763 = arith.addf %762, %cst_357 : f32
    %764 = math.rsqrt %763 : f32
    %765 = vector.broadcast %753 : f32 to vector<8x16xf32>
    %766 = arith.subf %748, %765 : vector<8x16xf32>
    %767 = vector.broadcast %764 : f32 to vector<1x16xf32>
    %768 = arith.mulf %684, %767 : vector<1x16xf32>
    %769 = vector.broadcast %768 : vector<1x16xf32> to vector<8x16xf32>
    %770 = arith.mulf %766, %769 : vector<8x16xf32>
    %771 = vector.broadcast %686 : vector<1x16xf32> to vector<8x16xf32>
    %772 = arith.addf %770, %771 : vector<8x16xf32>
    %cst_358 = arith.constant dense<0.000000e+00> : vector<8x8xf32>
    %773 = tpu.matmul %772, %674, %cst_358 {dimension_numbers = #tpu.dot_dimension_numbers<[1], [0], [0], [1], [0, 0, 1, 1], [], []>} : vector<8x16xf32>, vector<16x8xf32>, vector<8x8xf32> -> vector<8x8xf32>
    %774 = arith.addf %668, %773 : vector<8x8xf32>
    %775 = vector.broadcast %688 : vector<1x8xf32> to vector<8x8xf32>
    %776 = arith.addf %774, %775 : vector<8x8xf32>
    %c2_359 = arith.constant 2 : index
    %c0_360 = arith.constant 0 : index
    %c0_361 = arith.constant 0 : index
    %777 = vector.load %arg3[%c2_359, %c0_360, %c0_361] : memref<4x32x16xf32, #tpu.memory_space<vmem>>, vector<1x8x16xf32>
    %778 = vector.shape_cast %777 : vector<1x8x16xf32> to vector<8x16xf32>
    %c2_362 = arith.constant 2 : index
    %c8_363 = arith.constant 8 : index
    %c0_364 = arith.constant 0 : index
    %779 = vector.load %arg3[%c2_362, %c8_363, %c0_364] : memref<4x32x16xf32, #tpu.memory_space<vmem>>, vector<1x3x16xf32>
    %780 = vector.shape_cast %779 : vector<1x3x16xf32> to vector<3x16xf32>
    %c2_365 = arith.constant 2 : index
    %c16_366 = arith.constant 16 : index
    %c0_367 = arith.constant 0 : index
    %781 = vector.load %arg3[%c2_365, %c16_366, %c0_367] : memref<4x32x16xf32, #tpu.memory_space<vmem>>, vector<1x16x8xf32>
    %782 = vector.shape_cast %781 : vector<1x16x8xf32> to vector<16x8xf32>
    %c2_368 = arith.constant 2 : index
    %c0_369 = arith.constant 0 : index
    %c0_370 = arith.constant 0 : index
    %783 = vector.load %arg4[%c2_368, %c0_369, %c0_370] : memref<4x8x16xf32, #tpu.memory_space<vmem>>, vector<1x1x16xf32>
    %784 = vector.shape_cast %783 : vector<1x1x16xf32> to vector<1x16xf32>
    %c2_371 = arith.constant 2 : index
    %c1_372 = arith.constant 1 : index
    %c0_373 = arith.constant 0 : index
    %785 = vector.load %arg4[%c2_371, %c1_372, %c0_373] : memref<4x8x16xf32, #tpu.memory_space<vmem>>, vector<1x1x16xf32>
    %786 = vector.shape_cast %785 : vector<1x1x16xf32> to vector<1x16xf32>
    %c2_374 = arith.constant 2 : index
    %c2_375 = arith.constant 2 : index
    %c0_376 = arith.constant 0 : index
    %787 = vector.load %arg4[%c2_374, %c2_375, %c0_376] : memref<4x8x16xf32, #tpu.memory_space<vmem>>, vector<1x1x16xf32>
    %788 = vector.shape_cast %787 : vector<1x1x16xf32> to vector<1x16xf32>
    %c2_377 = arith.constant 2 : index
    %c3_378 = arith.constant 3 : index
    %c0_379 = arith.constant 0 : index
    %789 = vector.load %arg4[%c2_377, %c3_378, %c0_379] : memref<4x8x16xf32, #tpu.memory_space<vmem>>, vector<1x1x16xf32>
    %790 = vector.shape_cast %789 : vector<1x1x16xf32> to vector<1x16xf32>
    %c2_380 = arith.constant 2 : index
    %c4_381 = arith.constant 4 : index
    %c0_382 = arith.constant 0 : index
    %791 = vector.load %arg4[%c2_380, %c4_381, %c0_382] : memref<4x8x16xf32, #tpu.memory_space<vmem>>, vector<1x1x16xf32>
    %792 = vector.shape_cast %791 : vector<1x1x16xf32> to vector<1x16xf32>
    %c2_383 = arith.constant 2 : index
    %c5_384 = arith.constant 5 : index
    %c0_385 = arith.constant 0 : index
    %793 = vector.load %arg4[%c2_383, %c5_384, %c0_385] : memref<4x8x16xf32, #tpu.memory_space<vmem>>, vector<1x1x16xf32>
    %794 = vector.shape_cast %793 : vector<1x1x16xf32> to vector<1x16xf32>
    %c2_386 = arith.constant 2 : index
    %c6_387 = arith.constant 6 : index
    %c0_388 = arith.constant 0 : index
    %795 = vector.load %arg4[%c2_386, %c6_387, %c0_388] : memref<4x8x16xf32, #tpu.memory_space<vmem>>, vector<1x1x8xf32>
    %796 = vector.shape_cast %795 : vector<1x1x8xf32> to vector<1x8xf32>
    %c4_389 = arith.constant 4 : index
    %797 = memref.load %arg1[%c4_389] : memref<9xf32, #tpu.memory_space<smem>>
    %c5_390 = arith.constant 5 : index
    %798 = memref.load %arg1[%c5_390] : memref<9xf32, #tpu.memory_space<smem>>
    %cst_391 = arith.constant dense<0.000000e+00> : vector<8x16xf32>
    %799 = tpu.matmul %776, %778, %cst_391 {dimension_numbers = #tpu.dot_dimension_numbers<[1], [0], [0], [1], [0, 0, 1, 1], [], []>} : vector<8x8xf32>, vector<8x16xf32>, vector<8x16xf32> -> vector<8x16xf32>
    %800 = vector.broadcast %784 : vector<1x16xf32> to vector<8x16xf32>
    %801 = arith.addf %799, %800 : vector<8x16xf32>
    %cst_392 = arith.constant 0.000000e+00 : f32
    %802 = vector.broadcast %cst_392 : f32 to vector<8x16xf32>
    %803 = arith.cmpf oge, %801, %802 : vector<8x16xf32>
    %804 = vector.broadcast %797 : f32 to vector<8x16xf32>
    %805 = arith.mulf %804, %801 : vector<8x16xf32>
    %806 = arith.select %803, %801, %805 : vector<8x16xi1>, vector<8x16xf32>
    %807 = vector.shape_cast %806 : vector<8x16xf32> to vector<1x8x16xf32>
    %cst_393 = arith.constant dense<0.000000e+00> : vector<1xf32>
    %808 = vector.multi_reduction <add>, %807, %cst_393 [1, 2] : vector<1x8x16xf32> to vector<1xf32>
    %809 = vector.shape_cast %808 : vector<1xf32> to vector<1x1x1xf32>
    %810 = vector.extract %809[0, 0, 0] : f32 from vector<1x1x1xf32>
    %cst_394 = arith.constant 1.280000e+02 : f32
    %811 = arith.divf %810, %cst_394 : f32
    %812 = arith.mulf %806, %806 : vector<8x16xf32>
    %813 = vector.shape_cast %812 : vector<8x16xf32> to vector<1x8x16xf32>
    %cst_395 = arith.constant dense<0.000000e+00> : vector<1xf32>
    %814 = vector.multi_reduction <add>, %813, %cst_395 [1, 2] : vector<1x8x16xf32> to vector<1xf32>
    %815 = vector.shape_cast %814 : vector<1xf32> to vector<1x1x1xf32>
    %816 = vector.extract %815[0, 0, 0] : f32 from vector<1x1x1xf32>
    %cst_396 = arith.constant 1.280000e+02 : f32
    %817 = arith.divf %816, %cst_396 : f32
    %818 = arith.mulf %811, %811 : f32
    %819 = arith.subf %817, %818 : f32
    %cst_397 = arith.constant 0.000000e+00 : f32
    %820 = arith.maximumf %819, %cst_397 : f32
    %cst_398 = arith.constant 9.99999974E-6 : f32
    %821 = arith.addf %820, %cst_398 : f32
    %822 = math.rsqrt %821 : f32
    %823 = vector.broadcast %811 : f32 to vector<8x16xf32>
    %824 = arith.subf %806, %823 : vector<8x16xf32>
    %825 = vector.broadcast %822 : f32 to vector<1x16xf32>
    %826 = arith.mulf %786, %825 : vector<1x16xf32>
    %827 = vector.broadcast %826 : vector<1x16xf32> to vector<8x16xf32>
    %828 = arith.mulf %824, %827 : vector<8x16xf32>
    %829 = vector.broadcast %788 : vector<1x16xf32> to vector<8x16xf32>
    %830 = arith.addf %828, %829 : vector<8x16xf32>
    %cst_399 = arith.constant 0.000000e+00 : f32
    %831 = vector.broadcast %cst_399 : f32 to vector<8x16xf32>
    %c1_i32_400 = arith.constant 1 : i32
    %832 = tpu.dynamic_rotate %830 by %c1_i32_400 dim 0 : vector<8x16xf32>, i32 -> vector<8x16xf32>
    %cst_401 = arith.constant 0.000000e+00 : f32
    %833 = vector.broadcast %cst_401 : f32 to vector<8x16xf32>
    %834 = arith.select %113, %832, %833 : vector<8x16xi1>, vector<8x16xf32>
    %835 = vector.extract_strided_slice %780 {offsets = [0, 0], sizes = [1, 16], strides = [1, 1]} : vector<3x16xf32> to vector<1x16xf32>
    %836 = vector.broadcast %835 : vector<1x16xf32> to vector<8x16xf32>
    %837 = arith.mulf %834, %836 : vector<8x16xf32>
    %838 = arith.addf %831, %837 : vector<8x16xf32>
    %839 = vector.extract_strided_slice %780 {offsets = [1, 0], sizes = [1, 16], strides = [1, 1]} : vector<3x16xf32> to vector<1x16xf32>
    %840 = vector.broadcast %839 : vector<1x16xf32> to vector<8x16xf32>
    %841 = arith.mulf %830, %840 : vector<8x16xf32>
    %842 = arith.addf %838, %841 : vector<8x16xf32>
    %c7_i32_402 = arith.constant 7 : i32
    %843 = tpu.dynamic_rotate %830 by %c7_i32_402 dim 0 : vector<8x16xf32>, i32 -> vector<8x16xf32>
    %cst_403 = arith.constant 0.000000e+00 : f32
    %844 = vector.broadcast %cst_403 : f32 to vector<8x16xf32>
    %845 = arith.select %133, %843, %844 : vector<8x16xi1>, vector<8x16xf32>
    %846 = vector.extract_strided_slice %780 {offsets = [2, 0], sizes = [1, 16], strides = [1, 1]} : vector<3x16xf32> to vector<1x16xf32>
    %847 = vector.broadcast %846 : vector<1x16xf32> to vector<8x16xf32>
    %848 = arith.mulf %845, %847 : vector<8x16xf32>
    %849 = arith.addf %842, %848 : vector<8x16xf32>
    %850 = vector.broadcast %790 : vector<1x16xf32> to vector<8x16xf32>
    %851 = arith.addf %849, %850 : vector<8x16xf32>
    %cst_404 = arith.constant 0.000000e+00 : f32
    %852 = vector.broadcast %cst_404 : f32 to vector<8x16xf32>
    %853 = arith.cmpf oge, %851, %852 : vector<8x16xf32>
    %854 = vector.broadcast %798 : f32 to vector<8x16xf32>
    %855 = arith.mulf %854, %851 : vector<8x16xf32>
    %856 = arith.select %853, %851, %855 : vector<8x16xi1>, vector<8x16xf32>
    %857 = vector.shape_cast %856 : vector<8x16xf32> to vector<1x8x16xf32>
    %cst_405 = arith.constant dense<0.000000e+00> : vector<1xf32>
    %858 = vector.multi_reduction <add>, %857, %cst_405 [1, 2] : vector<1x8x16xf32> to vector<1xf32>
    %859 = vector.shape_cast %858 : vector<1xf32> to vector<1x1x1xf32>
    %860 = vector.extract %859[0, 0, 0] : f32 from vector<1x1x1xf32>
    %cst_406 = arith.constant 1.280000e+02 : f32
    %861 = arith.divf %860, %cst_406 : f32
    %862 = arith.mulf %856, %856 : vector<8x16xf32>
    %863 = vector.shape_cast %862 : vector<8x16xf32> to vector<1x8x16xf32>
    %cst_407 = arith.constant dense<0.000000e+00> : vector<1xf32>
    %864 = vector.multi_reduction <add>, %863, %cst_407 [1, 2] : vector<1x8x16xf32> to vector<1xf32>
    %865 = vector.shape_cast %864 : vector<1xf32> to vector<1x1x1xf32>
    %866 = vector.extract %865[0, 0, 0] : f32 from vector<1x1x1xf32>
    %cst_408 = arith.constant 1.280000e+02 : f32
    %867 = arith.divf %866, %cst_408 : f32
    %868 = arith.mulf %861, %861 : f32
    %869 = arith.subf %867, %868 : f32
    %cst_409 = arith.constant 0.000000e+00 : f32
    %870 = arith.maximumf %869, %cst_409 : f32
    %cst_410 = arith.constant 9.99999974E-6 : f32
    %871 = arith.addf %870, %cst_410 : f32
    %872 = math.rsqrt %871 : f32
    %873 = vector.broadcast %861 : f32 to vector<8x16xf32>
    %874 = arith.subf %856, %873 : vector<8x16xf32>
    %875 = vector.broadcast %872 : f32 to vector<1x16xf32>
    %876 = arith.mulf %792, %875 : vector<1x16xf32>
    %877 = vector.broadcast %876 : vector<1x16xf32> to vector<8x16xf32>
    %878 = arith.mulf %874, %877 : vector<8x16xf32>
    %879 = vector.broadcast %794 : vector<1x16xf32> to vector<8x16xf32>
    %880 = arith.addf %878, %879 : vector<8x16xf32>
    %cst_411 = arith.constant dense<0.000000e+00> : vector<8x8xf32>
    %881 = tpu.matmul %880, %782, %cst_411 {dimension_numbers = #tpu.dot_dimension_numbers<[1], [0], [0], [1], [0, 0, 1, 1], [], []>} : vector<8x16xf32>, vector<16x8xf32>, vector<8x8xf32> -> vector<8x8xf32>
    %882 = arith.addf %776, %881 : vector<8x8xf32>
    %883 = vector.broadcast %796 : vector<1x8xf32> to vector<8x8xf32>
    %884 = arith.addf %882, %883 : vector<8x8xf32>
    %c3_412 = arith.constant 3 : index
    %c0_413 = arith.constant 0 : index
    %c0_414 = arith.constant 0 : index
    %885 = vector.load %arg3[%c3_412, %c0_413, %c0_414] : memref<4x32x16xf32, #tpu.memory_space<vmem>>, vector<1x8x16xf32>
    %886 = vector.shape_cast %885 : vector<1x8x16xf32> to vector<8x16xf32>
    %c3_415 = arith.constant 3 : index
    %c8_416 = arith.constant 8 : index
    %c0_417 = arith.constant 0 : index
    %887 = vector.load %arg3[%c3_415, %c8_416, %c0_417] : memref<4x32x16xf32, #tpu.memory_space<vmem>>, vector<1x3x16xf32>
    %888 = vector.shape_cast %887 : vector<1x3x16xf32> to vector<3x16xf32>
    %c3_418 = arith.constant 3 : index
    %c16_419 = arith.constant 16 : index
    %c0_420 = arith.constant 0 : index
    %889 = vector.load %arg3[%c3_418, %c16_419, %c0_420] : memref<4x32x16xf32, #tpu.memory_space<vmem>>, vector<1x16x8xf32>
    %890 = vector.shape_cast %889 : vector<1x16x8xf32> to vector<16x8xf32>
    %c3_421 = arith.constant 3 : index
    %c0_422 = arith.constant 0 : index
    %c0_423 = arith.constant 0 : index
    %891 = vector.load %arg4[%c3_421, %c0_422, %c0_423] : memref<4x8x16xf32, #tpu.memory_space<vmem>>, vector<1x1x16xf32>
    %892 = vector.shape_cast %891 : vector<1x1x16xf32> to vector<1x16xf32>
    %c3_424 = arith.constant 3 : index
    %c1_425 = arith.constant 1 : index
    %c0_426 = arith.constant 0 : index
    %893 = vector.load %arg4[%c3_424, %c1_425, %c0_426] : memref<4x8x16xf32, #tpu.memory_space<vmem>>, vector<1x1x16xf32>
    %894 = vector.shape_cast %893 : vector<1x1x16xf32> to vector<1x16xf32>
    %c3_427 = arith.constant 3 : index
    %c2_428 = arith.constant 2 : index
    %c0_429 = arith.constant 0 : index
    %895 = vector.load %arg4[%c3_427, %c2_428, %c0_429] : memref<4x8x16xf32, #tpu.memory_space<vmem>>, vector<1x1x16xf32>
    %896 = vector.shape_cast %895 : vector<1x1x16xf32> to vector<1x16xf32>
    %c3_430 = arith.constant 3 : index
    %c3_431 = arith.constant 3 : index
    %c0_432 = arith.constant 0 : index
    %897 = vector.load %arg4[%c3_430, %c3_431, %c0_432] : memref<4x8x16xf32, #tpu.memory_space<vmem>>, vector<1x1x16xf32>
    %898 = vector.shape_cast %897 : vector<1x1x16xf32> to vector<1x16xf32>
    %c3_433 = arith.constant 3 : index
    %c4_434 = arith.constant 4 : index
    %c0_435 = arith.constant 0 : index
    %899 = vector.load %arg4[%c3_433, %c4_434, %c0_435] : memref<4x8x16xf32, #tpu.memory_space<vmem>>, vector<1x1x16xf32>
    %900 = vector.shape_cast %899 : vector<1x1x16xf32> to vector<1x16xf32>
    %c3_436 = arith.constant 3 : index
    %c5_437 = arith.constant 5 : index
    %c0_438 = arith.constant 0 : index
    %901 = vector.load %arg4[%c3_436, %c5_437, %c0_438] : memref<4x8x16xf32, #tpu.memory_space<vmem>>, vector<1x1x16xf32>
    %902 = vector.shape_cast %901 : vector<1x1x16xf32> to vector<1x16xf32>
    %c3_439 = arith.constant 3 : index
    %c6_440 = arith.constant 6 : index
    %c0_441 = arith.constant 0 : index
    %903 = vector.load %arg4[%c3_439, %c6_440, %c0_441] : memref<4x8x16xf32, #tpu.memory_space<vmem>>, vector<1x1x8xf32>
    %904 = vector.shape_cast %903 : vector<1x1x8xf32> to vector<1x8xf32>
    %c6_442 = arith.constant 6 : index
    %905 = memref.load %arg1[%c6_442] : memref<9xf32, #tpu.memory_space<smem>>
    %c7_443 = arith.constant 7 : index
    %906 = memref.load %arg1[%c7_443] : memref<9xf32, #tpu.memory_space<smem>>
    %cst_444 = arith.constant dense<0.000000e+00> : vector<8x16xf32>
    %907 = tpu.matmul %884, %886, %cst_444 {dimension_numbers = #tpu.dot_dimension_numbers<[1], [0], [0], [1], [0, 0, 1, 1], [], []>} : vector<8x8xf32>, vector<8x16xf32>, vector<8x16xf32> -> vector<8x16xf32>
    %908 = vector.broadcast %892 : vector<1x16xf32> to vector<8x16xf32>
    %909 = arith.addf %907, %908 : vector<8x16xf32>
    %cst_445 = arith.constant 0.000000e+00 : f32
    %910 = vector.broadcast %cst_445 : f32 to vector<8x16xf32>
    %911 = arith.cmpf oge, %909, %910 : vector<8x16xf32>
    %912 = vector.broadcast %905 : f32 to vector<8x16xf32>
    %913 = arith.mulf %912, %909 : vector<8x16xf32>
    %914 = arith.select %911, %909, %913 : vector<8x16xi1>, vector<8x16xf32>
    %915 = vector.shape_cast %914 : vector<8x16xf32> to vector<1x8x16xf32>
    %cst_446 = arith.constant dense<0.000000e+00> : vector<1xf32>
    %916 = vector.multi_reduction <add>, %915, %cst_446 [1, 2] : vector<1x8x16xf32> to vector<1xf32>
    %917 = vector.shape_cast %916 : vector<1xf32> to vector<1x1x1xf32>
    %918 = vector.extract %917[0, 0, 0] : f32 from vector<1x1x1xf32>
    %cst_447 = arith.constant 1.280000e+02 : f32
    %919 = arith.divf %918, %cst_447 : f32
    %920 = arith.mulf %914, %914 : vector<8x16xf32>
    %921 = vector.shape_cast %920 : vector<8x16xf32> to vector<1x8x16xf32>
    %cst_448 = arith.constant dense<0.000000e+00> : vector<1xf32>
    %922 = vector.multi_reduction <add>, %921, %cst_448 [1, 2] : vector<1x8x16xf32> to vector<1xf32>
    %923 = vector.shape_cast %922 : vector<1xf32> to vector<1x1x1xf32>
    %924 = vector.extract %923[0, 0, 0] : f32 from vector<1x1x1xf32>
    %cst_449 = arith.constant 1.280000e+02 : f32
    %925 = arith.divf %924, %cst_449 : f32
    %926 = arith.mulf %919, %919 : f32
    %927 = arith.subf %925, %926 : f32
    %cst_450 = arith.constant 0.000000e+00 : f32
    %928 = arith.maximumf %927, %cst_450 : f32
    %cst_451 = arith.constant 9.99999974E-6 : f32
    %929 = arith.addf %928, %cst_451 : f32
    %930 = math.rsqrt %929 : f32
    %931 = vector.broadcast %919 : f32 to vector<8x16xf32>
    %932 = arith.subf %914, %931 : vector<8x16xf32>
    %933 = vector.broadcast %930 : f32 to vector<1x16xf32>
    %934 = arith.mulf %894, %933 : vector<1x16xf32>
    %935 = vector.broadcast %934 : vector<1x16xf32> to vector<8x16xf32>
    %936 = arith.mulf %932, %935 : vector<8x16xf32>
    %937 = vector.broadcast %896 : vector<1x16xf32> to vector<8x16xf32>
    %938 = arith.addf %936, %937 : vector<8x16xf32>
    %cst_452 = arith.constant 0.000000e+00 : f32
    %939 = vector.broadcast %cst_452 : f32 to vector<8x16xf32>
    %c2_i32_453 = arith.constant 2 : i32
    %940 = tpu.dynamic_rotate %938 by %c2_i32_453 dim 0 : vector<8x16xf32>, i32 -> vector<8x16xf32>
    %cst_454 = arith.constant 0.000000e+00 : f32
    %941 = vector.broadcast %cst_454 : f32 to vector<8x16xf32>
    %942 = arith.select %239, %940, %941 : vector<8x16xi1>, vector<8x16xf32>
    %943 = vector.extract_strided_slice %888 {offsets = [0, 0], sizes = [1, 16], strides = [1, 1]} : vector<3x16xf32> to vector<1x16xf32>
    %944 = vector.broadcast %943 : vector<1x16xf32> to vector<8x16xf32>
    %945 = arith.mulf %942, %944 : vector<8x16xf32>
    %946 = arith.addf %939, %945 : vector<8x16xf32>
    %947 = vector.extract_strided_slice %888 {offsets = [1, 0], sizes = [1, 16], strides = [1, 1]} : vector<3x16xf32> to vector<1x16xf32>
    %948 = vector.broadcast %947 : vector<1x16xf32> to vector<8x16xf32>
    %949 = arith.mulf %938, %948 : vector<8x16xf32>
    %950 = arith.addf %946, %949 : vector<8x16xf32>
    %c6_i32_455 = arith.constant 6 : i32
    %951 = tpu.dynamic_rotate %938 by %c6_i32_455 dim 0 : vector<8x16xf32>, i32 -> vector<8x16xf32>
    %cst_456 = arith.constant 0.000000e+00 : f32
    %952 = vector.broadcast %cst_456 : f32 to vector<8x16xf32>
    %953 = arith.select %259, %951, %952 : vector<8x16xi1>, vector<8x16xf32>
    %954 = vector.extract_strided_slice %888 {offsets = [2, 0], sizes = [1, 16], strides = [1, 1]} : vector<3x16xf32> to vector<1x16xf32>
    %955 = vector.broadcast %954 : vector<1x16xf32> to vector<8x16xf32>
    %956 = arith.mulf %953, %955 : vector<8x16xf32>
    %957 = arith.addf %950, %956 : vector<8x16xf32>
    %958 = vector.broadcast %898 : vector<1x16xf32> to vector<8x16xf32>
    %959 = arith.addf %957, %958 : vector<8x16xf32>
    %cst_457 = arith.constant 0.000000e+00 : f32
    %960 = vector.broadcast %cst_457 : f32 to vector<8x16xf32>
    %961 = arith.cmpf oge, %959, %960 : vector<8x16xf32>
    %962 = vector.broadcast %906 : f32 to vector<8x16xf32>
    %963 = arith.mulf %962, %959 : vector<8x16xf32>
    %964 = arith.select %961, %959, %963 : vector<8x16xi1>, vector<8x16xf32>
    %965 = vector.shape_cast %964 : vector<8x16xf32> to vector<1x8x16xf32>
    %cst_458 = arith.constant dense<0.000000e+00> : vector<1xf32>
    %966 = vector.multi_reduction <add>, %965, %cst_458 [1, 2] : vector<1x8x16xf32> to vector<1xf32>
    %967 = vector.shape_cast %966 : vector<1xf32> to vector<1x1x1xf32>
    %968 = vector.extract %967[0, 0, 0] : f32 from vector<1x1x1xf32>
    %cst_459 = arith.constant 1.280000e+02 : f32
    %969 = arith.divf %968, %cst_459 : f32
    %970 = arith.mulf %964, %964 : vector<8x16xf32>
    %971 = vector.shape_cast %970 : vector<8x16xf32> to vector<1x8x16xf32>
    %cst_460 = arith.constant dense<0.000000e+00> : vector<1xf32>
    %972 = vector.multi_reduction <add>, %971, %cst_460 [1, 2] : vector<1x8x16xf32> to vector<1xf32>
    %973 = vector.shape_cast %972 : vector<1xf32> to vector<1x1x1xf32>
    %974 = vector.extract %973[0, 0, 0] : f32 from vector<1x1x1xf32>
    %cst_461 = arith.constant 1.280000e+02 : f32
    %975 = arith.divf %974, %cst_461 : f32
    %976 = arith.mulf %969, %969 : f32
    %977 = arith.subf %975, %976 : f32
    %cst_462 = arith.constant 0.000000e+00 : f32
    %978 = arith.maximumf %977, %cst_462 : f32
    %cst_463 = arith.constant 9.99999974E-6 : f32
    %979 = arith.addf %978, %cst_463 : f32
    %980 = math.rsqrt %979 : f32
    %981 = vector.broadcast %969 : f32 to vector<8x16xf32>
    %982 = arith.subf %964, %981 : vector<8x16xf32>
    %983 = vector.broadcast %980 : f32 to vector<1x16xf32>
    %984 = arith.mulf %900, %983 : vector<1x16xf32>
    %985 = vector.broadcast %984 : vector<1x16xf32> to vector<8x16xf32>
    %986 = arith.mulf %982, %985 : vector<8x16xf32>
    %987 = vector.broadcast %902 : vector<1x16xf32> to vector<8x16xf32>
    %988 = arith.addf %986, %987 : vector<8x16xf32>
    %cst_464 = arith.constant dense<0.000000e+00> : vector<8x8xf32>
    %989 = tpu.matmul %988, %890, %cst_464 {dimension_numbers = #tpu.dot_dimension_numbers<[1], [0], [0], [1], [0, 0, 1, 1], [], []>} : vector<8x16xf32>, vector<16x8xf32>, vector<8x8xf32> -> vector<8x8xf32>
    %990 = arith.addf %884, %989 : vector<8x8xf32>
    %991 = vector.broadcast %904 : vector<1x8xf32> to vector<8x8xf32>
    %992 = arith.addf %990, %991 : vector<8x8xf32>
    %cst_465 = arith.constant dense<0.000000e+00> : vector<8x16xf32>
    %993 = tpu.matmul %992, %4, %cst_465 {dimension_numbers = #tpu.dot_dimension_numbers<[1], [0], [0], [1], [0, 0, 1, 1], [], []>} : vector<8x8xf32>, vector<8x16xf32>, vector<8x16xf32> -> vector<8x16xf32>
    %994 = vector.broadcast %9 : vector<1x16xf32> to vector<8x16xf32>
    %995 = arith.addf %993, %994 : vector<8x16xf32>
    %996 = arith.mulf %533, %995 : vector<8x16xf32>
    %cst_466 = arith.constant dense<0.000000e+00> : vector<8x128xf32>
    %997 = tpu.matmul %996, %1, %cst_466 {dimension_numbers = #tpu.dot_dimension_numbers<[1], [0], [0], [1], [0, 0, 1, 1], [], []>} : vector<8x16xf32>, vector<16x128xf32>, vector<8x128xf32> -> vector<8x128xf32>
    %c0_i32_467 = arith.constant 0 : i32
    %998 = tpu.dynamic_rotate %997 by %c0_i32_467 dim 1 {stride = 4 : si32, stride_dimension = 0 : si32} : vector<8x128xf32>, i32 -> vector<8x128xf32>
    %cst_468 = arith.constant dense<0.000000e+00> : vector<128xf32>
    %999 = vector.multi_reduction <add>, %998, %cst_468 [0] : vector<8x128xf32> to vector<128xf32>
    %1000 = vector.shape_cast %999 : vector<128xf32> to vector<1x128xf32>
    %1001 = vector.broadcast %10 : f32 to vector<1x128xf32>
    %1002 = arith.addf %1000, %1001 : vector<1x128xf32>
    %1003 = tpu.concatenate %526, %1002 in 0 : vector<1x128xf32>, vector<1x128xf32> -> vector<2x128xf32>
    %c0_469 = arith.constant 0 : index
    %c0_470 = arith.constant 0 : index
    %c0_471 = arith.constant 0 : index
    %1004 = vector.load %arg8[%c0_469, %c0_470, %c0_471] : memref<1x2x128xf32, #tpu.memory_space<vmem>>, vector<1x2x128xf32>
    %1005 = vector.shape_cast %1004 : vector<1x2x128xf32> to vector<2x128xf32>
    %1006 = vector.shape_cast %1003 : vector<2x128xf32> to vector<1x2x128xf32>
    tpu.vector_store %arg8[%c0_469, %c0_470, %c0_471], %1006 {strides = array<i32>} : memref<1x2x128xf32, #tpu.memory_space<vmem>>, vector<1x2x128xf32>,
    return
  }
  func.func @transform_0(%arg0: i32, %arg1: memref<9xf32, #tpu.memory_space<smem>>) -> (i32, i32, i32) {
    %c0_i32 = arith.constant 0 : i32
    %c0_i32_0 = arith.constant 0 : i32
    %c0_i32_1 = arith.constant 0 : i32
    return %arg0, %c0_i32, %c0_i32_0 : i32, i32, i32
  }
  func.func @transform_1(%arg0: i32, %arg1: memref<9xf32, #tpu.memory_space<smem>>) -> (i32, i32, i32) {
    %c0_i32 = arith.constant 0 : i32
    %c0_i32_0 = arith.constant 0 : i32
    %c0_i32_1 = arith.constant 0 : i32
    %c0_i32_2 = arith.constant 0 : i32
    return %c0_i32, %c0_i32_0, %c0_i32_1 : i32, i32, i32
  }
  func.func @transform_2(%arg0: i32, %arg1: memref<9xf32, #tpu.memory_space<smem>>) -> (i32, i32, i32) {
    %c0_i32 = arith.constant 0 : i32
    %c0_i32_0 = arith.constant 0 : i32
    %c0_i32_1 = arith.constant 0 : i32
    %c0_i32_2 = arith.constant 0 : i32
    return %c0_i32, %c0_i32_0, %c0_i32_1 : i32, i32, i32
  }
  func.func @transform_3(%arg0: i32, %arg1: memref<9xf32, #tpu.memory_space<smem>>) -> (i32, i32) {
    %c0_i32 = arith.constant 0 : i32
    %c0_i32_0 = arith.constant 0 : i32
    %c0_i32_1 = arith.constant 0 : i32
    return %c0_i32, %c0_i32_0 : i32, i32
  }
  func.func @transform_4(%arg0: i32, %arg1: memref<9xf32, #tpu.memory_space<smem>>) -> (i32, i32) {
    %c0_i32 = arith.constant 0 : i32
    %c0_i32_0 = arith.constant 0 : i32
    %c0_i32_1 = arith.constant 0 : i32
    return %c0_i32, %c0_i32_0 : i32, i32
  }
  func.func @transform_5(%arg0: i32, %arg1: memref<9xf32, #tpu.memory_space<smem>>) -> (i32, i32) {
    %c0_i32 = arith.constant 0 : i32
    %c0_i32_0 = arith.constant 0 : i32
    %c0_i32_1 = arith.constant 0 : i32
    return %c0_i32, %c0_i32_0 : i32, i32
  }
  func.func @transform_6(%arg0: i32, %arg1: memref<9xf32, #tpu.memory_space<smem>>) -> (i32, i32, i32) {
    %c0_i32 = arith.constant 0 : i32
    %c0_i32_0 = arith.constant 0 : i32
    %c0_i32_1 = arith.constant 0 : i32
    return %arg0, %c0_i32, %c0_i32_0 : i32, i32, i32
  }
}

</mosaic_0001>

<bundles_post_ra>
// kernel: convtasnet_forward.1
= control target key start
LH: loop header
LB: loop body
LE: loop exit
PB: predicated region body
PF: predicated region fallthrough
CT: control target
= control target key end

     0   :  { %s4753_s0 = inlined_call_operand.vmem [shape: f32[9], index: 0, kind: input, shape index: {}]   ;;  %s4754_s1 = inlined_call_operand.vmem [shape: f32[1,2,90], index: 1, kind: input, shape index: {}]   ;;  %s4755_s2 = inlined_call_operand.vmem [shape: f32[4,32,16], index: 2, kind: input, shape index: {}]   ;;  %s4756_s3 = inlined_call_operand.vmem [shape: f32[4,8,16], index: 3, kind: input, shape index: {}]   ;;  %s4757_s4 = inlined_call_operand.vmem [shape: f32[152,16], index: 4, kind: input, shape index: {}]   ;;  %s4758_s5 = inlined_call_operand.vmem [shape: f32[112,128], index: 5, kind: input, shape index: {}]   ;;  %s4759_s6 = inlined_call_operand.vmem [shape: f32[8,16], index: 6, kind: input, shape index: {}]   ;;  %s4760_s7 = inlined_call_operand.hbm [shape: f32[1,2,128], index: 7, kind: output, shape index: {}]  }
   0x1   :  { %s12_s26 = sshll.u32 %s4753_s0, 4  ;;  %s13_s26 = int_to_ptr.vmem [resolvable:$true] %s12_s26 }
   0x2   :  { %s3759_s27 = scalar_lea.vmem %s13_s26, 16  ;;  %p3764_p1 = scmp.lt.s32.totalorder %s13_s26, %s13_s26 }
   0x3   :  { %p3760_p0 = scmp.ne.s32.totalorder %s13_s26, %s3759_s27  ;;  %p3765_p2 = scmp.lt.s32.totalorder %s3759_s27, %s3759_s27 }
   0x5   :  { %p3766_p3 = por %p3765_p2, %p3764_p1 }
   0x7   :  { %p3767_p4 = pnand %p3766_p3, %p3760_p0 }
   0x9   :  { %3770 = shalt.err (!%p3767_p4)  }
   0xa   :  { %s3795_s28 = smov [#allocation3]  }
   0xb   :  { %15 = dma.vmem_to_smem %s13_s26, 16, %s3795_s28, [#allocation2] }
   0xc   :  { %3791 = dma.done.wait [#allocation2], 16 }
   0xd   :  { %3792 = vsyncadd [#allocation2], 4294967280 }
   0xe   :  { %17 = sfence }
   0xf   :  { %v42_v0 = vld [vmem:[%s4758_s5 + $0x58] sm:$0x3]  ;;  %vm77_vm0 = vcmask 1041408   ;;  %v3796_v1 = vmov 0.0   ;;  %v41_v2 = vld [vmem:[%s4758_s5 + $0x50] sm:$0xff]  ;;  %vm3797_vm1 = vmmov 0  }
  0x10   :  { %3315 = vmatprep.subr.mxu0 %v3796_v1  ;;  %3342 = vmatprep.subr.mxu1 %v3796_v1  ;;  %v40_v3 = vld [vmem:[%s4758_s5 + $0x48] sm:$0xff] }
  0x11   :  { %3316 = vmatpush3.msk.msra.mxu0 %vm77_vm0, %v42_v0  ;;  %3339 = vmatprep.mubr.msk.f32.mxu0 %vm3797_vm1, %v3796_v1 }
  0x12   :  { %3317 = vmatprep.subr.mxu0 %v3796_v1  ;;  %3374 = vmatprep.mubr.msk.f32.mxu1 %vm3797_vm1, %v3796_v1 }
  0x13   :  { %3318 = vmatpush3.msra.mxu0 %v41_v2 }
  0x14   :  { %18 = vsyncpa [#allocation5], 0  ;;  %3319 = vmatprep.subr.mxu0 %v3796_v1  ;;  %v39_v4 = vld [vmem:[%s4758_s5 + $0x40] sm:$0xff]  ;;  %v38_v5 = vld [vmem:[%s4758_s5 + $0x38] sm:$0xff]  ;;  %vm73_vm2 = vcmask 736256   ;;  %v70_v30 = vlaneseq  ;;  %s3798_s13 = smov 1024  }
  0x15   :  { %3320 = vmatpush3.msra.mxu0 %v40_v3  ;;  %v37_v6 = vld [vmem:[%s4758_s5 + $0x30] sm:$0xff]  ;;  %v36_v7 = vld [vmem:[%s4758_s5 + $0x28] sm:$0xff]  ;;  %v35_v8 = vld [vmem:[%s4758_s5 + $0x20] sm:$0xff]  ;;  %vm232_vm3 = vcmask 130048   ;;  %s3799_s26 = smov 0.0   ;;  %vm375_vm4 = vcmask 64512  }
  0x16   :  { %3321 = vmatprep.subr.mxu0 %v3796_v1  ;;  %v34_v9 = vld [vmem:[%s4758_s5 + $0x18] sm:$0xff]  ;;  %v33_v10 = vld [vmem:[%s4758_s5 + $0x10] sm:$0xff]  ;;  %v32_v11 = vld [vmem:[%s4758_s5 + $0x8] sm:$0xff]  ;;  %v3967_v31 = vshrl.u32 %v70_v30, 7  ;;  %s4022_s14 = sld [smem:[#allocation3]] }
  0x17   :  { %3322 = vmatpush3.msra.mxu0 %v39_v4  ;;  %v31_v12 = vld [vmem:[%s4758_s5] sm:$0xff]  ;;  %v60_v14 = vld [vmem:[%s4757_s4 + $0x78] sm:$0xff]  ;;  %v59_v15 = vld [vmem:[%s4757_s4 + $0x70] sm:$0xff]  ;;  %s4063_s9 = sld [smem:[#allocation3 + $0x1]] }
  0x18   :  { %3323 = vmatprep.subr.mxu0 %v3796_v1  ;;  %v72_v13 = vld [vmem:[%s4754_s1] sm:$0x3]  ;;  %3343 = vmatpush3.msra.mxu1 %v60_v14  ;;  %v58_v16 = vld [vmem:[%s4757_s4 + $0x68] sm:$0xff]  ;;  %v56_v18 = vld [vmem:[%s4757_s4 + $0x58] sm:$0xff]  ;;  %v3970_v32 = vsub.s32 0, %v3967_v31  ;;  %s4116_s11 = sld [smem:[#allocation3 + $0x2]] }
  0x19   :  { %3324 = vmatpush3.msra.mxu0 %v38_v5  ;;  %3344 = vmatprep.subr.mxu1 %v3796_v1  ;;  %v57_v17 = vld [vmem:[%s4757_s4 + $0x60] sm:$0xff]  ;;  %v55_v19 = vld [vmem:[%s4757_s4 + $0x50] sm:$0xff]  ;;  %v54_v20 = vld [vmem:[%s4757_s4 + $0x48] sm:$0xff]  ;;  %s4151_s8 = sld [smem:[#allocation3 + $0x3]] }
  0x1a   :  { %3325 = vmatprep.subr.mxu0 %v3796_v1  ;;  %3345 = vmatpush3.msra.mxu1 %v59_v15  ;;  %v53_v21 = vld [vmem:[%s4757_s4 + $0x40] sm:$0xff]  ;;  %v52_v22 = vld [vmem:[%s4757_s4 + $0x38] sm:$0xff]  ;;  %v51_v23 = vld [vmem:[%s4757_s4 + $0x30] sm:$0xff]  ;;  %s4231_s15 = sld [smem:[#allocation3 + $0x5]] }
  0x1b   :  { %3326 = vmatpush3.msra.mxu0 %v37_v6  ;;  %3346 = vmatprep.subr.mxu1 %v3796_v1  ;;  %v50_v24 = vld [vmem:[%s4757_s4 + $0x28] sm:$0xff]  ;;  %v49_v25 = vld [vmem:[%s4757_s4 + $0x20] sm:$0xff]  ;;  %v48_v26 = vld [vmem:[%s4757_s4 + $0x18] sm:$0xff] }
  0x1c   :  { %3327 = vmatprep.subr.mxu0 %v3796_v1  ;;  %3347 = vmatpush3.msra.mxu1 %v58_v16  ;;  %v47_v27 = vld [vmem:[%s4757_s4 + $0x10] sm:$0xff]  ;;  %v46_v28 = vld [vmem:[%s4757_s4 + $0x8] sm:$0xff]  ;;  %v45_v29 = vld [vmem:[%s4757_s4] sm:$0xff]  ;;  %v450_v15 = vstv %s4022_s14 }
  0x1d   :  { %3328 = vmatpush3.msra.mxu0 %v36_v7  ;;  %3348 = vmatprep.subr.mxu1 %v3796_v1  ;;  %v3126_v37 = vld [vmem:[%s4759_s6] ss:$0 sm:$0xff]  ;;  %v62_v58 = vld [vmem:[%s4757_s4 + $0x88] sm:$0xff]  ;;  %v65_v62 = vld [vmem:[%s4759_s6 + $0x1] sm:$0x1] }
  0x1e   :  { %3329 = vmatprep.subr.mxu0 %v3796_v1  ;;  %3349 = vmatpush3.msra.mxu1 %v57_v17  ;;  %v61_v59 = vld [vmem:[%s4757_s4 + $0x80] sm:$0xff] }
  0x1f   :  { %3330 = vmatpush3.msra.mxu0 %v35_v8  ;;  %3350 = vmatprep.subr.mxu1 %v3796_v1  ;;  %v3127_v5 = vld [vmem:[%s4759_s6 + $0x2] ss:$0 sm:$0xff] }
  0x20   :  { %3331 = vmatprep.subr.mxu0 %v3796_v1  ;;  %3351 = vmatpush3.msra.mxu1 %v56_v18  ;;  %v358_v8 = vld [vmem:[%s4755_s2] sm:$0xff] }
  0x21   :  { %3332 = vmatpush3.msra.mxu0 %v34_v9  ;;  %3352 = vmatprep.subr.mxu1 %v3796_v1  ;;  %v3128_v9 = vld [vmem:[%s4759_s6 + $0x3] ss:$0 sm:$0xff] }
  0x22   :  { %3333 = vmatprep.subr.mxu0 %v3796_v1  ;;  %3353 = vmatpush3.msra.mxu1 %v55_v19 }
  0x23   :  { %3334 = vmatpush3.msra.mxu0 %v33_v10  ;;  %3354 = vmatprep.subr.mxu1 %v3796_v1 }
  0x24   :  { %3335 = vmatprep.subr.mxu0 %v3796_v1  ;;  %3355 = vmatpush3.msra.mxu1 %v54_v20 }
  0x25   :  { %3336 = vmatpush3.msra.mxu0 %v32_v11  ;;  %3356 = vmatprep.subr.mxu1 %v3796_v1 }
  0x26   :  { %3337 = vmatprep.subr.mxu0 %v3796_v1  ;;  %3357 = vmatpush3.msra.mxu1 %v53_v21 }
  0x27   :  { %3338 = vmatpush3.msra.mxu0 %v31_v12  ;;  %3358 = vmatprep.subr.mxu1 %v3796_v1 }
  0x28   :  { %3340 = vmatmul.mubr.msk.f32.vlgmr.msra.gmra.mxu0 %vm73_vm2, %v72_v13  ;;  %3377 = vmatprep.subr.mxu0 %v3796_v1  ;;  %v3131_v13 = vld [vmem:[%s4756_s3] ss:$0 sm:$0xff] }
  0x29   :  { %3381 = vmatprep.mubr.msk.f32.mxu0 %vm3797_vm1, %v3796_v1  ;;  %3359 = vmatpush3.msra.mxu1 %v52_v22 }
  0x2a   :  { %3360 = vmatprep.subr.mxu1 %v3796_v1  ;;  %3378 = vmatpush3.msra.mxu0 %v62_v58 }
  0x2b   :  { %3361 = vmatpush3.msra.mxu1 %v51_v23  ;;  %3379 = vmatprep.subr.mxu0 %v3796_v1 }
  0x2c   :  { %3362 = vmatprep.subr.mxu1 %v3796_v1  ;;  %3380 = vmatpush3.msra.mxu0 %v61_v59 }
  0x2d   :  { %3363 = vmatpush3.msra.mxu1 %v50_v24  ;;  %3384 = vmatprep.subr.mxu0 %v3796_v1 }
  0x2e   :  { %3364 = vmatprep.subr.mxu1 %v3796_v1 }
  0x2f   :  { %3365 = vmatpush3.msra.mxu1 %v49_v25 }
  0x30   :  { %3366 = vmatprep.subr.mxu1 %v3796_v1 }
  0x31   :  { %3367 = vmatpush3.msra.mxu1 %v48_v26 }
  0x32   :  { %3368 = vmatprep.subr.mxu1 %v3796_v1 }
  0x33   :  { %3369 = vmatpush3.msra.mxu1 %v47_v27 }
  0x34   :  { %3370 = vmatprep.subr.mxu1 %v3796_v1 }
  0x35   :  { %3371 = vmatpush3.msra.mxu1 %v46_v28 }
  0x36   :  { %3372 = vmatprep.subr.mxu1 %v3796_v1 }
  0x37   :  { %3373 = vmatpush3.msra.mxu1 %v45_v29 }
  0x38   :  { %3396 = vmatprep.subr.mxu1 %v3796_v1 }
  0xe8   :  { %v3972_v33 = vpop.f32.mrf.mxu0 }
  0xe9   :  { %v154_v34 = vrot.slane %v3972_v33, %v3970_v32 }
  0xea   :  { %v3341_v35 = vpop.f32.mrf.mxu0 }
  0xeb   :  { %156 = vrot.lane.b32.xlu0 %v154_v34, %s3798_s13 }
 0x15d   :  { %v157_v36 = vpop.permute.xlu0 %156 }
 0x15e   :  { %3375 = vmatmul.mubr.f32.vlgmr.msra.gmra.mxu1 %v157_v36 }
 0x15f   :  { %3398 = vmatprep.mubr.msk.f32.mxu1 %vm3797_vm1, %v3796_v1 }
 0x21e   :  { %v228_v38 = vpop.f32.mrf.mxu1 }
 0x21f   :  { %v3982_v39 = vadd.f32 %v3126_v37, %v228_v38 }
 0x220   :  { %v3376_v40 = vpop.f32.mrf.mxu1 }
 0x221   :  { %v233_v41 = vsel %vm232_vm3, %v3982_v39, 0.0  ;;  %v246_v42 = vmul.f32 %v3982_v39, %v3982_v39 }
 0x222   :  { %234 = vadd.xlane.f32.xlu0 %v233_v41 }
 0x223   :  { %v247_v43 = vsel %vm232_vm3, %v246_v42, 0.0 }
 0x224   :  { %248 = vadd.xlane.f32.xlu1 %v247_v43  ;;  %v363_v43 = vld [vmem:[%s4756_s3 + $0x1] sm:$0x1] }
 0x2ab   :  { %v235_v44 = vpop.xlane.xlu0 %234 }
 0x2ac   :  { %v236_v45 = vrot.slane %v235_v44, 4 }
 0x2ad   :  { %v249_v46 = vpop.xlane.xlu1 %248 }
 0x2ae   :  { %v237_v47 = vadd.f32 %v236_v45, %v235_v44  ;;  %v250_v48 = vrot.slane %v249_v46, 4 }
 0x2b0   :  { %v238_v49 = vrot.slane %v237_v47, 2  ;;  %v251_v50 = vadd.f32 %v250_v48, %v249_v46 }
 0x2b2   :  { %v252_v51 = vrot.slane %v251_v50, 2  ;;  %v239_v52 = vadd.f32 %v238_v49, %v237_v47  ;;  %v3133_v49 = vld [vmem:[%s4756_s3 + $0x2] ss:$0 sm:$0xff] }
 0x2b4   :  { %v240_v53 = vrot.slane %v239_v52, 1  ;;  %v253_v54 = vadd.f32 %v252_v51, %v251_v50  ;;  %v4041_v50 = vadd.s32 4294967295, %v3967_v31  ;;  %v4044_v51 = vadd.s32 1, %v3967_v31 }
 0x2b6   :  { %v241_v55 = vadd.f32 %v240_v53, %v239_v52  ;;  %v254_v56 = vrot.slane %v253_v54, 1  ;;  %v359_v52 = vld [vmem:[%s4755_s2 + $0x8] sm:$0x7]  ;;  %vm503_vm6 = vcmp.ge.s32.totalorder %v4041_v50, 0  ;;  %vm522_vm7 = vcmp.lt.s32.totalorder %v4044_v51, 8 }
 0x2b7   :  { %v4060_v58 = vrot.slane %v359_v52, %v3970_v32 }
 0x2b8   :  { %3546 = vpush %v241_v55  ;;  %v255_v57 = vadd.f32 %v254_v56, %v253_v54  ;;  %v4050_v54 = vsub.s32 1, %v3967_v31  ;;  %v4053_v55 = vsub.s32 2, %v3967_v31 }
 0x2ba   :  { %3548 = vpush %v255_v57  ;;  %v4057_v57 = vrot.slane %v359_v52, %v4050_v54 }
 0x2e9   :  { %s3547_s20 = spop %3546 }
 0x2ea   :  { %s245_s21 = smul.f32 0.0078125, %s3547_s20 }
 0x2eb   :  { %s3549_s22 = spop %3548 }
 0x2ec   :  { %s260_s23 = smul.f32 %s245_s21, %s245_s21  ;;  %v267_v63 = vstv %s245_s21 }
 0x2ed   :  { %s259_s24 = smul.f32 0.0078125, %s3549_s22  ;;  %v268_v3 = vsub.f32 %v3982_v39, %v267_v63 }
 0x2ef   :  { %s261_s25 = ssub.f32 %s259_s24, %s260_s23 }
 0x2f1   :  { %s262_s27 = smax.f32 %s3799_s26, %s261_s25 }
 0x2f2   :  { %s263_s28 = sadd.f32 1e-05, %s262_s27 }
 0x2f4   :  { %v264_v60 = vstv %s263_s28 }
 0x2f5   :  { %3660 = vrsqrt.f32 %v264_v60 }
 0x302   :  { %v3661_v61 = vpop.eup %3660 }
 0x303   :  { %3550 = vpush %v3661_v61  ;;  %v4066_v61 = vrot.slane %v359_v52, %v4053_v55 }
 0x334   :  { %s3551_s0 = spop %3550 }
 0x335   :  { %v269_v0 = vstv %s3551_s0 }
 0x336   :  { %v270_v2 = vmul.f32 %v269_v0, %v65_v62 }
 0x338   :  { %v274_v4 = vrot.slane %v270_v2, %v3970_v32 }
 0x33a   :  { %v275_v6 = vmul.f32 %v274_v4, %v268_v3 }
 0x33c   :  { %v280_v7 = vadd.f32 %v3127_v5, %v275_v6  ;;  %v3134_v5 = vld [vmem:[%s4756_s3 + $0x3] ss:$0 sm:$0xff] }
 0x33e   :  { %3382 = vmatmul.mubr.msk.f32.vlgmr.msra.gmra.mxu0 %vm232_vm3, %v280_v7  ;;  %v537_v7 = vstv %s4063_s9 }
 0x33f   :  { %3385 = vmatpush3.msra.mxu0 %v358_v8  ;;  %3386 = vmatprep.mubr.msk.f32.mxu0 %vm3797_vm1, %v3796_v1 }
 0x340   :  { %3389 = vmatprep.subr.mxu0 %v3796_v1 }
 0x3fe   :  { %v354_v10 = vpop.f32.mrf.mxu0 }
 0x3ff   :  { %v4016_v11 = vadd.f32 %v3128_v9, %v354_v10 }
 0x400   :  { %v3383_v12 = vpop.f32.mrf.mxu0 }
 0x401   :  { %3387 = vmatmul.mubr.msk.f32.vlgmr.msra.gmra.mxu0 %vm375_vm4, %v4016_v11 }
 0x402   :  { %3393 = vmatprep.mubr.msk.f32.mxu0 %vm3797_vm1, %v3796_v1 }
 0x4c1   :  { %v445_v14 = vpop.f32.mrf.mxu0 }
 0x4c2   :  { %v446_v16 = vadd.f32 %v3131_v13, %v445_v14 }
 0x4c3   :  { %v3388_v17 = vpop.f32.mrf.mxu0 }
 0x4c4   :  { %v451_v18 = vmul.f32 %v450_v15, %v446_v16  ;;  %vm449_vm5 = vcmp.ge.f32.partialorder %v446_v16, 0.0 }
 0x4c6   :  { %v452_v19 = vsel %vm449_vm5, %v446_v16, %v451_v18 }
 0x4c7   :  { %v453_v20 = vsel %vm232_vm3, %v452_v19, 0.0  ;;  %v466_v21 = vmul.f32 %v452_v19, %v452_v19 }
 0x4c8   :  { %454 = vadd.xlane.f32.xlu1 %v453_v20 }
 0x4c9   :  { %v467_v22 = vsel %vm232_vm3, %v466_v21, 0.0 }
 0x4cc   :  { %468 = vadd.xlane.f32.xlu1 %v467_v22 }
 0x551   :  { %v455_v23 = vpop.xlane.xlu1 %454 }
 0x552   :  { %v456_v24 = vrot.slane %v455_v23, 4 }
 0x554   :  { %v457_v25 = vadd.f32 %v456_v24, %v455_v23 }
 0x555   :  { %v469_v26 = vpop.xlane.xlu1 %468 }
 0x556   :  { %v458_v27 = vrot.slane %v457_v25, 2  ;;  %v470_v28 = vrot.slane %v469_v26, 4 }
 0x558   :  { %v471_v29 = vadd.f32 %v470_v28, %v469_v26  ;;  %v459_v30 = vadd.f32 %v458_v27, %v457_v25 }
 0x55a   :  { %v472_v34 = vrot.slane %v471_v29, 2  ;;  %v460_v35 = vrot.slane %v459_v30, 1 }
 0x55c   :  { %v461_v36 = vadd.f32 %v460_v35, %v459_v30  ;;  %v473_v37 = vadd.f32 %v472_v34, %v471_v29  ;;  %v361_v30 = vld [vmem:[%s4755_s2 + $0x18] sm:$0xff]  ;;  %v360_v34 = vld [vmem:[%s4755_s2 + $0x10] sm:$0xff] }
 0x55d   :  { %3390 = vmatpush3.msra.mxu0 %v361_v30 }
 0x55e   :  { %3552 = vpush %v461_v36  ;;  %v474_v38 = vrot.slane %v473_v37, 1  ;;  %3391 = vmatprep.subr.mxu0 %v3796_v1 }
 0x55f   :  { %3392 = vmatpush3.msra.mxu0 %v360_v34  ;;  %v3153_v34 = vld [vmem:[%s4756_s3 + $0xa] ss:$0 sm:$0xff] }
 0x560   :  { %v475_v40 = vadd.f32 %v474_v38, %v473_v37  ;;  %3401 = vmatprep.subr.mxu0 %v3796_v1  ;;  %v366_v37 = vld [vmem:[%s4756_s3 + $0x4] sm:$0x1] }
 0x562   :  { %3554 = vpush %v475_v40 }
 0x58f   :  { %s3553_s17 = spop %3552 }
 0x590   :  { %s465_s18 = smul.f32 0.0078125, %s3553_s17 }
 0x592   :  { %s480_s19 = smul.f32 %s465_s18, %s465_s18  ;;  %v487_v44 = vstv %s465_s18 }
 0x593   :  { %s3555_s20 = spop %3554  ;;  %v488_v47 = vsub.f32 %v452_v19, %v487_v44  ;;  %v3135_v44 = vld [vmem:[%s4756_s3 + $0x5] ss:$0 sm:$0xff] }
 0x594   :  { %s479_s21 = smul.f32 0.0078125, %s3555_s20 }
 0x596   :  { %s481_s22 = ssub.f32 %s479_s21, %s480_s19 }
 0x598   :  { %s482_s23 = smax.f32 %s3799_s26, %s481_s22 }
 0x599   :  { %s483_s24 = sadd.f32 1e-05, %s482_s23 }
 0x59b   :  { %v484_v41 = vstv %s483_s24 }
 0x59c   :  { %3662 = vrsqrt.f32 %v484_v41 }
 0x5a9   :  { %v3663_v42 = vpop.eup %3662 }
 0x5aa   :  { %3556 = vpush %v3663_v42 }
 0x5db   :  { %s3557_s28 = spop %3556 }
 0x5dc   :  { %v489_v45 = vstv %s3557_s28 }
 0x5dd   :  { %v490_v46 = vmul.f32 %v489_v45, %v363_v43 }
 0x5df   :  { %v494_v48 = vrot.slane %v490_v46, %v3970_v32 }
 0x5e1   :  { %v495_v53 = vmul.f32 %v494_v48, %v488_v47  ;;  %v3138_v47 = vld [vmem:[%s4755_s2 + $0x20] sm:$0xff] }
 0x5e2   :  { %3397 = vmatpush3.msra.mxu1 %v3138_v47  ;;  %v3137_v48 = vld [vmem:[%s4756_s3 + $0x6] ss:$0 sm:$0xff] }
 0x5e3   :  { %v500_v56 = vadd.f32 %v3133_v49, %v495_v53  ;;  %3408 = vmatprep.subr.mxu1 %v3796_v1 }
 0x5e5   :  { %v501_v59 = vrot.slane %v500_v56, 7  ;;  %v519_v60 = vrot.slane %v500_v56, 1  ;;  %v517_v0 = vmul.f32 %v4057_v57, %v500_v56 }
 0x5e7   :  { %v506_v62 = vsel %vm503_vm6, %v501_v59, 0.0  ;;  %v524_v63 = vsel %vm522_vm7, %v519_v60, 0.0  ;;  %v3151_v59 = vld [vmem:[%s4756_s3 + $0x8] ss:$0 sm:$0xff] }
 0x5e8   :  { %v511_v2 = vmul.f32 %v4060_v58, %v506_v62  ;;  %v529_v4 = vmul.f32 %v4066_v61, %v524_v63  ;;  %v760_v62 = vstv %s4116_s11 }
 0x5ea   :  { %v518_v3 = vadd.f32 %v517_v0, %v511_v2 }
 0x5ec   :  { %v530_v6 = vadd.f32 %v529_v4, %v518_v3 }
 0x5ee   :  { %v535_v8 = vadd.f32 %v3134_v5, %v530_v6 }
 0x5f0   :  { %vm536_vm8 = vcmp.ge.f32.partialorder %v535_v8, 0.0  ;;  %v538_v9 = vmul.f32 %v537_v7, %v535_v8 }
 0x5f2   :  { %v539_v10 = vsel %vm536_vm8, %v535_v8, %v538_v9 }
 0x5f3   :  { %v540_v12 = vsel %vm232_vm3, %v539_v10, 0.0  ;;  %v553_v13 = vmul.f32 %v539_v10, %v539_v10 }
 0x5f4   :  { %541 = vadd.xlane.f32.xlu1 %v540_v12 }
 0x5f5   :  { %v554_v14 = vsel %vm232_vm3, %v553_v13, 0.0 }
 0x5f8   :  { %555 = vadd.xlane.f32.xlu1 %v554_v14 }
 0x67d   :  { %v542_v16 = vpop.xlane.xlu1 %541 }
 0x67e   :  { %v543_v17 = vrot.slane %v542_v16, 4 }
 0x680   :  { %v544_v18 = vadd.f32 %v543_v17, %v542_v16 }
 0x681   :  { %v556_v19 = vpop.xlane.xlu1 %555 }
 0x682   :  { %v545_v20 = vrot.slane %v544_v18, 2  ;;  %v557_v21 = vrot.slane %v556_v19, 4 }
 0x684   :  { %v558_v22 = vadd.f32 %v557_v21, %v556_v19  ;;  %v546_v23 = vadd.f32 %v545_v20, %v544_v18 }
 0x686   :  { %v559_v24 = vrot.slane %v558_v22, 2  ;;  %v547_v25 = vrot.slane %v546_v23, 1 }
 0x688   :  { %v548_v26 = vadd.f32 %v547_v25, %v546_v23  ;;  %v560_v27 = vadd.f32 %v559_v24, %v558_v22  ;;  %v3143_v25 = vld [vmem:[%s4756_s3 + $0x9] sm:$0x1] }
 0x68a   :  { %3558 = vpush %v548_v26  ;;  %v561_v28 = vrot.slane %v560_v27, 1 }
 0x68c   :  { %v562_v29 = vadd.f32 %v561_v28, %v560_v27 }
 0x68e   :  { %3560 = vpush %v562_v29 }
 0x6bb   :  { %s3559_s17 = spop %3558 }
 0x6bc   :  { %s552_s18 = smul.f32 0.0078125, %s3559_s17 }
 0x6be   :  { %s567_s19 = smul.f32 %s552_s18, %s552_s18  ;;  %v574_v38 = vstv %s552_s18 }
 0x6bf   :  { %s3561_s20 = spop %3560  ;;  %v575_v42 = vsub.f32 %v539_v10, %v574_v38 }
 0x6c0   :  { %s566_s21 = smul.f32 0.0078125, %s3561_s20 }
 0x6c2   :  { %s568_s22 = ssub.f32 %s566_s21, %s567_s19 }
 0x6c4   :  { %s569_s23 = smax.f32 %s3799_s26, %s568_s22 }
 0x6c5   :  { %s570_s24 = sadd.f32 1e-05, %s569_s23 }
 0x6c7   :  { %v571_v35 = vstv %s570_s24 }
 0x6c8   :  { %3664 = vrsqrt.f32 %v571_v35  ;;  %v4135_v35 = vadd.s32 4294967294, %v3967_v31 }
 0x6ca   :  { %vm813_vm10 = vcmp.ge.s32.totalorder %v4135_v35, 0 }
 0x6d5   :  { %v3665_v36 = vpop.eup %3664 }
 0x6d6   :  { %3562 = vpush %v3665_v36  ;;  %v4138_v36 = vadd.s32 2, %v3967_v31 }
 0x6d8   :  { %vm832_vm11 = vcmp.lt.s32.totalorder %v4138_v36, 8 }
 0x707   :  { %s3563_s28 = spop %3562 }
 0x708   :  { %v576_v40 = vstv %s3563_s28 }
 0x709   :  { %v577_v41 = vmul.f32 %v576_v40, %v366_v37  ;;  %v3139_v37 = vld [vmem:[%s4755_s2 + $0x28] sm:$0x7] }
 0x70a   :  { %v4154_v31 = vrot.slane %v3139_v37, %v4053_v55 }
 0x70b   :  { %v581_v43 = vrot.slane %v577_v41, %v3970_v32  ;;  %v4145_v41 = vrot.slane %v3139_v37, %v4050_v54 }
 0x70d   :  { %v582_v45 = vmul.f32 %v581_v43, %v575_v42  ;;  %v4148_v42 = vrot.slane %v3139_v37, %v3970_v32  ;;  %v3155_v37 = vld [vmem:[%s4756_s3 + $0xd] ss:$0 sm:$0xff] }
 0x70f   :  { %v587_v46 = vadd.f32 %v3135_v44, %v582_v45 }
 0x711   :  { %3394 = vmatmul.mubr.msk.f32.vlgmr.msra.gmra.mxu0 %vm232_vm3, %v587_v46 }
 0x712   :  { %3405 = vmatprep.mubr.msk.f32.mxu0 %vm3797_vm1, %v3796_v1 }
 0x7d1   :  { %v657_v49 = vpop.f32.mrf.mxu0 }
 0x7d2   :  { %v661_v52 = vadd.f32 %v657_v49, %v4016_v11 }
 0x7d3   :  { %v3395_v53 = vpop.f32.mrf.mxu0 }
 0x7d4   :  { %v4110_v56 = vadd.f32 %v3137_v48, %v661_v52  ;;  %v3154_v53 = vld [vmem:[%s4756_s3 + $0xb] ss:$0 sm:$0xff] }
 0x7d6   :  { %3399 = vmatmul.mubr.msk.f32.vlgmr.msra.gmra.mxu1 %vm375_vm4, %v4110_v56 }
 0x7d7   :  { %3410 = vmatprep.mubr.msk.f32.mxu1 %vm3797_vm1, %v3796_v1 }
 0x896   :  { %v755_v60 = vpop.f32.mrf.mxu1 }
 0x897   :  { %v756_v11 = vadd.f32 %v3151_v59, %v755_v60  ;;  %v847_v60 = vstv %s4151_s8 }
 0x898   :  { %v3400_v63 = vpop.f32.mrf.mxu1 }
 0x899   :  { %v761_v0 = vmul.f32 %v760_v62, %v756_v11  ;;  %vm759_vm9 = vcmp.ge.f32.partialorder %v756_v11, 0.0 }
 0x89b   :  { %v762_v2 = vsel %vm759_vm9, %v756_v11, %v761_v0 }
 0x89c   :  { %v763_v3 = vsel %vm232_vm3, %v762_v2, 0.0  ;;  %v776_v4 = vmul.f32 %v762_v2, %v762_v2 }
 0x89d   :  { %764 = vadd.xlane.f32.xlu1 %v763_v3 }
 0x89e   :  { %v777_v5 = vsel %vm232_vm3, %v776_v4, 0.0 }
 0x8a1   :  { %778 = vadd.xlane.f32.xlu1 %v777_v5 }
 0x926   :  { %v765_v6 = vpop.xlane.xlu1 %764 }
 0x927   :  { %v766_v8 = vrot.slane %v765_v6, 4 }
 0x929   :  { %v767_v9 = vadd.f32 %v766_v8, %v765_v6 }
 0x92a   :  { %v779_v10 = vpop.xlane.xlu1 %778 }
 0x92b   :  { %v768_v12 = vrot.slane %v767_v9, 2  ;;  %v780_v13 = vrot.slane %v779_v10, 4 }
 0x92d   :  { %v781_v14 = vadd.f32 %v780_v13, %v779_v10  ;;  %v769_v16 = vadd.f32 %v768_v12, %v767_v9 }
 0x92f   :  { %v782_v17 = vrot.slane %v781_v14, 2  ;;  %v770_v18 = vrot.slane %v769_v16, 1 }
 0x931   :  { %v771_v19 = vadd.f32 %v770_v18, %v769_v16  ;;  %v783_v20 = vadd.f32 %v782_v17, %v781_v14 }
 0x933   :  { %3564 = vpush %v771_v19  ;;  %v784_v21 = vrot.slane %v783_v20, 1 }
 0x935   :  { %v785_v22 = vadd.f32 %v784_v21, %v783_v20 }
 0x937   :  { %3566 = vpush %v785_v22  ;;  %v3141_v22 = vld [vmem:[%s4755_s2 + $0x38] sm:$0xff] }
 0x938   :  { %3402 = vmatpush3.msra.mxu0 %v3141_v22 }
 0x939   :  { %3403 = vmatprep.subr.mxu0 %v3796_v1 }
 0x964   :  { %s3565_s16 = spop %3564 }
 0x965   :  { %s775_s17 = smul.f32 0.0078125, %s3565_s16  ;;  %s4204_s16 = sld [smem:[#allocation3 + $0x4]] }
 0x967   :  { %s790_s18 = smul.f32 %s775_s17, %s775_s17  ;;  %v797_v26 = vstv %s775_s17 }
 0x968   :  { %s3567_s19 = spop %3566  ;;  %v798_v29 = vsub.f32 %v762_v2, %v797_v26  ;;  %v3146_v26 = vld [vmem:[%s4756_s3 + $0xc] sm:$0x1] }
 0x969   :  { %s789_s20 = smul.f32 0.0078125, %s3567_s19 }
 0x96b   :  { %s791_s21 = ssub.f32 %s789_s20, %s790_s18 }
 0x96d   :  { %s792_s22 = smax.f32 %s3799_s26, %s791_s21 }
 0x96e   :  { %s793_s23 = sadd.f32 1e-05, %s792_s22 }
 0x970   :  { %v794_v23 = vstv %s793_s23 }
 0x971   :  { %3666 = vrsqrt.f32 %v794_v23  ;;  %v3140_v23 = vld [vmem:[%s4755_s2 + $0x30] sm:$0xff] }
 0x972   :  { %3404 = vmatpush3.msra.mxu0 %v3140_v23  ;;  %v3163_v23 = vld [vmem:[%s4756_s3 + $0x11] sm:$0x1] }
 0x973   :  { %3413 = vmatprep.subr.mxu0 %v3796_v1 }
 0x97e   :  { %v3667_v24 = vpop.eup %3666 }
 0x97f   :  { %3568 = vpush %v3667_v24 }
 0x9b0   :  { %s3569_s27 = spop %3568 }
 0x9b1   :  { %v799_v27 = vstv %s3569_s27 }
 0x9b2   :  { %v800_v28 = vmul.f32 %v3143_v25, %v799_v27 }
 0x9b4   :  { %v804_v30 = vrot.slane %v800_v28, %v3970_v32 }
 0x9b6   :  { %v805_v38 = vmul.f32 %v804_v30, %v798_v29 }
 0x9b8   :  { %v810_v40 = vadd.f32 %v3153_v34, %v805_v38 }
 0x9ba   :  { %v811_v43 = vrot.slane %v810_v40, 6  ;;  %v829_v44 = vrot.slane %v810_v40, 2  ;;  %v827_v47 = vmul.f32 %v4145_v41, %v810_v40 }
 0x9bc   :  { %v816_v45 = vsel %vm813_vm10, %v811_v43, 0.0  ;;  %v834_v46 = vsel %vm832_vm11, %v829_v44, 0.0  ;;  %v3158_v43 = vld [vmem:[%s4755_s2 + $0x40] sm:$0xff]  ;;  %v3157_v44 = vld [vmem:[%s4756_s3 + $0xe] ss:$0 sm:$0xff] }
 0x9bd   :  { %v821_v48 = vmul.f32 %v4148_v42, %v816_v45  ;;  %v839_v52 = vmul.f32 %v4154_v31, %v834_v46  ;;  %3409 = vmatpush3.msra.mxu1 %v3158_v43 }
 0x9be   :  { %3420 = vmatprep.subr.mxu1 %v3796_v1 }
 0x9bf   :  { %v828_v49 = vadd.f32 %v827_v47, %v821_v48 }
 0x9c1   :  { %v840_v59 = vadd.f32 %v839_v52, %v828_v49  ;;  %v3171_v49 = vld [vmem:[%s4756_s3 + $0x10] ss:$0 sm:$0xff] }
 0x9c3   :  { %v845_v11 = vadd.f32 %v3154_v53, %v840_v59  ;;  %v1070_v53 = vstv %s4204_s16 }
 0x9c5   :  { %vm846_vm12 = vcmp.ge.f32.partialorder %v845_v11, 0.0  ;;  %v848_v63 = vmul.f32 %v847_v60, %v845_v11 }
 0x9c7   :  { %v849_v0 = vsel %vm846_vm12, %v845_v11, %v848_v63 }
 0x9c8   :  { %v850_v2 = vsel %vm232_vm3, %v849_v0, 0.0  ;;  %v863_v3 = vmul.f32 %v849_v0, %v849_v0 }
 0x9c9   :  { %851 = vadd.xlane.f32.xlu1 %v850_v2 }
 0x9ca   :  { %v864_v4 = vsel %vm232_vm3, %v863_v3, 0.0 }
 0x9cd   :  { %865 = vadd.xlane.f32.xlu1 %v864_v4 }
 0xa52   :  { %v852_v5 = vpop.xlane.xlu1 %851 }
 0xa53   :  { %v853_v6 = vrot.slane %v852_v5, 4 }
 0xa55   :  { %v854_v8 = vadd.f32 %v853_v6, %v852_v5 }
 0xa56   :  { %v866_v9 = vpop.xlane.xlu1 %865 }
 0xa57   :  { %v855_v10 = vrot.slane %v854_v8, 2  ;;  %v867_v12 = vrot.slane %v866_v9, 4 }
 0xa59   :  { %v868_v13 = vadd.f32 %v867_v12, %v866_v9  ;;  %v856_v14 = vadd.f32 %v855_v10, %v854_v8 }
 0xa5b   :  { %v869_v16 = vrot.slane %v868_v13, 2  ;;  %v857_v17 = vrot.slane %v856_v14, 1 }
 0xa5d   :  { %v858_v18 = vadd.f32 %v857_v17, %v856_v14  ;;  %v870_v19 = vadd.f32 %v869_v16, %v868_v13 }
 0xa5f   :  { %3570 = vpush %v858_v18  ;;  %v871_v20 = vrot.slane %v870_v19, 1 }
 0xa61   :  { %v872_v21 = vadd.f32 %v871_v20, %v870_v19 }
 0xa63   :  { %3572 = vpush %v872_v21 }
 0xa90   :  { %s3571_s18 = spop %3570 }
 0xa91   :  { %s862_s19 = smul.f32 0.0078125, %s3571_s18 }
 0xa93   :  { %s877_s20 = smul.f32 %s862_s19, %s862_s19  ;;  %v884_v27 = vstv %s862_s19 }
 0xa94   :  { %s3573_s21 = spop %3572  ;;  %v885_v30 = vsub.f32 %v849_v0, %v884_v27 }
 0xa95   :  { %s876_s22 = smul.f32 0.0078125, %s3573_s21 }
 0xa97   :  { %s878_s23 = ssub.f32 %s876_s22, %s877_s20 }
 0xa99   :  { %s879_s24 = smax.f32 %s3799_s26, %s878_s23 }
 0xa9a   :  { %s880_s25 = sadd.f32 1e-05, %s879_s24 }
 0xa9c   :  { %v881_v24 = vstv %s880_s25 }
 0xa9d   :  { %3668 = vrsqrt.f32 %v881_v24 }
 0xaaa   :  { %v3669_v25 = vpop.eup %3668 }
 0xaab   :  { %3574 = vpush %v3669_v25 }
 0xadc   :  { %s3575_s29 = spop %3574 }
 0xadd   :  { %v886_v28 = vstv %s3575_s29 }
 0xade   :  { %v887_v29 = vmul.f32 %v3146_v26, %v886_v28 }
 0xae0   :  { %v891_v34 = vrot.slane %v887_v29, %v3970_v32  ;;  %v3173_v29 = vld [vmem:[%s4756_s3 + $0x12] ss:$0 sm:$0xff] }
 0xae2   :  { %v892_v38 = vmul.f32 %v891_v34, %v885_v30  ;;  %v3159_v30 = vld [vmem:[%s4755_s2 + $0x48] sm:$0x7] }
 0xae4   :  { %v897_v40 = vadd.f32 %v3155_v37, %v892_v38  ;;  %v4226_v38 = vrot.slane %v3159_v30, %v4050_v54 }
 0xae6   :  { %3406 = vmatmul.mubr.msk.f32.vlgmr.msra.gmra.mxu0 %vm232_vm3, %v897_v40  ;;  %v4229_v40 = vrot.slane %v3159_v30, %v3970_v32 }
 0xae7   :  { %3417 = vmatprep.mubr.msk.f32.mxu0 %vm3797_vm1, %v3796_v1 }
 0xba6   :  { %v967_v45 = vpop.f32.mrf.mxu0 }
 0xba7   :  { %v971_v46 = vadd.f32 %v967_v45, %v4110_v56  ;;  %v4234_v45 = vrot.slane %v3159_v30, %v4053_v55 }
 0xba8   :  { %v3407_v47 = vpop.f32.mrf.mxu0 }
 0xba9   :  { %v4198_v48 = vadd.f32 %v3157_v44, %v971_v46 }
 0xbab   :  { %3411 = vmatmul.mubr.msk.f32.vlgmr.msra.gmra.mxu1 %vm375_vm4, %v4198_v48 }
 0xbac   :  { %3422 = vmatprep.mubr.msk.f32.mxu1 %vm3797_vm1, %v3796_v1 }
 0xc6b   :  { %v1065_v52 = vpop.f32.mrf.mxu1 }
 0xc6c   :  { %v1066_v56 = vadd.f32 %v3171_v49, %v1065_v52 }
 0xc6d   :  { %v3412_v59 = vpop.f32.mrf.mxu1 }
 0xc6e   :  { %v1071_v11 = vmul.f32 %v1070_v53, %v1066_v56  ;;  %vm1069_vm13 = vcmp.ge.f32.partialorder %v1066_v56, 0.0 }
 0xc70   :  { %v1072_v63 = vsel %vm1069_vm13, %v1066_v56, %v1071_v11  ;;  %v3174_v11 = vld [vmem:[%s4756_s3 + $0x13] ss:$0 sm:$0xff] }
 0xc71   :  { %v1073_v0 = vsel %vm232_vm3, %v1072_v63, 0.0  ;;  %v1086_v2 = vmul.f32 %v1072_v63, %v1072_v63 }
 0xc72   :  { %1074 = vadd.xlane.f32.xlu0 %v1073_v0  ;;  %v1149_v0 = vstv %s4231_s15 }
 0xc73   :  { %v1087_v3 = vsel %vm232_vm3, %v1086_v2, 0.0 }
 0xc74   :  { %1088 = vadd.xlane.f32.xlu1 %v1087_v3 }
 0xcfb   :  { %v1075_v4 = vpop.xlane.xlu0 %1074 }
 0xcfc   :  { %v1076_v5 = vrot.slane %v1075_v4, 4 }
 0xcfd   :  { %v1089_v6 = vpop.xlane.xlu1 %1088 }
 0xcfe   :  { %v1077_v8 = vadd.f32 %v1076_v5, %v1075_v4  ;;  %v1090_v9 = vrot.slane %v1089_v6, 4 }
 0xd00   :  { %v1078_v10 = vrot.slane %v1077_v8, 2  ;;  %v1091_v12 = vadd.f32 %v1090_v9, %v1089_v6 }
 0xd02   :  { %v1092_v13 = vrot.slane %v1091_v12, 2  ;;  %v1079_v14 = vadd.f32 %v1078_v10, %v1077_v8 }
 0xd04   :  { %v1080_v16 = vrot.slane %v1079_v14, 1  ;;  %v1093_v17 = vadd.f32 %v1092_v13, %v1091_v12 }
 0xd06   :  { %v1081_v18 = vadd.f32 %v1080_v16, %v1079_v14  ;;  %v1094_v19 = vrot.slane %v1093_v17, 1 }
 0xd08   :  { %3576 = vpush %v1081_v18  ;;  %v1095_v20 = vadd.f32 %v1094_v19, %v1093_v17 }
 0xd0a   :  { %3578 = vpush %v1095_v20 }
 0xd39   :  { %s3577_s19 = spop %3576 }
 0xd3a   :  { %s1085_s20 = smul.f32 0.0078125, %s3577_s19 }
 0xd3b   :  { %s3579_s21 = spop %3578 }
 0xd3c   :  { %s1100_s22 = smul.f32 %s1085_s20, %s1085_s20  ;;  %v1107_v24 = vstv %s1085_s20 }
 0xd3d   :  { %s1099_s23 = smul.f32 0.0078125, %s3579_s21  ;;  %v1108_v27 = vsub.f32 %v1072_v63, %v1107_v24 }
 0xd3f   :  { %s1101_s24 = ssub.f32 %s1099_s23, %s1100_s22 }
 0xd41   :  { %s1102_s25 = smax.f32 %s3799_s26, %s1101_s24 }
 0xd42   :  { %s1103_s27 = sadd.f32 1e-05, %s1102_s25 }
 0xd44   :  { %v1104_v21 = vstv %s1103_s27 }
 0xd45   :  { %3670 = vrsqrt.f32 %v1104_v21 }
 0xd52   :  { %v3671_v22 = vpop.eup %3670 }
 0xd53   :  { %3580 = vpush %v3671_v22 }
 0xd84   :  { %s3581_s30 = spop %3580 }
 0xd85   :  { %v1109_v25 = vstv %s3581_s30 }
 0xd86   :  { %v1110_v26 = vmul.f32 %v3163_v23, %v1109_v25  ;;  %v3161_v25 = vld [vmem:[%s4755_s2 + $0x58] sm:$0xff] }
 0xd87   :  { %3414 = vmatpush3.msra.mxu0 %v3161_v25 }
 0xd88   :  { %v1114_v28 = vrot.slane %v1110_v26, %v3970_v32  ;;  %3415 = vmatprep.subr.mxu0 %v3796_v1  ;;  %v3160_v26 = vld [vmem:[%s4755_s2 + $0x50] sm:$0xff] }
 0xd89   :  { %3416 = vmatpush3.msra.mxu0 %v3160_v26 }
 0xd8a   :  { %v1115_v34 = vmul.f32 %v1114_v28, %v1108_v27  ;;  %3425 = vmatprep.subr.mxu0 %v3796_v1 }
 0xd8c   :  { %v1120_v37 = vadd.f32 %v3173_v29, %v1115_v34  ;;  %v3166_v29 = vld [vmem:[%s4756_s3 + $0x14] sm:$0x1] }
 0xd8e   :  { %v1121_v43 = vrot.slane %v1120_v37, 7  ;;  %v1135_v44 = vrot.slane %v1120_v37, 1  ;;  %v1133_v49 = vmul.f32 %v4226_v38, %v1120_v37 }
 0xd90   :  { %v1122_v46 = vsel %vm503_vm6, %v1121_v43, 0.0  ;;  %v1136_v47 = vsel %vm522_vm7, %v1135_v44, 0.0 }
 0xd91   :  { %v1127_v52 = vmul.f32 %v4229_v40, %v1122_v46  ;;  %v1141_v59 = vmul.f32 %v4234_v45, %v1136_v47  ;;  %v3175_v46 = vld [vmem:[%s4756_s3 + $0x15] ss:$0 sm:$0xff] }
 0xd93   :  { %v1134_v56 = vadd.f32 %v1133_v49, %v1127_v52  ;;  %v3178_v52 = vld [vmem:[%s4755_s2 + $0x60] sm:$0xff] }
 0xd94   :  { %3421 = vmatpush3.msra.mxu1 %v3178_v52  ;;  %v3179_v52 = vld [vmem:[%s4755_s2 + $0x68] sm:$0x7] }
 0xd95   :  { %v1142_v63 = vadd.f32 %v1141_v59, %v1134_v56  ;;  %3432 = vmatprep.subr.mxu1 %v3796_v1  ;;  %v3177_v56 = vld [vmem:[%s4756_s3 + $0x16] ss:$0 sm:$0xff] }
 0xd97   :  { %v1147_v2 = vadd.f32 %v3174_v11, %v1142_v63 }
 0xd99   :  { %vm1148_vm14 = vcmp.ge.f32.partialorder %v1147_v2, 0.0  ;;  %v1150_v3 = vmul.f32 %v1149_v0, %v1147_v2 }
 0xd9b   :  { %v1151_v4 = vsel %vm1148_vm14, %v1147_v2, %v1150_v3  ;;  %v3191_v3 = vld [vmem:[%s4756_s3 + $0x18] ss:$0 sm:$0xff] }
 0xd9c   :  { %v1152_v5 = vsel %vm232_vm3, %v1151_v4, 0.0  ;;  %v1165_v6 = vmul.f32 %v1151_v4, %v1151_v4 }
 0xd9d   :  { %1153 = vadd.xlane.f32.xlu0 %v1152_v5 }
 0xd9e   :  { %v1166_v8 = vsel %vm232_vm3, %v1165_v6, 0.0 }
 0xd9f   :  { %1167 = vadd.xlane.f32.xlu1 %v1166_v8 }
 0xe26   :  { %v1154_v9 = vpop.xlane.xlu0 %1153 }
 0xe27   :  { %v1155_v10 = vrot.slane %v1154_v9, 4 }
 0xe28   :  { %v1168_v12 = vpop.xlane.xlu1 %1167 }
 0xe29   :  { %v1156_v13 = vadd.f32 %v1155_v10, %v1154_v9  ;;  %v1169_v14 = vrot.slane %v1168_v12, 4 }
 0xe2b   :  { %v1157_v16 = vrot.slane %v1156_v13, 2  ;;  %v1170_v17 = vadd.f32 %v1169_v14, %v1168_v12 }
 0xe2d   :  { %v1171_v18 = vrot.slane %v1170_v17, 2  ;;  %v1158_v19 = vadd.f32 %v1157_v16, %v1156_v13 }
 0xe2f   :  { %v1159_v20 = vrot.slane %v1158_v19, 1  ;;  %v1172_v21 = vadd.f32 %v1171_v18, %v1170_v17 }
 0xe31   :  { %v1160_v22 = vadd.f32 %v1159_v20, %v1158_v19  ;;  %v1173_v23 = vrot.slane %v1172_v21, 1 }
 0xe33   :  { %3582 = vpush %v1160_v22  ;;  %v1174_v24 = vadd.f32 %v1173_v23, %v1172_v21 }
 0xe35   :  { %3584 = vpush %v1174_v24 }
 0xe64   :  { %s3583_s23 = spop %3582 }
 0xe65   :  { %s1164_s24 = smul.f32 0.0078125, %s3583_s23  ;;  %s4284_s23 = sld [smem:[#allocation3 + $0x6]] }
 0xe66   :  { %s3585_s25 = spop %3584 }
 0xe67   :  { %s1179_s27 = smul.f32 %s1164_s24, %s1164_s24  ;;  %v1186_v30 = vstv %s1164_s24 }
 0xe68   :  { %s1178_s28 = smul.f32 0.0078125, %s3585_s25  ;;  %v1187_v43 = vsub.f32 %v1151_v4, %v1186_v30  ;;  %s4311_s25 = sld [smem:[#allocation3 + $0x7]] }
 0xe6a   :  { %s1180_s29 = ssub.f32 %s1178_s28, %s1179_s27 }
 0xe6b   :  { %v1372_v5 = vstv %s4284_s23 }
 0xe6c   :  { %s1181_s30 = smax.f32 %s3799_s26, %s1180_s29 }
 0xe6d   :  { %s1182_s0 = sadd.f32 1e-05, %s1181_s30 }
 0xe6f   :  { %v1183_v27 = vstv %s1182_s0 }
 0xe70   :  { %3672 = vrsqrt.f32 %v1183_v27 }
 0xe7d   :  { %v3673_v28 = vpop.eup %3672 }
 0xe7e   :  { %3586 = vpush %v3673_v28 }
 0xeaf   :  { %s3587_s12 = spop %3586 }
 0xeb0   :  { %v1188_v34 = vstv %s3587_s12 }
 0xeb1   :  { %v1189_v37 = vmul.f32 %v3166_v29, %v1188_v34  ;;  %v3183_v34 = vld [vmem:[%s4756_s3 + $0x19] sm:$0x1] }
 0xeb3   :  { %v1193_v44 = vrot.slane %v1189_v37, %v3970_v32 }
 0xeb5   :  { %v1194_v47 = vmul.f32 %v1193_v44, %v1187_v43 }
 0xeb7   :  { %v1199_v49 = vadd.f32 %v3175_v46, %v1194_v47 }
 0xeb9   :  { %3418 = vmatmul.mubr.msk.f32.vlgmr.msra.gmra.mxu0 %vm232_vm3, %v1199_v49  ;;  %v3193_v49 = vld [vmem:[%s4756_s3 + $0x1a] ss:$0 sm:$0xff] }
 0xeba   :  { %3429 = vmatprep.mubr.msk.f32.mxu0 %vm3797_vm1, %v3796_v1 }
 0xf79   :  { %v1269_v59 = vpop.f32.mrf.mxu0 }
 0xf7a   :  { %v1273_v11 = vadd.f32 %v1269_v59, %v4198_v48 }
 0xf7b   :  { %v3419_v63 = vpop.f32.mrf.mxu0 }
 0xf7c   :  { %v4278_v2 = vadd.f32 %v3177_v56, %v1273_v11  ;;  %v4306_v11 = vrot.slane %v3179_v52, %v4050_v54  ;;  %v4309_v63 = vrot.slane %v3179_v52, %v3970_v32 }
 0xf7e   :  { %3423 = vmatmul.mubr.msk.f32.vlgmr.msra.gmra.mxu1 %vm375_vm4, %v4278_v2 }
 0xf7f   :  { %3434 = vmatprep.mubr.msk.f32.mxu1 %vm3797_vm1, %v3796_v1 }
0x103e   :  { %v1367_v4 = vpop.f32.mrf.mxu1 }
0x103f   :  { %v1368_v48 = vadd.f32 %v3191_v3, %v1367_v4 }
0x1040   :  { %v3424_v6 = vpop.f32.mrf.mxu1 }
0x1041   :  { %v1373_v8 = vmul.f32 %v1372_v5, %v1368_v48  ;;  %vm1371_vm15 = vcmp.ge.f32.partialorder %v1368_v48, 0.0 }
0x1043   :  { %v1374_v9 = vsel %vm1371_vm15, %v1368_v48, %v1373_v8  ;;  %v4314_v48 = vrot.slane %v3179_v52, %v4053_v55  ;;  %v1451_v55 = vstv %s4311_s25 }
0x1044   :  { %v1375_v10 = vsel %vm232_vm3, %v1374_v9, 0.0  ;;  %v1388_v12 = vmul.f32 %v1374_v9, %v1374_v9 }
0x1045   :  { %1376 = vadd.xlane.f32.xlu0 %v1375_v10 }
0x1046   :  { %v1389_v13 = vsel %vm232_vm3, %v1388_v12, 0.0 }
0x1047   :  { %1390 = vadd.xlane.f32.xlu1 %v1389_v13 }
0x10ce   :  { %v1377_v14 = vpop.xlane.xlu0 %1376 }
0x10cf   :  { %v1378_v16 = vrot.slane %v1377_v14, 4 }
0x10d0   :  { %v1391_v17 = vpop.xlane.xlu1 %1390 }
0x10d1   :  { %v1379_v18 = vadd.f32 %v1378_v16, %v1377_v14  ;;  %v1392_v19 = vrot.slane %v1391_v17, 4  ;;  %v3194_v14 = vld [vmem:[%s4756_s3 + $0x1b] ss:$0 sm:$0xff] }
0x10d3   :  { %v1380_v20 = vrot.slane %v1379_v18, 2  ;;  %v1393_v21 = vadd.f32 %v1392_v19, %v1391_v17 }
0x10d5   :  { %v1394_v22 = vrot.slane %v1393_v21, 2  ;;  %v1381_v23 = vadd.f32 %v1380_v20, %v1379_v18 }
0x10d7   :  { %v1382_v24 = vrot.slane %v1381_v23, 1  ;;  %v1395_v25 = vadd.f32 %v1394_v22, %v1393_v21 }
0x10d9   :  { %v1383_v26 = vadd.f32 %v1382_v24, %v1381_v23  ;;  %v1396_v27 = vrot.slane %v1395_v25, 1  ;;  %v1746_v23 = vrot.slane %v3972_v33, %v4050_v54  ;;  %v4337_v33 = vld [vmem:[%s4755_s2 + $0x78] sm:$0xff]  ;;  %v4344_v54 = vld [vmem:[%s4755_s2 + $0x70] sm:$0xff] }
0x10da   :  { %3426 = vmatpush3.msra.mxu0 %v4337_v33 }
0x10db   :  { %3588 = vpush %v1383_v26  ;;  %v1397_v28 = vadd.f32 %v1396_v27, %v1395_v25  ;;  %3427 = vmatprep.subr.mxu0 %v3796_v1 }
0x10dc   :  { %3428 = vmatpush3.msra.mxu0 %v4344_v54 }
0x10dd   :  { %3590 = vpush %v1397_v28  ;;  %3437 = vmatprep.subr.mxu0 %v3796_v1 }
0x110c   :  { %s3589_s27 = spop %3588 }
0x110d   :  { %s1387_s28 = smul.f32 0.0078125, %s3589_s27 }
0x110e   :  { %s3591_s29 = spop %3590 }
0x110f   :  { %s1402_s30 = smul.f32 %s1387_s28, %s1387_s28  ;;  %v1409_v37 = vstv %s1387_s28 }
0x1110   :  { %s1401_s0 = smul.f32 0.0078125, %s3591_s29  ;;  %v1410_v46 = vsub.f32 %v1374_v9, %v1409_v37 }
0x1112   :  { %s1403_s10 = ssub.f32 %s1401_s0, %s1402_s30 }
0x1114   :  { %s1404_s1 = smax.f32 %s3799_s26, %s1403_s10 }
0x1115   :  { %s1405_s12 = sadd.f32 1e-05, %s1404_s1 }
0x1117   :  { %v1406_v29 = vstv %s1405_s12 }
0x1118   :  { %3674 = vrsqrt.f32 %v1406_v29 }
0x1125   :  { %v3675_v30 = vpop.eup %3674 }
0x1126   :  { %3592 = vpush %v3675_v30 }
0x1157   :  { %s3593_s19 = spop %3592 }
0x1158   :  { %v1411_v43 = vstv %s3593_s19 }
0x1159   :  { %v1412_v44 = vmul.f32 %v3183_v34, %v1411_v43 }
0x115b   :  { %v1416_v47 = vrot.slane %v1412_v44, %v3970_v32 }
0x115d   :  { %v1417_v56 = vmul.f32 %v1416_v47, %v1410_v46 }
0x115f   :  { %v1422_v59 = vadd.f32 %v3193_v49, %v1417_v56 }
0x1161   :  { %v1423_v3 = vrot.slane %v1422_v59, 6  ;;  %v1437_v4 = vrot.slane %v1422_v59, 2  ;;  %v1435_v9 = vmul.f32 %v4306_v11, %v1422_v59  ;;  %v3186_v59 = vld [vmem:[%s4756_s3 + $0x1c] sm:$0x1] }
0x1163   :  { %v1424_v6 = vsel %vm813_vm10, %v1423_v3, 0.0  ;;  %v1438_v8 = vsel %vm832_vm11, %v1437_v4, 0.0 }
0x1164   :  { %v1429_v10 = vmul.f32 %v4309_v63, %v1424_v6  ;;  %v1443_v13 = vmul.f32 %v4314_v48, %v1438_v8 }
0x1166   :  { %v1436_v12 = vadd.f32 %v1435_v9, %v1429_v10  ;;  %v3195_v10 = vld [vmem:[%s4756_s3 + $0x1d] ss:$0 sm:$0xff] }
0x1168   :  { %v1444_v16 = vadd.f32 %v1443_v13, %v1436_v12 }
0x116a   :  { %v1449_v17 = vadd.f32 %v3194_v14, %v1444_v16  ;;  %v4362_v14 = vld [vmem:[%s4757_s4 + $0x90] sm:$0xff]  ;;  %v3197_v16 = vld [vmem:[%s4756_s3 + $0x1e] ss:$0 sm:$0xff] }
0x116b   :  { %3433 = vmatpush3.msra.mxu1 %v4362_v14 }
0x116c   :  { %vm1450_vm0 = vcmp.ge.f32.partialorder %v1449_v17, 0.0  ;;  %v1452_v18 = vmul.f32 %v1451_v55, %v1449_v17  ;;  %3444 = vmatprep.subr.mxu1 %v3796_v1 }
0x116e   :  { %v1453_v19 = vsel %vm1450_vm0, %v1449_v17, %v1452_v18 }
0x116f   :  { %v1454_v20 = vsel %vm232_vm3, %v1453_v19, 0.0  ;;  %v1467_v21 = vmul.f32 %v1453_v19, %v1453_v19 }
0x1170   :  { %1455 = vadd.xlane.f32.xlu0 %v1454_v20 }
0x1171   :  { %v1468_v22 = vsel %vm232_vm3, %v1467_v21, 0.0  ;;  %v3696_v21 = vld [vmem:[%s4757_s4 + $0x78] sm:$0xff] }
0x1172   :  { %1469 = vadd.xlane.f32.xlu1 %v1468_v22  ;;  %v3697_v22 = vld [vmem:[%s4757_s4 + $0x70] sm:$0xff] }
0x1186   :  { %1748 = vrot.lane.b32.xlu0 %v1746_v23, %s3798_s13  ;;  %v3699_v23 = vld [vmem:[%s4757_s4 + $0x60] sm:$0xff] }
0x11f9   :  { %v1456_v24 = vpop.xlane.xlu0 %1455 }
0x11fa   :  { %v1457_v25 = vrot.slane %v1456_v24, 4 }
0x11fb   :  { %v1470_v26 = vpop.xlane.xlu1 %1469 }
0x11fc   :  { %v1458_v27 = vadd.f32 %v1457_v25, %v1456_v24  ;;  %v1471_v28 = vrot.slane %v1470_v26, 4  ;;  %v3700_v24 = vld [vmem:[%s4757_s4 + $0x58] sm:$0xff]  ;;  %v3701_v25 = vld [vmem:[%s4757_s4 + $0x50] sm:$0xff] }
0x11fe   :  { %v1459_v29 = vrot.slane %v1458_v27, 2  ;;  %v1472_v30 = vadd.f32 %v1471_v28, %v1470_v26  ;;  %v3702_v26 = vld [vmem:[%s4757_s4 + $0x48] sm:$0xff]  ;;  %v3704_v28 = vld [vmem:[%s4757_s4 + $0x38] sm:$0xff] }
0x1200   :  { %v1473_v34 = vrot.slane %v1472_v30, 2  ;;  %v1460_v37 = vadd.f32 %v1459_v29, %v1458_v27  ;;  %v3703_v27 = vld [vmem:[%s4757_s4 + $0x40] sm:$0xff]  ;;  %v3705_v29 = vld [vmem:[%s4757_s4 + $0x30] sm:$0xff] }
0x1202   :  { %v1461_v43 = vrot.slane %v1460_v37, 1  ;;  %v1474_v44 = vadd.f32 %v1473_v34, %v1472_v30  ;;  %v3706_v30 = vld [vmem:[%s4757_s4 + $0x28] sm:$0xff]  ;;  %v3707_v34 = vld [vmem:[%s4757_s4 + $0x20] sm:$0xff] }
0x1204   :  { %v1462_v46 = vadd.f32 %v1461_v43, %v1460_v37  ;;  %v1475_v47 = vrot.slane %v1474_v44, 1  ;;  %v3708_v37 = vld [vmem:[%s4757_s4 + $0x18] sm:$0xff]  ;;  %v3709_v43 = vld [vmem:[%s4757_s4 + $0x10] sm:$0xff] }
0x1206   :  { %3594 = vpush %v1462_v46  ;;  %v1476_v49 = vadd.f32 %v1475_v47, %v1474_v44  ;;  %v3710_v44 = vld [vmem:[%s4757_s4 + $0x8] sm:$0xff]  ;;  %v1749_v46 = vpop.permute.xlu0 %1748  ;;  %v3711_v47 = vld [vmem:[%s4757_s4] sm:$0xff] }
0x1208   :  { %3596 = vpush %v1476_v49  ;;  %v44_v49 = vld [vmem:[%s4758_s5 + $0x68] sm:$0xff] }
0x1237   :  { %s3595_s1 = spop %3594 }
0x1238   :  { %s1466_s12 = smul.f32 0.0078125, %s3595_s1 }
0x1239   :  { %s3597_s17 = spop %3596 }
0x123a   :  { %s1481_s18 = smul.f32 %s1466_s12, %s1466_s12  ;;  %v1488_v3 = vstv %s1466_s12 }
0x123b   :  { %s1480_s19 = smul.f32 0.0078125, %s3597_s17  ;;  %v1489_v8 = vsub.f32 %v1453_v19, %v1488_v3 }
0x123d   :  { %s1482_s20 = ssub.f32 %s1480_s19, %s1481_s18 }
0x123f   :  { %s1483_s21 = smax.f32 %s3799_s26, %s1482_s20 }
0x1240   :  { %s1484_s22 = sadd.f32 1e-05, %s1483_s21 }
0x1242   :  { %v1485_v52 = vstv %s1484_s22 }
0x1243   :  { %3676 = vrsqrt.f32 %v1485_v52  ;;  %v43_v52 = vld [vmem:[%s4758_s5 + $0x60] sm:$0xff] }
0x1250   :  { %v3677_v56 = vpop.eup %3676 }
0x1251   :  { %3598 = vpush %v3677_v56 }
0x1282   :  { %s3599_s28 = spop %3598 }
0x1283   :  { %v1490_v4 = vstv %s3599_s28 }
0x1284   :  { %v1491_v6 = vmul.f32 %v3186_v59, %v1490_v4  ;;  %v3712_v4 = vld [vmem:[%s4757_s4 + $0x88] sm:$0xff] }
0x1286   :  { %v1495_v9 = vrot.slane %v1491_v6, %v3970_v32  ;;  %v3713_v6 = vld [vmem:[%s4757_s4 + $0x80] sm:$0xff] }
0x1288   :  { %v1496_v12 = vmul.f32 %v1495_v9, %v1489_v8  ;;  %v3714_v8 = vld [vmem:[%s4759_s6] ss:$0 sm:$0xff] }
0x128a   :  { %v1501_v13 = vadd.f32 %v3195_v10, %v1496_v12 }
0x128c   :  { %3430 = vmatmul.mubr.msk.f32.vlgmr.msra.gmra.mxu0 %vm232_vm3, %v1501_v13 }
0x128d   :  { %3441 = vmatprep.mubr.msk.f32.mxu0 %vm3797_vm1, %v3796_v1  ;;  %3438 = vmatpush3.msra.mxu0 %v44_v49 }
0x128e   :  { %3439 = vmatprep.subr.mxu0 %v3796_v1 }
0x128f   :  { %3440 = vmatpush3.msra.mxu0 %v43_v52 }
0x1290   :  { %3479 = vmatprep.subr.mxu0 %v3796_v1 }
0x134c   :  { %v1571_v17 = vpop.f32.mrf.mxu0 }
0x134d   :  { %v1575_v18 = vadd.f32 %v1571_v17, %v4278_v2  ;;  %v3698_v2 = vld [vmem:[%s4757_s4 + $0x68] sm:$0xff] }
0x134e   :  { %v3431_v19 = vpop.f32.mrf.mxu0 }
0x134f   :  { %v1580_v20 = vadd.f32 %v3197_v16, %v1575_v18 }
0x1351   :  { %3435 = vmatmul.mubr.msk.f32.vlgmr.msra.gmra.mxu1 %vm375_vm4, %v1580_v20 }
0x1352   :  { %3445 = vmatpush3.msra.mxu1 %v3696_v21  ;;  %3476 = vmatprep.mubr.msk.f32.mxu1 %vm3797_vm1, %v3796_v1 }
0x1353   :  { %3446 = vmatprep.subr.mxu1 %v3796_v1 }
0x1354   :  { %3447 = vmatpush3.msra.mxu1 %v3697_v22 }
0x1355   :  { %3448 = vmatprep.subr.mxu1 %v3796_v1 }
0x1356   :  { %3449 = vmatpush3.msra.mxu1 %v3698_v2 }
0x1357   :  { %3450 = vmatprep.subr.mxu1 %v3796_v1 }
0x1358   :  { %3451 = vmatpush3.msra.mxu1 %v3699_v23 }
0x1359   :  { %3452 = vmatprep.subr.mxu1 %v3796_v1 }
0x135a   :  { %3453 = vmatpush3.msra.mxu1 %v3700_v24 }
0x135b   :  { %3454 = vmatprep.subr.mxu1 %v3796_v1 }
0x135c   :  { %3455 = vmatpush3.msra.mxu1 %v3701_v25 }
0x135d   :  { %3456 = vmatprep.subr.mxu1 %v3796_v1 }
0x135e   :  { %3457 = vmatpush3.msra.mxu1 %v3702_v26 }
0x135f   :  { %3458 = vmatprep.subr.mxu1 %v3796_v1 }
0x1360   :  { %3459 = vmatpush3.msra.mxu1 %v3703_v27 }
0x1361   :  { %3460 = vmatprep.subr.mxu1 %v3796_v1 }
0x1362   :  { %3461 = vmatpush3.msra.mxu1 %v3704_v28 }
0x1363   :  { %3462 = vmatprep.subr.mxu1 %v3796_v1 }
0x1364   :  { %3463 = vmatpush3.msra.mxu1 %v3705_v29 }
0x1365   :  { %3464 = vmatprep.subr.mxu1 %v3796_v1 }
0x1366   :  { %3465 = vmatpush3.msra.mxu1 %v3706_v30 }
0x1367   :  { %3466 = vmatprep.subr.mxu1 %v3796_v1 }
0x1368   :  { %3467 = vmatpush3.msra.mxu1 %v3707_v34 }
0x1369   :  { %3468 = vmatprep.subr.mxu1 %v3796_v1 }
0x136a   :  { %3469 = vmatpush3.msra.mxu1 %v3708_v37 }
0x136b   :  { %3470 = vmatprep.subr.mxu1 %v3796_v1 }
0x136c   :  { %3471 = vmatpush3.msra.mxu1 %v3709_v43 }
0x136d   :  { %3472 = vmatprep.subr.mxu1 %v3796_v1 }
0x136e   :  { %3473 = vmatpush3.msra.mxu1 %v3710_v44 }
0x136f   :  { %3474 = vmatprep.subr.mxu1 %v3796_v1 }
0x1370   :  { %3475 = vmatpush3.msra.mxu1 %v3711_v47  ;;  %v3715_v47 = vld [vmem:[%s4759_s6 + $0x1] sm:$0x1] }
0x1371   :  { %3477 = vmatmul.mubr.f32.vlgmr.msra.gmra.mxu1 %v1749_v46  ;;  %3527 = vmatprep.subr.mxu1 %v3796_v1 }
0x1372   :  { %3528 = vmatpush3.msra.mxu1 %v4337_v33  ;;  %3531 = vmatprep.mubr.msk.f32.mxu1 %vm3797_vm1, %v3796_v1  ;;  %v3198_v33 = vld [vmem:[%s4759_s6 + $0x4] ss:$0 sm:$0xff] }
0x1373   :  { %3529 = vmatprep.subr.mxu1 %v3796_v1 }
0x1374   :  { %3530 = vmatpush3.msra.mxu1 %v4344_v54 }
0x1375   :  { %3539 = vmatprep.subr.mxu1 %v3796_v1 }
0x1411   :  { %v1654_v54 = vpop.f32.mrf.mxu1 }
0x1412   :  { %v1655_v56 = vadd.f32 %v3198_v33, %v1654_v54 }
0x1413   :  { %v3436_v59 = vpop.f32.mrf.mxu1 }
0x1414   :  { %v1658_v3 = vmul.f32 %v1655_v56, %v3982_v39  ;;  %v3716_v56 = vld [vmem:[%s4759_s6 + $0x2] ss:$0 sm:$0xff] }
0x1416   :  { %3442 = vmatmul.mubr.msk.f32.vlgmr.msra.gmra.mxu0 %vm232_vm3, %v1658_v3  ;;  %v3717_v3 = vld [vmem:[%s4755_s2] sm:$0xff] }
0x1417   :  { %3480 = vmatpush3.msra.mxu0 %v3712_v4  ;;  %3483 = vmatprep.mubr.msk.f32.mxu0 %vm3797_vm1, %v3796_v1 }
0x1418   :  { %3481 = vmatprep.subr.mxu0 %v3796_v1 }
0x1419   :  { %3482 = vmatpush3.msra.mxu0 %v3713_v6  ;;  %v3718_v6 = vld [vmem:[%s4759_s6 + $0x3] ss:$0 sm:$0xff] }
0x141a   :  { %3486 = vmatprep.subr.mxu0 %v3796_v1 }
0x1431   :  { %v1816_v39 = vpop.f32.mrf.mxu1 }
0x1432   :  { %v4469_v9 = vadd.f32 %v3714_v8, %v1816_v39 }
0x1433   :  { %v3478_v10 = vpop.f32.mrf.mxu1 }
0x1434   :  { %v1820_v12 = vsel %vm232_vm3, %v4469_v9, 0.0  ;;  %v1833_v13 = vmul.f32 %v4469_v9, %v4469_v9  ;;  %v3719_v10 = vld [vmem:[%s4755_s2 + $0x18] sm:$0xff] }
0x1435   :  { %1821 = vadd.xlane.f32.xlu1 %v1820_v12  ;;  %v3720_v12 = vld [vmem:[%s4755_s2 + $0x10] sm:$0xff] }
0x1436   :  { %v1834_v16 = vsel %vm232_vm3, %v1833_v13, 0.0 }
0x1439   :  { %1835 = vadd.xlane.f32.xlu1 %v1834_v16  ;;  %v3721_v16 = vld [vmem:[%s4756_s3] ss:$0 sm:$0xff] }
0x14be   :  { %v1822_v17 = vpop.xlane.xlu1 %1821 }
0x14bf   :  { %v1823_v18 = vrot.slane %v1822_v17, 4 }
0x14c1   :  { %v1824_v19 = vadd.f32 %v1823_v18, %v1822_v17 }
0x14c2   :  { %v1836_v20 = vpop.xlane.xlu1 %1835 }
0x14c3   :  { %v1825_v21 = vrot.slane %v1824_v19, 2  ;;  %v1837_v22 = vrot.slane %v1836_v20, 4 }
0x14c5   :  { %v1838_v2 = vadd.f32 %v1837_v22, %v1836_v20  ;;  %v1826_v23 = vadd.f32 %v1825_v21, %v1824_v19 }
0x14c7   :  { %v1839_v24 = vrot.slane %v1838_v2, 2  ;;  %v1827_v25 = vrot.slane %v1826_v23, 1 }
0x14c9   :  { %v1828_v26 = vadd.f32 %v1827_v25, %v1826_v23  ;;  %v1840_v27 = vadd.f32 %v1839_v24, %v1838_v2 }
0x14cb   :  { %3600 = vpush %v1828_v26  ;;  %v1841_v28 = vrot.slane %v1840_v27, 1 }
0x14cd   :  { %v1842_v29 = vadd.f32 %v1841_v28, %v1840_v27 }
0x14cf   :  { %3602 = vpush %v1842_v29 }
0x14d6   :  { %v4476_v30 = vpop.f32.mrf.mxu0 }
0x14d8   :  { %v3443_v34 = vpop.f32.mrf.mxu0 }
0x14fc   :  { %s3601_s4 = spop %3600 }
0x14fd   :  { %s1832_s12 = smul.f32 0.0078125, %s3601_s4 }
0x14ff   :  { %s1847_s17 = smul.f32 %s1832_s12, %s1832_s12  ;;  %v1854_v44 = vstv %s1832_s12 }
0x1500   :  { %s3603_s18 = spop %3602  ;;  %v1855_v52 = vsub.f32 %v4469_v9, %v1854_v44 }
0x1501   :  { %s1846_s19 = smul.f32 0.0078125, %s3603_s18 }
0x1503   :  { %s1848_s20 = ssub.f32 %s1846_s19, %s1847_s17 }
0x1505   :  { %s1849_s21 = smax.f32 %s3799_s26, %s1848_s20 }
0x1506   :  { %s1850_s22 = sadd.f32 1e-05, %s1849_s21 }
0x1508   :  { %v1851_v37 = vstv %s1850_s22 }
0x1509   :  { %3678 = vrsqrt.f32 %v1851_v37 }
0x1516   :  { %v3679_v43 = vpop.eup %3678 }
0x1517   :  { %3604 = vpush %v3679_v43 }
0x1548   :  { %s3605_s24 = spop %3604 }
0x1549   :  { %v1856_v46 = vstv %s3605_s24 }
0x154a   :  { %v1857_v49 = vmul.f32 %v3715_v47, %v1856_v46 }
0x154c   :  { %v1861_v33 = vrot.slane %v1857_v49, %v3970_v32 }
0x154e   :  { %v1862_v54 = vmul.f32 %v1861_v33, %v1855_v52 }
0x1550   :  { %v1863_v59 = vadd.f32 %v3716_v56, %v1862_v54  ;;  %v3722_v56 = vld [vmem:[%s4756_s3 + $0x1] sm:$0x1] }
0x1552   :  { %3484 = vmatmul.mubr.msk.f32.vlgmr.msra.gmra.mxu0 %vm232_vm3, %v1863_v59 }
0x1553   :  { %3487 = vmatpush3.msra.mxu0 %v3717_v3  ;;  %3488 = vmatprep.mubr.msk.f32.mxu0 %vm3797_vm1, %v3796_v1 }
0x1554   :  { %3491 = vmatprep.subr.mxu0 %v3796_v1 }
0x1612   :  { %v1933_v4 = vpop.f32.mrf.mxu0 }
0x1613   :  { %v4497_v39 = vadd.f32 %v3718_v6, %v1933_v4 }
0x1614   :  { %v3485_v8 = vpop.f32.mrf.mxu0 }
0x1615   :  { %3489 = vmatmul.mubr.msk.f32.vlgmr.msra.gmra.mxu0 %vm375_vm4, %v4497_v39  ;;  %v3723_v8 = vld [vmem:[%s4756_s3 + $0x2] ss:$0 sm:$0xff] }
0x1616   :  { %3492 = vmatpush3.msra.mxu0 %v3719_v10  ;;  %3495 = vmatprep.mubr.msk.f32.mxu0 %vm3797_vm1, %v3796_v1 }
0x1617   :  { %3493 = vmatprep.subr.mxu0 %v3796_v1 }
0x1618   :  { %3494 = vmatpush3.msra.mxu0 %v3720_v12 }
0x1619   :  { %3498 = vmatprep.subr.mxu0 %v3796_v1 }
0x16d5   :  { %v2006_v13 = vpop.f32.mrf.mxu0 }
0x16d6   :  { %v2007_v17 = vadd.f32 %v3721_v16, %v2006_v13 }
0x16d7   :  { %v3490_v18 = vpop.f32.mrf.mxu0 }
0x16d8   :  { %v2011_v19 = vmul.f32 %v2007_v17, %v450_v15  ;;  %vm2010_vm2 = vcmp.ge.f32.partialorder %v2007_v17, 0.0 }
0x16da   :  { %v2012_v20 = vsel %vm2010_vm2, %v2007_v17, %v2011_v19 }
0x16db   :  { %v2013_v21 = vsel %vm232_vm3, %v2012_v20, 0.0  ;;  %v2026_v22 = vmul.f32 %v2012_v20, %v2012_v20 }
0x16dc   :  { %2014 = vadd.xlane.f32.xlu1 %v2013_v21 }
0x16dd   :  { %v2027_v2 = vsel %vm232_vm3, %v2026_v22, 0.0 }
0x16e0   :  { %2028 = vadd.xlane.f32.xlu1 %v2027_v2  ;;  %v3724_v2 = vld [vmem:[%s4756_s3 + $0x3] ss:$0 sm:$0xff] }
0x1765   :  { %v2015_v23 = vpop.xlane.xlu1 %2014 }
0x1766   :  { %v2016_v24 = vrot.slane %v2015_v23, 4 }
0x1768   :  { %v2017_v25 = vadd.f32 %v2016_v24, %v2015_v23 }
0x1769   :  { %v2029_v26 = vpop.xlane.xlu1 %2028 }
0x176a   :  { %v2018_v27 = vrot.slane %v2017_v25, 2  ;;  %v2030_v28 = vrot.slane %v2029_v26, 4 }
0x176c   :  { %v2031_v29 = vadd.f32 %v2030_v28, %v2029_v26  ;;  %v2019_v34 = vadd.f32 %v2018_v27, %v2017_v25 }
0x176e   :  { %v2032_v37 = vrot.slane %v2031_v29, 2  ;;  %v2020_v43 = vrot.slane %v2019_v34, 1 }
0x1770   :  { %v2021_v15 = vadd.f32 %v2020_v43, %v2019_v34  ;;  %v2033_v44 = vadd.f32 %v2032_v37, %v2031_v29 }
0x1772   :  { %3606 = vpush %v2021_v15  ;;  %v2034_v46 = vrot.slane %v2033_v44, 1 }
0x1774   :  { %v2035_v47 = vadd.f32 %v2034_v46, %v2033_v44 }
0x1776   :  { %3608 = vpush %v2035_v47 }
0x17a3   :  { %s3607_s14 = spop %3606 }
0x17a4   :  { %s2025_s22 = smul.f32 0.0078125, %s3607_s14 }
0x17a6   :  { %s2040_s24 = smul.f32 %s2025_s22, %s2025_s22  ;;  %v2047_v33 = vstv %s2025_s22 }
0x17a7   :  { %s3609_s27 = spop %3608  ;;  %v2048_v3 = vsub.f32 %v2012_v20, %v2047_v33 }
0x17a8   :  { %s2039_s28 = smul.f32 0.0078125, %s3609_s27 }
0x17aa   :  { %s2041_s29 = ssub.f32 %s2039_s28, %s2040_s24 }
0x17ac   :  { %s2042_s30 = smax.f32 %s3799_s26, %s2041_s29 }
0x17ad   :  { %s2043_s0 = sadd.f32 1e-05, %s2042_s30 }
0x17af   :  { %v2044_v49 = vstv %s2043_s0 }
0x17b0   :  { %3680 = vrsqrt.f32 %v2044_v49 }
0x17bd   :  { %v3681_v52 = vpop.eup %3680 }
0x17be   :  { %3610 = vpush %v3681_v52 }
0x17ef   :  { %s3611_s10 = spop %3610 }
0x17f0   :  { %v2049_v54 = vstv %s3611_s10 }
0x17f1   :  { %v2050_v59 = vmul.f32 %v3722_v56, %v2049_v54 }
0x17f3   :  { %v2054_v4 = vrot.slane %v2050_v59, %v3970_v32 }
0x17f5   :  { %v2055_v6 = vmul.f32 %v2054_v4, %v2048_v3  ;;  %v3725_v3 = vld [vmem:[%s4756_s3 + $0x4] sm:$0x1] }
0x17f7   :  { %v2056_v10 = vadd.f32 %v3723_v8, %v2055_v6 }
0x17f9   :  { %v2057_v12 = vrot.slane %v2056_v10, 7  ;;  %v2063_v13 = vrot.slane %v2056_v10, 1  ;;  %v2061_v18 = vmul.f32 %v2056_v10, %v4057_v57 }
0x17fb   :  { %v2058_v16 = vsel %vm503_vm6, %v2057_v12, 0.0  ;;  %v2064_v17 = vsel %vm522_vm7, %v2063_v13, 0.0  ;;  %v3726_v12 = vld [vmem:[%s4756_s3 + $0x5] ss:$0 sm:$0xff] }
0x17fc   :  { %v2059_v19 = vmul.f32 %v2058_v16, %v4060_v58  ;;  %v2065_v21 = vmul.f32 %v2064_v17, %v4066_v61  ;;  %v3727_v16 = vld [vmem:[%s4755_s2 + $0x20] sm:$0xff] }
0x17fe   :  { %v2062_v20 = vadd.f32 %v2061_v18, %v2059_v19 }
0x1800   :  { %v2066_v22 = vadd.f32 %v2065_v21, %v2062_v20  ;;  %v3728_v20 = vld [vmem:[%s4756_s3 + $0x6] ss:$0 sm:$0xff] }
0x1802   :  { %v2067_v23 = vadd.f32 %v3724_v2, %v2066_v22  ;;  %v3729_v22 = vld [vmem:[%s4755_s2 + $0x38] sm:$0xff] }
0x1804   :  { %vm2068_vm5 = vcmp.ge.f32.partialorder %v2067_v23, 0.0  ;;  %v2069_v24 = vmul.f32 %v2067_v23, %v537_v7 }
0x1806   :  { %v2070_v25 = vsel %vm2068_vm5, %v2067_v23, %v2069_v24  ;;  %v3731_v23 = vld [vmem:[%s4756_s3 + $0x8] ss:$0 sm:$0xff] }
0x1807   :  { %v2071_v26 = vsel %vm232_vm3, %v2070_v25, 0.0  ;;  %v2084_v27 = vmul.f32 %v2070_v25, %v2070_v25 }
0x1808   :  { %2072 = vadd.xlane.f32.xlu1 %v2071_v26 }
0x1809   :  { %v2085_v57 = vsel %vm232_vm3, %v2084_v27, 0.0 }
0x180c   :  { %2086 = vadd.xlane.f32.xlu1 %v2085_v57 }
0x1891   :  { %v2073_v58 = vpop.xlane.xlu1 %2072 }
0x1892   :  { %v2074_v28 = vrot.slane %v2073_v58, 4 }
0x1894   :  { %v2075_v61 = vadd.f32 %v2074_v28, %v2073_v58 }
0x1895   :  { %v2087_v29 = vpop.xlane.xlu1 %2086 }
0x1896   :  { %v2076_v34 = vrot.slane %v2075_v61, 2  ;;  %v2088_v37 = vrot.slane %v2087_v29, 4 }
0x1898   :  { %v2089_v43 = vadd.f32 %v2088_v37, %v2087_v29  ;;  %v2077_v15 = vadd.f32 %v2076_v34, %v2075_v61 }
0x189a   :  { %v2090_v44 = vrot.slane %v2089_v43, 2  ;;  %v2078_v46 = vrot.slane %v2077_v15, 1 }
0x189c   :  { %v2079_v47 = vadd.f32 %v2078_v46, %v2077_v15  ;;  %v2091_v7 = vadd.f32 %v2090_v44, %v2089_v43 }
0x189e   :  { %3612 = vpush %v2079_v47  ;;  %v2092_v49 = vrot.slane %v2091_v7, 1 }
0x18a0   :  { %v2093_v52 = vadd.f32 %v2092_v49, %v2091_v7 }
0x18a2   :  { %3614 = vpush %v2093_v52 }
0x18cf   :  { %s3613_s9 = spop %3612 }
0x18d0   :  { %s2083_s20 = smul.f32 0.0078125, %s3613_s9 }
0x18d2   :  { %s2098_s21 = smul.f32 %s2083_s20, %s2083_s20  ;;  %v2105_v56 = vstv %s2083_s20 }
0x18d3   :  { %s3615_s14 = spop %3614  ;;  %v2106_v6 = vsub.f32 %v2070_v25, %v2105_v56 }
0x18d4   :  { %s2097_s22 = smul.f32 0.0078125, %s3615_s14 }
0x18d6   :  { %s2099_s24 = ssub.f32 %s2097_s22, %s2098_s21 }
0x18d8   :  { %s2100_s27 = smax.f32 %s3799_s26, %s2099_s24 }
0x18d9   :  { %s2101_s28 = sadd.f32 1e-05, %s2100_s27 }
0x18db   :  { %v2102_v33 = vstv %s2101_s28 }
0x18dc   :  { %3682 = vrsqrt.f32 %v2102_v33 }
0x18e9   :  { %v3683_v54 = vpop.eup %3682 }
0x18ea   :  { %3616 = vpush %v3683_v54 }
0x191b   :  { %s3617_s29 = spop %3616 }
0x191c   :  { %v2107_v59 = vstv %s3617_s29 }
0x191d   :  { %v2108_v4 = vmul.f32 %v3725_v3, %v2107_v59 }
0x191f   :  { %v2112_v8 = vrot.slane %v2108_v4, %v3970_v32  ;;  %v3732_v4 = vld [vmem:[%s4756_s3 + $0x9] sm:$0x1] }
0x1921   :  { %v2113_v10 = vmul.f32 %v2112_v8, %v2106_v6 }
0x1923   :  { %v2114_v13 = vadd.f32 %v3726_v12, %v2113_v10 }
0x1925   :  { %3496 = vmatmul.mubr.msk.f32.vlgmr.msra.gmra.mxu0 %vm232_vm3, %v2114_v13  ;;  %v3733_v13 = vld [vmem:[%s4756_s3 + $0xa] ss:$0 sm:$0xff] }
0x1926   :  { %3499 = vmatpush3.msra.mxu0 %v3727_v16  ;;  %3500 = vmatprep.mubr.msk.f32.mxu0 %vm3797_vm1, %v3796_v1 }
0x1927   :  { %3503 = vmatprep.subr.mxu0 %v3796_v1 }
0x19e5   :  { %v2184_v17 = vpop.f32.mrf.mxu0 }
0x19e6   :  { %v2188_v18 = vadd.f32 %v2184_v17, %v4497_v39  ;;  %v3730_v39 = vld [vmem:[%s4755_s2 + $0x30] sm:$0xff] }
0x19e7   :  { %v3497_v19 = vpop.f32.mrf.mxu0 }
0x19e8   :  { %v4559_v21 = vadd.f32 %v3728_v20, %v2188_v18 }
0x19ea   :  { %3501 = vmatmul.mubr.msk.f32.vlgmr.msra.gmra.mxu0 %vm375_vm4, %v4559_v21 }
0x19eb   :  { %3504 = vmatpush3.msra.mxu0 %v3729_v22  ;;  %3507 = vmatprep.mubr.msk.f32.mxu0 %vm3797_vm1, %v3796_v1 }
0x19ec   :  { %3505 = vmatprep.subr.mxu0 %v3796_v1 }
0x19ed   :  { %3506 = vmatpush3.msra.mxu0 %v3730_v39 }
0x19ee   :  { %3510 = vmatprep.subr.mxu0 %v3796_v1 }
0x1aaa   :  { %v2259_v2 = vpop.f32.mrf.mxu0 }
0x1aab   :  { %v2260_v24 = vadd.f32 %v3731_v23, %v2259_v2 }
0x1aac   :  { %v3502_v25 = vpop.f32.mrf.mxu0 }
0x1aad   :  { %v2264_v26 = vmul.f32 %v2260_v24, %v760_v62  ;;  %vm2263_vm8 = vcmp.ge.f32.partialorder %v2260_v24, 0.0  ;;  %v3734_v25 = vld [vmem:[%s4756_s3 + $0xb] ss:$0 sm:$0xff] }
0x1aaf   :  { %v2265_v27 = vsel %vm2263_vm8, %v2260_v24, %v2264_v26 }
0x1ab0   :  { %v2266_v57 = vsel %vm232_vm3, %v2265_v27, 0.0  ;;  %v2279_v58 = vmul.f32 %v2265_v27, %v2265_v27 }
0x1ab1   :  { %2267 = vadd.xlane.f32.xlu0 %v2266_v57 }
0x1ab2   :  { %v2280_v28 = vsel %vm232_vm3, %v2279_v58, 0.0 }
0x1ab3   :  { %2281 = vadd.xlane.f32.xlu1 %v2280_v28 }
0x1b3a   :  { %v2268_v61 = vpop.xlane.xlu0 %2267 }
0x1b3b   :  { %v2269_v29 = vrot.slane %v2268_v61, 4 }
0x1b3c   :  { %v2282_v34 = vpop.xlane.xlu1 %2281 }
0x1b3d   :  { %v2270_v37 = vadd.f32 %v2269_v29, %v2268_v61  ;;  %v2283_v43 = vrot.slane %v2282_v34, 4 }
0x1b3f   :  { %v2271_v15 = vrot.slane %v2270_v37, 2  ;;  %v2284_v44 = vadd.f32 %v2283_v43, %v2282_v34 }
0x1b41   :  { %v2285_v46 = vrot.slane %v2284_v44, 2  ;;  %v2272_v47 = vadd.f32 %v2271_v15, %v2270_v37 }
0x1b43   :  { %v2273_v7 = vrot.slane %v2272_v47, 1  ;;  %v2286_v62 = vadd.f32 %v2285_v46, %v2284_v44 }
0x1b45   :  { %v2274_v49 = vadd.f32 %v2273_v7, %v2272_v47  ;;  %v2287_v52 = vrot.slane %v2286_v62, 1 }
0x1b47   :  { %3618 = vpush %v2274_v49  ;;  %v2288_v33 = vadd.f32 %v2287_v52, %v2286_v62 }
0x1b49   :  { %3620 = vpush %v2288_v33 }
0x1b78   :  { %s3619_s11 = spop %3618 }
0x1b79   :  { %s2278_s24 = smul.f32 0.0078125, %s3619_s11 }
0x1b7a   :  { %s3621_s27 = spop %3620 }
0x1b7b   :  { %s2293_s28 = smul.f32 %s2278_s24, %s2278_s24  ;;  %v2300_v59 = vstv %s2278_s24 }
0x1b7c   :  { %s2292_s29 = smul.f32 0.0078125, %s3621_s27  ;;  %v2301_v8 = vsub.f32 %v2265_v27, %v2300_v59 }
0x1b7e   :  { %s2294_s30 = ssub.f32 %s2292_s29, %s2293_s28 }
0x1b80   :  { %s2295_s0 = smax.f32 %s3799_s26, %s2294_s30 }
0x1b81   :  { %s2296_s10 = sadd.f32 1e-05, %s2295_s0 }
0x1b83   :  { %v2297_v54 = vstv %s2296_s10 }
0x1b84   :  { %3684 = vrsqrt.f32 %v2297_v54 }
0x1b91   :  { %v3685_v56 = vpop.eup %3684 }
0x1b92   :  { %3622 = vpush %v3685_v56  ;;  %v3735_v56 = vld [vmem:[%s4756_s3 + $0xc] sm:$0x1] }
0x1bc3   :  { %s3623_s1 = spop %3622 }
0x1bc4   :  { %v2302_v3 = vstv %s3623_s1 }
0x1bc5   :  { %v2303_v6 = vmul.f32 %v3732_v4, %v2302_v3 }
0x1bc7   :  { %v2307_v10 = vrot.slane %v2303_v6, %v3970_v32 }
0x1bc9   :  { %v2308_v12 = vmul.f32 %v2307_v10, %v2301_v8  ;;  %v3736_v8 = vld [vmem:[%s4756_s3 + $0xd] ss:$0 sm:$0xff] }
0x1bcb   :  { %v2309_v16 = vadd.f32 %v3733_v13, %v2308_v12  ;;  %v3737_v12 = vld [vmem:[%s4755_s2 + $0x40] sm:$0xff] }
0x1bcd   :  { %v2310_v17 = vrot.slane %v2309_v16, 6  ;;  %v2316_v18 = vrot.slane %v2309_v16, 2  ;;  %v2314_v22 = vmul.f32 %v2309_v16, %v4145_v41 }
0x1bcf   :  { %v2311_v19 = vsel %vm813_vm10, %v2310_v17, 0.0  ;;  %v2317_v20 = vsel %vm832_vm11, %v2316_v18, 0.0  ;;  %v3738_v18 = vld [vmem:[%s4756_s3 + $0xe] ss:$0 sm:$0xff] }
0x1bd0   :  { %v2312_v39 = vmul.f32 %v2311_v19, %v4148_v42  ;;  %v2318_v23 = vmul.f32 %v2317_v20, %v4154_v31  ;;  %v3739_v20 = vld [vmem:[%s4755_s2 + $0x58] sm:$0xff] }
0x1bd2   :  { %v2315_v2 = vadd.f32 %v2314_v22, %v2312_v39  ;;  %v3741_v39 = vld [vmem:[%s4756_s3 + $0x10] ss:$0 sm:$0xff] }
0x1bd4   :  { %v2319_v24 = vadd.f32 %v2318_v23, %v2315_v2 }
0x1bd6   :  { %v2320_v26 = vadd.f32 %v3734_v25, %v2319_v24 }
0x1bd8   :  { %vm2321_vm9 = vcmp.ge.f32.partialorder %v2320_v26, 0.0  ;;  %v2322_v27 = vmul.f32 %v2320_v26, %v847_v60 }
0x1bda   :  { %v2323_v57 = vsel %vm2321_vm9, %v2320_v26, %v2322_v27 }
0x1bdb   :  { %v2324_v58 = vsel %vm232_vm3, %v2323_v57, 0.0  ;;  %v2337_v28 = vmul.f32 %v2323_v57, %v2323_v57 }
0x1bdc   :  { %2325 = vadd.xlane.f32.xlu1 %v2324_v58 }
0x1bdd   :  { %v2338_v41 = vsel %vm232_vm3, %v2337_v28, 0.0 }
0x1be0   :  { %2339 = vadd.xlane.f32.xlu1 %v2338_v41 }
0x1c65   :  { %v2326_v42 = vpop.xlane.xlu1 %2325 }
0x1c66   :  { %v2327_v61 = vrot.slane %v2326_v42, 4 }
0x1c68   :  { %v2328_v31 = vadd.f32 %v2327_v61, %v2326_v42 }
0x1c69   :  { %v2340_v29 = vpop.xlane.xlu1 %2339 }
0x1c6a   :  { %v2329_v34 = vrot.slane %v2328_v31, 2  ;;  %v2341_v37 = vrot.slane %v2340_v29, 4 }
0x1c6c   :  { %v2342_v43 = vadd.f32 %v2341_v37, %v2340_v29  ;;  %v2330_v15 = vadd.f32 %v2329_v34, %v2328_v31 }
0x1c6e   :  { %v2343_v44 = vrot.slane %v2342_v43, 2  ;;  %v2331_v46 = vrot.slane %v2330_v15, 1 }
0x1c70   :  { %v2332_v47 = vadd.f32 %v2331_v46, %v2330_v15  ;;  %v2344_v60 = vadd.f32 %v2343_v44, %v2342_v43 }
0x1c72   :  { %3624 = vpush %v2332_v47  ;;  %v2345_v7 = vrot.slane %v2344_v60, 1 }
0x1c74   :  { %v2346_v62 = vadd.f32 %v2345_v7, %v2344_v60 }
0x1c76   :  { %3626 = vpush %v2346_v62 }
0x1ca3   :  { %s3625_s8 = spop %3624 }
0x1ca4   :  { %s2336_s20 = smul.f32 0.0078125, %s3625_s8 }
0x1ca6   :  { %s2351_s21 = smul.f32 %s2336_s20, %s2336_s20  ;;  %v2358_v33 = vstv %s2336_s20 }
0x1ca7   :  { %s3627_s14 = spop %3626  ;;  %v2359_v3 = vsub.f32 %v2323_v57, %v2358_v33 }
0x1ca8   :  { %s2350_s22 = smul.f32 0.0078125, %s3627_s14 }
0x1caa   :  { %s2352_s11 = ssub.f32 %s2350_s22, %s2351_s21 }
0x1cac   :  { %s2353_s24 = smax.f32 %s3799_s26, %s2352_s11 }
0x1cad   :  { %s2354_s27 = sadd.f32 1e-05, %s2353_s24 }
0x1caf   :  { %v2355_v49 = vstv %s2354_s27 }
0x1cb0   :  { %3686 = vrsqrt.f32 %v2355_v49  ;;  %v3742_v49 = vld [vmem:[%s4756_s3 + $0x11] sm:$0x1] }
0x1cbd   :  { %v3687_v52 = vpop.eup %3686 }
0x1cbe   :  { %3628 = vpush %v3687_v52 }
0x1cef   :  { %s3629_s28 = spop %3628 }
0x1cf0   :  { %v2360_v54 = vstv %s3629_s28 }
0x1cf1   :  { %v2361_v59 = vmul.f32 %v3735_v56, %v2360_v54 }
0x1cf3   :  { %v2365_v4 = vrot.slane %v2361_v59, %v3970_v32  ;;  %v3743_v59 = vld [vmem:[%s4756_s3 + $0x12] ss:$0 sm:$0xff] }
0x1cf5   :  { %v2366_v6 = vmul.f32 %v2365_v4, %v2359_v3 }
0x1cf7   :  { %v2367_v10 = vadd.f32 %v3736_v8, %v2366_v6 }
0x1cf9   :  { %3508 = vmatmul.mubr.msk.f32.vlgmr.msra.gmra.mxu0 %vm232_vm3, %v2367_v10 }
0x1cfa   :  { %3511 = vmatpush3.msra.mxu0 %v3737_v12  ;;  %3512 = vmatprep.mubr.msk.f32.mxu0 %vm3797_vm1, %v3796_v1 }
0x1cfb   :  { %3515 = vmatprep.subr.mxu0 %v3796_v1 }
0x1db9   :  { %v2437_v13 = vpop.f32.mrf.mxu0 }
0x1dba   :  { %v2441_v16 = vadd.f32 %v2437_v13, %v4559_v21  ;;  %v3740_v21 = vld [vmem:[%s4755_s2 + $0x50] sm:$0xff] }
0x1dbb   :  { %v3509_v17 = vpop.f32.mrf.mxu0 }
0x1dbc   :  { %v4621_v19 = vadd.f32 %v3738_v18, %v2441_v16 }
0x1dbe   :  { %3513 = vmatmul.mubr.msk.f32.vlgmr.msra.gmra.mxu0 %vm375_vm4, %v4621_v19 }
0x1dbf   :  { %3516 = vmatpush3.msra.mxu0 %v3739_v20  ;;  %3519 = vmatprep.mubr.msk.f32.mxu0 %vm3797_vm1, %v3796_v1  ;;  %v3744_v20 = vld [vmem:[%s4756_s3 + $0x13] ss:$0 sm:$0xff] }
0x1dc0   :  { %3517 = vmatprep.subr.mxu0 %v3796_v1 }
0x1dc1   :  { %3518 = vmatpush3.msra.mxu0 %v3740_v21 }
0x1dc2   :  { %3522 = vmatprep.subr.mxu0 %v3796_v1 }
0x1e7e   :  { %v2512_v22 = vpop.f32.mrf.mxu0 }
0x1e7f   :  { %v2513_v2 = vadd.f32 %v3741_v39, %v2512_v22 }
0x1e80   :  { %v3514_v23 = vpop.f32.mrf.mxu0 }
0x1e81   :  { %v2517_v24 = vmul.f32 %v2513_v2, %v1070_v53  ;;  %vm2516_vm12 = vcmp.ge.f32.partialorder %v2513_v2, 0.0 }
0x1e83   :  { %v2518_v25 = vsel %vm2516_vm12, %v2513_v2, %v2517_v24 }
0x1e84   :  { %v2519_v26 = vsel %vm232_vm3, %v2518_v25, 0.0  ;;  %v2532_v27 = vmul.f32 %v2518_v25, %v2518_v25 }
0x1e85   :  { %2520 = vadd.xlane.f32.xlu1 %v2519_v26 }
0x1e86   :  { %v2533_v57 = vsel %vm232_vm3, %v2532_v27, 0.0 }
0x1e89   :  { %2534 = vadd.xlane.f32.xlu1 %v2533_v57 }
0x1f0e   :  { %v2521_v58 = vpop.xlane.xlu1 %2520 }
0x1f0f   :  { %v2522_v28 = vrot.slane %v2521_v58, 4 }
0x1f11   :  { %v2523_v41 = vadd.f32 %v2522_v28, %v2521_v58 }
0x1f12   :  { %v2535_v42 = vpop.xlane.xlu1 %2534 }
0x1f13   :  { %v2524_v61 = vrot.slane %v2523_v41, 2  ;;  %v2536_v31 = vrot.slane %v2535_v42, 4 }
0x1f15   :  { %v2537_v29 = vadd.f32 %v2536_v31, %v2535_v42  ;;  %v2525_v34 = vadd.f32 %v2524_v61, %v2523_v41 }
0x1f17   :  { %v2538_v37 = vrot.slane %v2537_v29, 2  ;;  %v2526_v43 = vrot.slane %v2525_v34, 1 }
0x1f19   :  { %v2527_v53 = vadd.f32 %v2526_v43, %v2525_v34  ;;  %v2539_v15 = vadd.f32 %v2538_v37, %v2537_v29  ;;  %v3745_v37 = vld [vmem:[%s4756_s3 + $0x14] sm:$0x1] }
0x1f1b   :  { %3630 = vpush %v2527_v53  ;;  %v2540_v44 = vrot.slane %v2539_v15, 1 }
0x1f1d   :  { %v2541_v46 = vadd.f32 %v2540_v44, %v2539_v15 }
0x1f1f   :  { %3632 = vpush %v2541_v46  ;;  %v3746_v46 = vld [vmem:[%s4756_s3 + $0x15] ss:$0 sm:$0xff] }
0x1f4c   :  { %s3631_s16 = spop %3630 }
0x1f4d   :  { %s2531_s14 = smul.f32 0.0078125, %s3631_s16 }
0x1f4f   :  { %s2546_s22 = smul.f32 %s2531_s14, %s2531_s14  ;;  %v2553_v7 = vstv %s2531_s14 }
0x1f50   :  { %s3633_s11 = spop %3632  ;;  %v2554_v33 = vsub.f32 %v2518_v25, %v2553_v7 }
0x1f51   :  { %s2545_s24 = smul.f32 0.0078125, %s3633_s11 }
0x1f53   :  { %s2547_s27 = ssub.f32 %s2545_s24, %s2546_s22 }
0x1f55   :  { %s2548_s28 = smax.f32 %s3799_s26, %s2547_s27 }
0x1f56   :  { %s2549_s29 = sadd.f32 1e-05, %s2548_s28 }
0x1f58   :  { %v2550_v47 = vstv %s2549_s29 }
0x1f59   :  { %3688 = vrsqrt.f32 %v2550_v47 }
0x1f66   :  { %v3689_v60 = vpop.eup %3688 }
0x1f67   :  { %3634 = vpush %v3689_v60  ;;  %v3747_v60 = vld [vmem:[%s4755_s2 + $0x60] sm:$0xff] }
0x1f98   :  { %s3635_s30 = spop %3634 }
0x1f99   :  { %v2555_v62 = vstv %s3635_s30 }
0x1f9a   :  { %v2556_v52 = vmul.f32 %v3742_v49, %v2555_v62 }
0x1f9c   :  { %v2560_v54 = vrot.slane %v2556_v52, %v3970_v32  ;;  %v3748_v52 = vld [vmem:[%s4756_s3 + $0x16] ss:$0 sm:$0xff] }
0x1f9e   :  { %v2561_v56 = vmul.f32 %v2560_v54, %v2554_v33 }
0x1fa0   :  { %v2562_v3 = vadd.f32 %v3743_v59, %v2561_v56 }
0x1fa2   :  { %v2563_v4 = vrot.slane %v2562_v3, 7  ;;  %v2569_v6 = vrot.slane %v2562_v3, 1  ;;  %v2567_v12 = vmul.f32 %v2562_v3, %v4226_v38 }
0x1fa4   :  { %v2564_v8 = vsel %vm503_vm6, %v2563_v4, 0.0  ;;  %v2570_v10 = vsel %vm522_vm7, %v2569_v6, 0.0 }
0x1fa5   :  { %v2565_v13 = vmul.f32 %v2564_v8, %v4229_v40  ;;  %v2571_v17 = vmul.f32 %v2570_v10, %v4234_v45 }
0x1fa7   :  { %v2568_v16 = vadd.f32 %v2567_v12, %v2565_v13 }
0x1fa9   :  { %v2572_v18 = vadd.f32 %v2571_v17, %v2568_v16 }
0x1fab   :  { %v2573_v21 = vadd.f32 %v3744_v20, %v2572_v18 }
0x1fad   :  { %vm2574_vm13 = vcmp.ge.f32.partialorder %v2573_v21, 0.0  ;;  %v2575_v50 = vmul.f32 %v2573_v21, %v1149_v0 }
0x1faf   :  { %v2576_v22 = vsel %vm2574_vm13, %v2573_v21, %v2575_v50 }
0x1fb0   :  { %v2577_v51 = vsel %vm232_vm3, %v2576_v22, 0.0  ;;  %v2590_v39 = vmul.f32 %v2576_v22, %v2576_v22 }
0x1fb1   :  { %2578 = vadd.xlane.f32.xlu1 %v2577_v51 }
0x1fb2   :  { %v2591_v38 = vsel %vm232_vm3, %v2590_v39, 0.0 }
0x1fb5   :  { %2592 = vadd.xlane.f32.xlu1 %v2591_v38 }
0x203a   :  { %v2579_v40 = vpop.xlane.xlu1 %2578 }
0x203b   :  { %v2580_v2 = vrot.slane %v2579_v40, 4 }
0x203d   :  { %v2581_v45 = vadd.f32 %v2580_v2, %v2579_v40 }
0x203e   :  { %v2593_v23 = vpop.xlane.xlu1 %2592 }
0x203f   :  { %v2582_v24 = vrot.slane %v2581_v45, 2  ;;  %v2594_v25 = vrot.slane %v2593_v23, 4 }
0x2041   :  { %v2595_v26 = vadd.f32 %v2594_v25, %v2593_v23  ;;  %v2583_v27 = vadd.f32 %v2582_v24, %v2581_v45  ;;  %v3750_v24 = vld [vmem:[%s4756_s3 + $0x19] sm:$0x1] }
0x2043   :  { %v2596_v57 = vrot.slane %v2595_v26, 2  ;;  %v2584_v58 = vrot.slane %v2583_v27, 1 }
0x2045   :  { %v2585_v28 = vadd.f32 %v2584_v58, %v2583_v27  ;;  %v2597_v0 = vadd.f32 %v2596_v57, %v2595_v26  ;;  %v3751_v58 = vld [vmem:[%s4756_s3 + $0x1a] ss:$0 sm:$0xff] }
0x2047   :  { %3636 = vpush %v2585_v28  ;;  %v2598_v41 = vrot.slane %v2597_v0, 1 }
0x2049   :  { %v2599_v42 = vadd.f32 %v2598_v41, %v2597_v0 }
0x204b   :  { %3638 = vpush %v2599_v42 }
0x2078   :  { %s3637_s15 = spop %3636 }
0x2079   :  { %s2589_s18 = smul.f32 0.0078125, %s3637_s15 }
0x207b   :  { %s2604_s19 = smul.f32 %s2589_s18, %s2589_s18  ;;  %v2611_v29 = vstv %s2589_s18 }
0x207c   :  { %s3639_s9 = spop %3638  ;;  %v2612_v53 = vsub.f32 %v2576_v22, %v2611_v29 }
0x207d   :  { %s2603_s8 = smul.f32 0.0078125, %s3639_s9 }
0x207f   :  { %s2605_s20 = ssub.f32 %s2603_s8, %s2604_s19 }
0x2081   :  { %s2606_s21 = smax.f32 %s3799_s26, %s2605_s20 }
0x2082   :  { %s2607_s16 = sadd.f32 1e-05, %s2606_s21 }
0x2084   :  { %v2608_v61 = vstv %s2607_s16 }
0x2085   :  { %3690 = vrsqrt.f32 %v2608_v61 }
0x2092   :  { %v3691_v31 = vpop.eup %3690 }
0x2093   :  { %3640 = vpush %v3691_v31 }
0x20c4   :  { %s3641_s14 = spop %3640 }
0x20c5   :  { %v2613_v34 = vstv %s3641_s14 }
0x20c6   :  { %v2614_v43 = vmul.f32 %v3745_v37, %v2613_v34 }
0x20c8   :  { %v2618_v15 = vrot.slane %v2614_v43, %v3970_v32 }
0x20ca   :  { %v2619_v44 = vmul.f32 %v2618_v15, %v2612_v53  ;;  %v3752_v53 = vld [vmem:[%s4756_s3 + $0x1b] ss:$0 sm:$0xff] }
0x20cc   :  { %v2620_v47 = vadd.f32 %v3746_v46, %v2619_v44 }
0x20ce   :  { %3520 = vmatmul.mubr.msk.f32.vlgmr.msra.gmra.mxu0 %vm232_vm3, %v2620_v47 }
0x20cf   :  { %3523 = vmatpush3.msra.mxu0 %v3747_v60  ;;  %3524 = vmatprep.mubr.msk.f32.mxu0 %vm3797_vm1, %v3796_v1 }
0x20d0   :  { %3534 = vmatprep.subr.mxu0 %v3796_v1 }
0x218e   :  { %v2690_v7 = vpop.f32.mrf.mxu0 }
0x218f   :  { %v2694_v62 = vadd.f32 %v2690_v7, %v4621_v19  ;;  %v3749_v19 = vld [vmem:[%s4756_s3 + $0x18] ss:$0 sm:$0xff] }
0x2190   :  { %v3521_v49 = vpop.f32.mrf.mxu0 }
0x2191   :  { %v4683_v33 = vadd.f32 %v3748_v52, %v2694_v62 }
0x2193   :  { %3525 = vmatmul.mubr.msk.f32.vlgmr.msra.gmra.mxu0 %vm375_vm4, %v4683_v33 }
0x2194   :  { %3535 = vmatpush3.msra.mxu0 %v4362_v14  ;;  %3536 = vmatprep.mubr.msk.f32.mxu0 %vm3797_vm1, %v3796_v1 }
0x2253   :  { %v2765_v54 = vpop.f32.mrf.mxu0 }
0x2254   :  { %v2766_v56 = vadd.f32 %v3749_v19, %v2765_v54 }
0x2255   :  { %v3526_v59 = vpop.f32.mrf.mxu0 }
0x2256   :  { %v2770_v3 = vmul.f32 %v2766_v56, %v1372_v5  ;;  %vm2769_vm6 = vcmp.ge.f32.partialorder %v2766_v56, 0.0 }
0x2258   :  { %v2771_v4 = vsel %vm2769_vm6, %v2766_v56, %v2770_v3 }
0x2259   :  { %v2772_v6 = vsel %vm232_vm3, %v2771_v4, 0.0  ;;  %v2785_v8 = vmul.f32 %v2771_v4, %v2771_v4 }
0x225a   :  { %2773 = vadd.xlane.f32.xlu0 %v2772_v6 }
0x225b   :  { %v2786_v14 = vsel %vm232_vm3, %v2785_v8, 0.0 }
0x225c   :  { %2787 = vadd.xlane.f32.xlu1 %v2786_v14  ;;  %v3753_v14 = vld [vmem:[%s4756_s3 + $0x1c] sm:$0x1] }
0x22e3   :  { %v2774_v10 = vpop.xlane.xlu0 %2773 }
0x22e4   :  { %v2775_v12 = vrot.slane %v2774_v10, 4 }
0x22e5   :  { %v2788_v13 = vpop.xlane.xlu1 %2787 }
0x22e6   :  { %v2776_v16 = vadd.f32 %v2775_v12, %v2774_v10  ;;  %v2789_v17 = vrot.slane %v2788_v13, 4 }
0x22e8   :  { %v2777_v18 = vrot.slane %v2776_v16, 2  ;;  %v2790_v20 = vadd.f32 %v2789_v17, %v2788_v13  ;;  %v3754_v17 = vld [vmem:[%s4756_s3 + $0x1d] ss:$0 sm:$0xff] }
0x22ea   :  { %v2791_v21 = vrot.slane %v2790_v20, 2  ;;  %v2778_v50 = vadd.f32 %v2777_v18, %v2776_v16 }
0x22ec   :  { %v2779_v22 = vrot.slane %v2778_v50, 1  ;;  %v2792_v5 = vadd.f32 %v2791_v21, %v2790_v20  ;;  %v3755_v20 = vld [vmem:[%s4758_s5 + $0x68] sm:$0xff] }
0x22ee   :  { %v2780_v51 = vadd.f32 %v2779_v22, %v2778_v50  ;;  %v2793_v39 = vrot.slane %v2792_v5, 1 }
0x22f0   :  { %3642 = vpush %v2780_v51  ;;  %v2794_v38 = vadd.f32 %v2793_v39, %v2792_v5  ;;  %v3757_v5 = vld [vmem:[%s4756_s3 + $0x1e] ss:$0 sm:$0xff]  ;;  %s3123_s3 = sld [smem:[#allocation3 + $0x8]] }
0x22f2   :  { %3644 = vpush %v2794_v38 }
0x2321   :  { %s3643_s23 = spop %3642 }
0x2322   :  { %s2784_s1 = smul.f32 0.0078125, %s3643_s23 }
0x2323   :  { %s3645_s4 = spop %3644 }
0x2324   :  { %s2799_s12 = smul.f32 %s2784_s1, %s2784_s1  ;;  %v2806_v45 = vstv %s2784_s1 }
0x2325   :  { %s2798_s17 = smul.f32 0.0078125, %s3645_s4  ;;  %v2807_v26 = vsub.f32 %v2771_v4, %v2806_v45 }
0x2327   :  { %s2800_s15 = ssub.f32 %s2798_s17, %s2799_s12 }
0x2329   :  { %s2801_s18 = smax.f32 %s3799_s26, %s2800_s15 }
0x232a   :  { %s2802_s19 = sadd.f32 1e-05, %s2801_s18 }
0x232c   :  { %v2803_v40 = vstv %s2802_s19 }
0x232d   :  { %3692 = vrsqrt.f32 %v2803_v40 }
0x233a   :  { %v3693_v2 = vpop.eup %3692 }
0x233b   :  { %3646 = vpush %v3693_v2 }
0x236c   :  { %s3647_s9 = spop %3646 }
0x236d   :  { %v2808_v23 = vstv %s3647_s9 }
0x236e   :  { %v2809_v25 = vmul.f32 %v3750_v24, %v2808_v23 }
0x2370   :  { %v2813_v27 = vrot.slane %v2809_v25, %v3970_v32 }
0x2372   :  { %v2814_v57 = vmul.f32 %v2813_v27, %v2807_v26 }
0x2374   :  { %v2815_v28 = vadd.f32 %v3751_v58, %v2814_v57 }
0x2376   :  { %v2816_v0 = vrot.slane %v2815_v28, 6  ;;  %v2822_v41 = vrot.slane %v2815_v28, 2  ;;  %v2820_v31 = vmul.f32 %v2815_v28, %v4306_v11 }
0x2378   :  { %v2817_v42 = vsel %vm813_vm10, %v2816_v0, 0.0  ;;  %v2823_v61 = vsel %vm832_vm11, %v2822_v41, 0.0 }
0x2379   :  { %v2818_v29 = vmul.f32 %v2817_v42, %v4309_v63  ;;  %v2824_v37 = vmul.f32 %v2823_v61, %v4314_v48 }
0x237b   :  { %v2821_v34 = vadd.f32 %v2820_v31, %v2818_v29  ;;  %v1741_v31 = vstv %s3123_s3 }
0x237d   :  { %v2825_v43 = vadd.f32 %v2824_v37, %v2821_v34 }
0x237f   :  { %v2826_v15 = vadd.f32 %v3752_v53, %v2825_v43 }
0x2381   :  { %vm2827_vm7 = vcmp.ge.f32.partialorder %v2826_v15, 0.0  ;;  %v2828_v35 = vmul.f32 %v2826_v15, %v1451_v55 }
0x2383   :  { %v2829_v44 = vsel %vm2827_vm7, %v2826_v15, %v2828_v35 }
0x2384   :  { %v2830_v36 = vsel %vm232_vm3, %v2829_v44, 0.0  ;;  %v2843_v46 = vmul.f32 %v2829_v44, %v2829_v44 }
0x2385   :  { %2831 = vadd.xlane.f32.xlu0 %v2830_v36 }
0x2386   :  { %v2844_v11 = vsel %vm232_vm3, %v2843_v46, 0.0 }
0x2387   :  { %2845 = vadd.xlane.f32.xlu1 %v2844_v11 }
0x239b   :  { %1733 = vrot.lane.b32.xlu0 %v4476_v30, %s3798_s13 }
0x240e   :  { %v2832_v63 = vpop.xlane.xlu0 %2831 }
0x240f   :  { %v2833_v48 = vrot.slane %v2832_v63, 4 }
0x2410   :  { %v2846_v47 = vpop.xlane.xlu1 %2845 }
0x2411   :  { %v2834_v60 = vadd.f32 %v2833_v48, %v2832_v63  ;;  %v2847_v7 = vrot.slane %v2846_v47, 4 }
0x2412   :  { %v1734_v23 = vpop.permute.xlu0 %1733 }
0x2413   :  { %v2835_v62 = vrot.slane %v2834_v60, 2  ;;  %v2848_v49 = vadd.f32 %v2847_v7, %v2846_v47  ;;  %v1735_v24 = vrot.slane %v1734_v23, 4 }
0x2415   :  { %v2849_v52 = vrot.slane %v2848_v49, 2  ;;  %v2836_v55 = vadd.f32 %v2835_v62, %v2834_v60  ;;  %v1736_v25 = vadd.f32 %v1735_v24, %v1734_v23 }
0x2417   :  { %v2837_v54 = vrot.slane %v2836_v55, 1  ;;  %v2850_v19 = vadd.f32 %v2849_v52, %v2848_v49  ;;  %v1737_v26 = vrot.slane %v1736_v25, 2 }
0x2419   :  { %v2838_v56 = vadd.f32 %v2837_v54, %v2836_v55  ;;  %v2851_v59 = vrot.slane %v2850_v19, 1  ;;  %v1738_v57 = vadd.f32 %v1737_v26, %v1736_v25 }
0x241b   :  { %3648 = vpush %v2838_v56  ;;  %v2852_v3 = vadd.f32 %v2851_v59, %v2850_v19  ;;  %v1739_v0 = vrot.slane %v1738_v57, 1 }
0x241d   :  { %3650 = vpush %v2852_v3  ;;  %v1740_v61 = vadd.f32 %v1739_v0, %v1738_v57 }
0x241f   :  { %v1742_v34 = vadd.f32 %v1741_v31, %v1740_v61 }
0x244c   :  { %s3649_s25 = spop %3648 }
0x244d   :  { %s2842_s11 = smul.f32 0.0078125, %s3649_s25 }
0x244e   :  { %s3651_s24 = spop %3650 }
0x244f   :  { %s2857_s27 = smul.f32 %s2842_s11, %s2842_s11  ;;  %v2864_v6 = vstv %s2842_s11 }
0x2450   :  { %s2856_s28 = smul.f32 0.0078125, %s3651_s24  ;;  %v2865_v12 = vsub.f32 %v2829_v44, %v2864_v6 }
0x2452   :  { %s2858_s29 = ssub.f32 %s2856_s28, %s2857_s27 }
0x2454   :  { %s2859_s30 = smax.f32 %s3799_s26, %s2858_s29 }
0x2455   :  { %s2860_s0 = sadd.f32 1e-05, %s2859_s30 }
0x2457   :  { %v2861_v30 = vstv %s2860_s0 }
0x2458   :  { %3694 = vrsqrt.f32 %v2861_v30 }
0x2465   :  { %v3695_v4 = vpop.eup %3694 }
0x2466   :  { %3652 = vpush %v3695_v4 }
0x2497   :  { %s3653_s2 = spop %3652 }
0x2498   :  { %v2866_v8 = vstv %s3653_s2 }
0x2499   :  { %v2867_v10 = vmul.f32 %v3753_v14, %v2866_v8 }
0x249b   :  { %v2871_v13 = vrot.slane %v2867_v10, %v3970_v32  ;;  %v3756_v32 = vld [vmem:[%s4758_s5 + $0x60] sm:$0xff]  ;;  %s3800_s5 = smov [#allocation4]  }
0x249d   :  { %v2872_v16 = vmul.f32 %v2871_v13, %v2865_v12 }
0x249f   :  { %v2873_v18 = vadd.f32 %v3754_v17, %v2872_v16 }
0x24a1   :  { %3532 = vmatmul.mubr.msk.f32.vlgmr.msra.gmra.mxu1 %vm232_vm3, %v2873_v18 }
0x24a2   :  { %3540 = vmatpush3.msra.mxu1 %v3755_v20  ;;  %3543 = vmatprep.mubr.msk.f32.mxu1 %vm3797_vm1, %v3796_v1  ;;  %vm3106_vm1 = vcmask 1040384  }
0x24a3   :  { %3541 = vmatprep.subr.mxu1 %v3796_v1  ;;  %v3758_v1 = vld [vmem:[%s4759_s6 + $0x4] ss:$0 sm:$0xff]  ;;  %s3115_s6 = sshll.u32 %s3800_s5, 4  ;;  %s3116_s6 = int_to_ptr.vmem [resolvable:$true] %s3115_s6 }
0x24a4   :  { %3542 = vmatpush3.msra.mxu1 %v3756_v32  ;;  %p3776_p6 = scmp.lt.s32.totalorder %s3116_s6, %s3116_s6 }
0x2561   :  { %v2943_v21 = vpop.f32.mrf.mxu1 }
0x2562   :  { %v2947_v50 = vadd.f32 %v2943_v21, %v4683_v33 }
0x2563   :  { %v3533_v22 = vpop.f32.mrf.mxu1 }
0x2564   :  { %v2948_v51 = vadd.f32 %v3757_v5, %v2947_v50 }
0x2566   :  { %3537 = vmatmul.mubr.msk.f32.vlgmr.msra.gmra.mxu0 %vm375_vm4, %v2948_v51 }
0x2626   :  { %v3018_v39 = vpop.f32.mrf.mxu0 }
0x2627   :  { %v3019_v38 = vadd.f32 %v3758_v1, %v3018_v39 }
0x2628   :  { %v3538_v40 = vpop.f32.mrf.mxu0 }
0x2629   :  { %v3022_v2 = vmul.f32 %v3019_v38, %v4469_v9 }
0x262b   :  { %3544 = vmatmul.mubr.msk.f32.vlgmr.msra.gmra.mxu1 %vm232_vm3, %v3022_v2 }
0x26eb   :  { %v3092_v33 = vpop.f32.mrf.mxu1 }
0x26ec   :  { %3097 = vrot.lane.b32.xlu1 %v3092_v33, %s3798_s13  ;;  %s3771_s13 = scalar_lea.vmem %s3116_s6, 32 }
0x26ed   :  { %v3545_v45 = vpop.f32.mrf.mxu1  ;;  %p3772_p5 = scmp.ne.s32.totalorder %s3116_s6, %s3771_s13  ;;  %p3777_p7 = scmp.lt.s32.totalorder %s3771_s13, %s3771_s13 }
0x26ef   :  { %p3778_p8 = por %p3777_p7, %p3776_p6 }
0x26f1   :  { %p3779_p9 = pnand %p3778_p8, %p3772_p5 }
0x275e   :  { %v3098_v27 = vpop.permute.xlu1 %3097 }
0x275f   :  { %v3099_v58 = vrot.slane %v3098_v27, 4 }
0x2761   :  { %v3100_v28 = vadd.f32 %v3099_v58, %v3098_v27 }
0x2763   :  { %v3101_v41 = vrot.slane %v3100_v28, 2 }
0x2765   :  { %v3102_v42 = vadd.f32 %v3101_v41, %v3100_v28 }
0x2767   :  { %v3103_v9 = vrot.slane %v3102_v42, 1 }
0x2769   :  { %v3104_v29 = vadd.f32 %v3103_v9, %v3102_v42 }
0x276b   :  { %v3105_v37 = vadd.f32 %v3104_v29, %v1741_v31 }
0x276d   :  { %v3107_v43 = vsel %vm3106_vm1, %v1742_v34, %v3105_v37 }
0x276e   :  { %3108 = vst [vmem:[#allocation4] sm:$0x3] %v3107_v43 }
0x276f   :  { %3782 = shalt.err (!%p3779_p9)
}
0x2770   :  { %3118 = dma.vmem_to_hbm [thread:$0]  %s3116_s6, 32, %s4760_s7, [#allocation5]  }
0x2771   :  { %3793 = dma.done.wait [#allocation5], 32  }
0x2772   :  { %3794 = vsyncadd [#allocation5], 4294967264 }
0x2773   :  { %3122 = vsyncpa [#allocation5], 1 }

</bundles_post_ra>
